<compile_context>
chip_gen: v6e
topology: v6e:2x2x1
jax: 0.10.0
libtpu: 0.0.40
codegen_flags: <defaults>
</compile_context>

<pallas_src>
import functools

import jax
import jax.numpy as jnp
import numpy as np
from jax import lax
from jax.experimental import pallas as pl
from jax.experimental.pallas import tpu as pltpu

LANE = 128       # vreg lane width  (last-dim tiling unit)
SUBLANE = 8      # vreg sublane width (second-to-last-dim tiling unit)


def _round_up(x, m):
    return (x + m - 1) // m * m


def _default_vmem_limit():
    """Generation-aware scoped-VMEM budget.

    ~3/4 of physical VMEM, capped at 96 MiB: v5e/v6e (128 MiB) -> 96 MiB,
    v7x (64 MiB per TC) -> 48 MiB.  Falls back to a v7x-safe 48 MiB.
    """
    try:
        cap = int(pltpu.get_tpu_info().vmem_capacity_bytes)
        return int(min(cap * 3 // 4, 96 * 1024 * 1024))
    except Exception:  # noqa: BLE001  (query unavailable -> conservative)
        return 48 * 1024 * 1024


VMEM_LIMIT = _default_vmem_limit()


def _aligned_ds(idx, size):
    """pl.ds with a sublane-alignment hint when the start is dynamic."""
    if not isinstance(idx, int):
        idx = pl.multiple_of(idx, SUBLANE)
    return pl.ds(idx, size)


# ---------------------------------------------------------------------------
# Tiled matmul + bias kernel (final vocab projection).
# ---------------------------------------------------------------------------
def _matmul_bias_kernel(x_ref, w_ref, b_ref, o_ref):
    o_ref[...] = (jnp.dot(x_ref[...], w_ref[...],
                          preferred_element_type=jnp.float32)
                  + b_ref[...]).astype(o_ref.dtype)


def matmul_bias(x, w_t, b_row, n_cols, *, tile_n=1024, tile_v=1024):
    """x: (N, K) @ w_t: (K, Vp) + b_row: (1, Vp) -> (N, n_cols) f32.

    w_t / b_row arrive pre-padded (Vp a multiple of 128, padded columns zero)
    from prepare_params, so interior tiles get unmasked lane-dense stores.
    The output is emitted at its TRUE shape (N, n_cols): only the final
    partial row/column block (if any) uses masked stores, and no post-kernel
    slice / re-copy of the logits is needed.
    """
    N, K = x.shape
    Vp = w_t.shape[1]
    tn = min(tile_n, _round_up(N, SUBLANE))
    tv = min(tile_v, Vp)
    grid = (pl.cdiv(N, tn), pl.cdiv(Vp, tv))

    itemsize = jnp.dtype(x.dtype).itemsize
    cost = pl.CostEstimate(
        flops=int(2 * N * K * Vp),
        transcendentals=0,
        bytes_accessed=int(itemsize * (N * K + grid[0] * K * Vp)
                           + 4 * (N * n_cols + Vp)))

    return pl.pallas_call(
        _matmul_bias_kernel,
        out_shape=jax.ShapeDtypeStruct((N, n_cols), jnp.float32),
        grid_spec=pltpu.PrefetchScalarGridSpec(
            num_scalar_prefetch=0,
            grid=grid,
            in_specs=[
                pl.BlockSpec((tn, K), lambda i, j: (i, 0)),
                pl.BlockSpec((K, tv), lambda i, j: (0, j)),
                pl.BlockSpec((1, tv), lambda i, j: (0, j)),
            ],
            out_specs=pl.BlockSpec((tn, tv), lambda i, j: (i, j)),
        ),
        compiler_params=pltpu.CompilerParams(
            dimension_semantics=("parallel", "parallel"),
            vmem_limit_bytes=VMEM_LIMIT),
        cost_estimate=cost,
    )(x, w_t, b_row)


# ---------------------------------------------------------------------------
# Fused 2-layer LSTM kernel.
#   * Per chunk: one big MXU matmul computes all layer-0 input gates into a
#     VMEM scratch (no HBM round trip).
#   * Recurrent state: hcat = [h0 | h1] (mm_dtype), c0/c1 (f32) in VMEM.
#   * One-timestep stagger between the layers inside the time loop.
# Gate order matches PyTorch: [i, f, g, o]; Hp is a multiple of 128 so every
# gate slice is lane-aligned (gate-blockwise zero padding is exact).
# ---------------------------------------------------------------------------
def _fused_lstm2_kernel(emb_ref, wih0_ref, b0_ref, whh0_ref, w1_ref, b1_ref,
                        h_init_ref, c_init_ref,
                        out_ref, hN_ref, cN_ref,
                        gx0_sc, hcat_sc, c0_sc, c1_sc,
                        *, hp, bp, ts, seq_len, mm_dtype, masked, unroll):
    chunk = pl.program_id(0)

    @pl.when(chunk == 0)
    def _():
        hcat_sc[:, :hp] = h_init_ref[0].astype(mm_dtype)
        hcat_sc[:, hp:] = h_init_ref[1].astype(mm_dtype)
        c0_sc[...] = c_init_ref[0]
        c1_sc[...] = c_init_ref[1]

    bias0 = b0_ref[...]                        # (1, 4*hp), loop-invariant
    bias1 = b1_ref[...]                        # (1, 4*hp), loop-invariant

    # Time-parallel layer-0 input projection for the whole chunk: one big,
    # MXU-friendly matmul straight into VMEM scratch.
    gx0_sc[...] = (jnp.dot(emb_ref[...], wih0_ref[...],
                           preferred_element_type=jnp.float32) + bias0)

    def cell(gates, c_prev):
        # Lane-aligned gate slices; sigmoid/tanh go to the EUP, math in f32.
        i_g = jax.nn.sigmoid(gates[:, 0 * hp:1 * hp])
        f_g = jax.nn.sigmoid(gates[:, 1 * hp:2 * hp])
        g_g = jnp.tanh(gates[:, 2 * hp:3 * hp])
        o_g = jax.nn.sigmoid(gates[:, 3 * hp:4 * hp])
        c_new = f_g * c_prev + i_g * g_g
        h_new = o_g * jnp.tanh(c_new)
        return h_new, c_new

    def layer0_step(t):
        # Layer-0 at local timestep t; returns new h0 (f32), updates c0.
        h0_prev = hcat_sc[:, :hp]              # already mm_dtype: no re-cast
        row = t * bp
        gates0 = (gx0_sc[_aligned_ds(row, bp), :]
                  + jnp.dot(h0_prev, whh0_ref[...],
                            preferred_element_type=jnp.float32))
        h0n, c0n = cell(gates0, c0_sc[...])
        if masked:                             # static: only for padded tail
            valid = (chunk * ts + t) < seq_len
            h0n = jnp.where(valid, h0n, h0_prev.astype(jnp.float32))
            c0n = jnp.where(valid, c0n, c0_sc[...])
        c0_sc[...] = c0n
        return h0n

    def layer1_step(t):
        # Layer-1 at local timestep t.  hcat currently holds [h0_t | h1_{t-1}]
        # so BOTH of its matmuls fold into one jnp.dot against the
        # pre-concatenated (2Hp, 4Hp) weight.
        gates1 = (jnp.dot(hcat_sc[...], w1_ref[...],
                          preferred_element_type=jnp.float32) + bias1)
        h1n, c1n = cell(gates1, c1_sc[...])
        row = t * bp
        out_ref[_aligned_ds(row, bp), :] = h1n.astype(out_ref.dtype)
        if masked:
            valid = (chunk * ts + t) < seq_len
            h1n = jnp.where(valid, h1n, hcat_sc[:, hp:].astype(jnp.float32))
            c1n = jnp.where(valid, c1n, c1_sc[...])
        c1_sc[...] = c1n
        return h1n

    # One-timestep software stagger between the layers: iteration t computes
    # layer-0 step t and layer-1 step t-1 so their matmuls are independent.
    h0_first = layer0_step(0)                  # prologue: layer-0 step 0
    hcat_sc[:, :hp] = h0_first.astype(mm_dtype)

    def step(t, carry):
        h0n = layer0_step(t)                   # independent of the dot below
        h1n = layer1_step(t - 1)
        hcat_sc[:, :hp] = h0n.astype(mm_dtype)
        hcat_sc[:, hp:] = h1n.astype(mm_dtype)
        return carry

    lax.fori_loop(1, ts, step, 0, unroll=unroll)

    h1_last = layer1_step(ts - 1)              # epilogue: layer-1 step ts-1
    hcat_sc[:, hp:] = h1_last.astype(mm_dtype)

    @pl.when(chunk == pl.num_programs(0) - 1)
    def _():
        hN_ref[0] = hcat_sc[:, :hp].astype(jnp.float32)
        hN_ref[1] = hcat_sc[:, hp:].astype(jnp.float32)
        cN_ref[0] = c0_sc[...]
        cN_ref[1] = c1_sc[...]


def _pick_chunk(S, bp, hp, e, max_chunk, budget_bytes=24 * 1024 * 1024):
    """Largest chunk length whose per-chunk VMEM footprint fits the budget."""
    per_t = bp * (4 * hp * 4        # gx0 scratch (f32)
                  + hp * 4 * 2      # double-buffered out chunk (f32)
                  + e * 4 * 2)      # double-buffered embeds chunk (<= f32)
    ts = int(max(1, min(max_chunk, S, budget_bytes // per_t)))
    if ts > 1:
        ts -= ts % 2                # keep ts*bp a multiple of 16 (bf16-safe)
    return ts


def fused_lstm2(embeds_2d, wih0_t, b0_row, whh0_t, w1cat, b1_row,
                h_init, c_init, *, bp, mm_dtype, max_chunk=256):
    """Both LSTM layers fused; whole (chunked) time loop inside the kernel.

    embeds_2d: (S*bp, E) mm_dtype, rows ordered (t, b)
    wih0_t: (E, 4Hp);  whh0_t: (Hp, 4Hp);  w1cat: (2Hp, 4Hp) = [wih1^T; whh1^T]
    b0_row/b1_row: (1, 4Hp) f32 combined biases
    h_init, c_init: (2, bp, Hp) f32 initial states
    Returns out (S_pad*bp, Hp) f32, h_n (2, bp, Hp), c_n (2, bp, Hp).
    """
    SBp, E = embeds_2d.shape
    S = SBp // bp
    Hp = whh0_t.shape[0]
    G = 4 * Hp

    ts = _pick_chunk(S, bp, Hp, E, max_chunk)
    S_pad = _round_up(S, ts)
    masked = S_pad != S
    if masked:
        embeds_2d = jnp.pad(embeds_2d, ((0, (S_pad - S) * bp), (0, 0)))
    n_chunks = S_pad // ts

    kernel = functools.partial(
        _fused_lstm2_kernel, hp=Hp, bp=bp, ts=ts, seq_len=S,
        mm_dtype=mm_dtype, masked=masked,
        unroll=True if ts <= 16 else 8)

    itemsize = jnp.dtype(mm_dtype).itemsize
    cost = pl.CostEstimate(
        flops=int(2 * S_pad * bp * G * (E + 3 * Hp)),
        transcendentals=int(10 * S_pad * bp * Hp),
        bytes_accessed=int(itemsize * (S_pad * bp * E + (E + 3 * Hp) * G)
                           + 4 * (S_pad * bp * Hp + 8 * bp * Hp + 2 * G)))

    out_shapes = (
        jax.ShapeDtypeStruct((S_pad * bp, Hp), jnp.float32),
        jax.ShapeDtypeStruct((2, bp, Hp), jnp.float32),
        jax.ShapeDtypeStruct((2, bp, Hp), jnp.float32),
    )
    return pl.pallas_call(
        kernel,
        out_shape=out_shapes,
        grid_spec=pltpu.PrefetchScalarGridSpec(
            num_scalar_prefetch=0,
            grid=(n_chunks,),
            in_specs=[
                pl.BlockSpec((ts * bp, E), lambda c: (c, 0)),    # embeds chunk
                pl.BlockSpec((E, G), lambda c: (0, 0)),          # wih0^T
                pl.BlockSpec((1, G), lambda c: (0, 0)),          # bias0
                pl.BlockSpec((Hp, G), lambda c: (0, 0)),         # whh0^T
                pl.BlockSpec((2 * Hp, G), lambda c: (0, 0)),     # [wih1^T;whh1^T]
                pl.BlockSpec((1, G), lambda c: (0, 0)),          # bias1
                pl.BlockSpec((2, bp, Hp), lambda c: (0, 0, 0)),  # h_init
                pl.BlockSpec((2, bp, Hp), lambda c: (0, 0, 0)),  # c_init
            ],
            out_specs=(
                pl.BlockSpec((ts * bp, Hp), lambda c: (c, 0)),   # all h1_t
                pl.BlockSpec((2, bp, Hp), lambda c: (0, 0, 0)),  # h_n
                pl.BlockSpec((2, bp, Hp), lambda c: (0, 0, 0)),  # c_n
            ),
            scratch_shapes=[
                pltpu.VMEM((ts * bp, G), jnp.float32),   # gx0 for the chunk
                pltpu.VMEM((bp, 2 * Hp), mm_dtype),      # [h0 | h1]
                pltpu.VMEM((bp, Hp), jnp.float32),       # c0
                pltpu.VMEM((bp, Hp), jnp.float32),       # c1
            ],
        ),
        compiler_params=pltpu.CompilerParams(
            dimension_semantics=("arbitrary",),          # time is sequential
            vmem_limit_bytes=VMEM_LIMIT),
        cost_estimate=cost,
    )(embeds_2d, wih0_t, b0_row, whh0_t, w1cat, b1_row, h_init, c_init)


# ---------------------------------------------------------------------------
# One-time parameter preparation (hoisted out of the forward pass):
# gate-blockwise padding H -> Hp (multiple of 128), transposes, dtype casts,
# layer-1 weight concatenation, 128-padded vocab weight/bias.
# Padded rows/cols are zero, so padded hidden units stay exactly zero through
# the recurrence (math is unchanged).
# ---------------------------------------------------------------------------
def _pad_lstm_params(w_ih, w_hh, b_ih, b_hh, hp, in_pad):
    four_h, din = w_ih.shape
    h = four_h // 4
    w_ih_p = jnp.pad(w_ih.reshape(4, h, din),
                     ((0, 0), (0, hp - h), (0, in_pad - din))
                     ).reshape(4 * hp, in_pad)
    w_hh_p = jnp.pad(w_hh.reshape(4, h, h),
                     ((0, 0), (0, hp - h), (0, hp - h))).reshape(4 * hp, hp)
    b_p = jnp.pad((b_ih + b_hh).reshape(4, h),
                  ((0, 0), (0, hp - h))).reshape(4 * hp)
    return w_ih_p, w_hh_p, b_p


def prepare_params(params, *, mm_dtype=jnp.bfloat16):
    """Run once at parameter-load time; returns only arrays (jit-friendly)."""
    V, E = params["embedding"].shape
    H = params["w_hh_l0"].shape[1]
    Hp = _round_up(H, LANE)
    Vp = _round_up(V, LANE)
    G = 4 * Hp

    wih0, whh0, b0 = _pad_lstm_params(params["w_ih_l0"], params["w_hh_l0"],
                                      params["b_ih_l0"], params["b_hh_l0"],
                                      Hp, in_pad=E)
    wih1, whh1, b1 = _pad_lstm_params(params["w_ih_l1"], params["w_hh_l1"],
                                      params["b_ih_l1"], params["b_hh_l1"],
                                      Hp, in_pad=Hp)

    lin_w = jnp.pad(params["linear_w"], ((0, Vp - V), (0, Hp - H)))  # (Vp, Hp)
    lin_b = jnp.pad(params["linear_b"].astype(jnp.float32), (0, Vp - V))

    return {
        "emb": params["embedding"].astype(mm_dtype),               # (V, E)
        "wih0_t": jnp.transpose(wih0).astype(mm_dtype),            # (E, 4Hp)
        "b0": b0.astype(jnp.float32).reshape(1, G),
        "whh0_t": jnp.transpose(whh0).astype(mm_dtype),            # (Hp, 4Hp)
        "w1cat": jnp.concatenate([jnp.transpose(wih1),
                                  jnp.transpose(whh1)],
                                 axis=0).astype(mm_dtype),         # (2Hp, 4Hp)
        "b1": b1.astype(jnp.float32).reshape(1, G),
        "lin_wt": jnp.transpose(lin_w).astype(mm_dtype),           # (Hp, Vp)
        "lin_b": lin_b.reshape(1, Vp),
    }


# ---------------------------------------------------------------------------
# Full RNNModel forward.
# ---------------------------------------------------------------------------
def rnn_model_forward(prep, x_ids, hidden=None, *, hidden_dim,
                      mm_dtype=jnp.bfloat16, max_chunk=256):
    """x_ids: (seq_len, batch) int32. Returns (logits (S*B, V), (h_n, c_n))."""
    S, B = x_ids.shape
    V, E = prep["emb"].shape
    Hp = prep["whh0_t"].shape[0]
    H = hidden_dim
    Bp = _round_up(B, SUBLANE)

    # Embedding lookup stays as plain-JAX gather glue (table pre-cast once).
    # NOTE: padded batch rows (token id 0) produce garbage h/c that is sliced
    # away below; never read h_n/c_n beyond [:, :B].
    x_pad = x_ids if Bp == B else jnp.pad(x_ids, ((0, 0), (0, Bp - B)))
    embeds = jnp.take(prep["emb"], x_pad, axis=0)        # (S, Bp, E)
    embeds_2d = embeds.reshape(S * Bp, E)

    if hidden is None:
        h_init = jnp.zeros((2, Bp, Hp), jnp.float32)
        c_init = jnp.zeros((2, Bp, Hp), jnp.float32)
    else:
        h_in, c_in = hidden   # each (2, B, H)
        h_init = jnp.pad(h_in.astype(jnp.float32),
                         ((0, 0), (0, Bp - B), (0, Hp - H)))
        c_init = jnp.pad(c_in.astype(jnp.float32),
                         ((0, 0), (0, Bp - B), (0, Hp - H)))

    # Fused 2-layer LSTM (layer-0 input projection computed per-chunk inside).
    out, h_n, c_n = fused_lstm2(embeds_2d, prep["wih0_t"], prep["b0"],
                                prep["whh0_t"], prep["w1cat"], prep["b1"],
                                h_init, c_init, bp=Bp, mm_dtype=mm_dtype,
                                max_chunk=max_chunk)

    # Valid (S, B) rows of layer-1's hidden states feed the vocab projection.
    rows = out.shape[0]
    if Bp == B:
        feats = out if rows == S * B else out[:S * B]
    else:
        feats = out.reshape(rows // Bp, Bp, Hp)[:S, :B].reshape(S * B, Hp)

    # Final vocab projection: true-shaped (S*B, V) output, no post-slice.
    logits = matmul_bias(feats.astype(mm_dtype), prep["lin_wt"], prep["lin_b"],
                         V, tile_n=1024, tile_v=1024)

    return logits, (h_n[:, :B, :H], c_n[:, :B, :H])


# ---------------------------------------------------------------------------
# Pure-JAX reference (correctness check).
# ---------------------------------------------------------------------------
def _ref_lstm_layer(x, w_ih, w_hh, b_ih, b_hh, h0, c0):
    def step(carry, x_t):
        h, c = carry
        gates = x_t @ w_ih.T + b_ih + h @ w_hh.T + b_hh
        i, f, g, o = jnp.split(gates, 4, axis=-1)
        i, f, o = jax.nn.sigmoid(i), jax.nn.sigmoid(f), jax.nn.sigmoid(o)
        g = jnp.tanh(g)
        c = f * c + i * g
        h = o * jnp.tanh(c)
        return (h, c), h

    (h, c), out = jax.lax.scan(step, (h0, c0), x)
    return out, h, c


def _ref_forward(params, x_ids, hidden=None):
    S, B = x_ids.shape
    H = params["w_hh_l0"].shape[1]
    if hidden is None:
        h0 = jnp.zeros((2, B, H), jnp.float32)
        c0 = jnp.zeros((2, B, H), jnp.float32)
    else:
        h0, c0 = hidden
    embeds = jnp.take(params["embedding"], x_ids, axis=0)
    out0, hA, cA = _ref_lstm_layer(embeds, params["w_ih_l0"], params["w_hh_l0"],
                                   params["b_ih_l0"], params["b_hh_l0"],
                                   h0[0], c0[0])
    out1, hB, cB = _ref_lstm_layer(out0, params["w_ih_l1"], params["w_hh_l1"],
                                   params["b_ih_l1"], params["b_hh_l1"],
                                   h0[1], c0[1])
    logits = out1.reshape(S * B, H) @ params["linear_w"].T + params["linear_b"]
    return logits, (jnp.stack([hA, hB]), jnp.stack([cA, cB]))


# ---------------------------------------------------------------------------
# Deterministic parameter init (shapes match the PyTorch module __init__).
# ---------------------------------------------------------------------------
def init_params(key, vocab_size, embedding_dim, hidden_dim):
    ks = jax.random.split(key, 12)
    H, E, V = hidden_dim, embedding_dim, vocab_size
    s = 1.0 / jnp.sqrt(H)
    u = lambda k, shape: jax.random.uniform(k, shape, jnp.float32, -s, s)
    return {
        "embedding": jax.random.normal(ks[0], (V, E), jnp.float32),
        "w_ih_l0": u(ks[1], (4 * H, E)),
        "w_hh_l0": u(ks[2], (4 * H, H)),
        "b_ih_l0": u(ks[3], (4 * H,)),
        "b_hh_l0": u(ks[4], (4 * H,)),
        "w_ih_l1": u(ks[5], (4 * H, H)),
        "w_hh_l1": u(ks[6], (4 * H, H)),
        "b_ih_l1": u(ks[7], (4 * H,)),
        "b_hh_l1": u(ks[8], (4 * H,)),
        "linear_w": u(ks[9], (V, H)),
        "linear_b": u(ks[10], (V,)),
    }


if __name__ == "__main__":
    vocab_size, embedding_dim, hidden_dim = 50, 32, 32
    seq_len, batch = 8, 8

    key = jax.random.PRNGKey(0)
    k_param, k_ids, k_h, k_c = jax.random.split(key, 4)
    params = init_params(k_param, vocab_size, embedding_dim, hidden_dim)
    x_ids = jax.random.randint(k_ids, (seq_len, batch), 0, vocab_size,
                               dtype=jnp.int32)

    # One-time weight preprocessing (hoisted out of the forward pass).
    prep_bf16 = prepare_params(params, mm_dtype=jnp.bfloat16)
    prep_f32 = prepare_params(params, mm_dtype=jnp.float32)

    fwd_bf16 = jax.jit(functools.partial(rnn_model_forward,
                                         hidden_dim=hidden_dim,
                                         mm_dtype=jnp.bfloat16))
    fwd_f32 = jax.jit(functools.partial(rnn_model_forward,
                                        hidden_dim=hidden_dim,
                                        mm_dtype=jnp.float32))
    # Small max_chunk forces the multi-chunk + masked-tail + stagger-carry path.
    fwd_f32_chunked = jax.jit(functools.partial(rnn_model_forward,
                                                hidden_dim=hidden_dim,
                                                mm_dtype=jnp.float32,
                                                max_chunk=6))

    ref_logits, (ref_h, ref_c) = _ref_forward(params, x_ids)

    # Production path: bf16 matmuls / bf16 h state, f32 accumulation & gates.
    logits, (h_n, c_n) = jax.block_until_ready(fwd_bf16(prep_bf16, x_ids))
    assert logits.shape == (seq_len * batch, vocab_size)
    assert h_n.shape == (2, batch, hidden_dim)
    assert c_n.shape == (2, batch, hidden_dim)
    np.testing.assert_allclose(np.asarray(logits), np.asarray(ref_logits),
                               rtol=5e-2, atol=5e-2)
    np.testing.assert_allclose(np.asarray(h_n), np.asarray(ref_h),
                               rtol=5e-2, atol=5e-2)
    np.testing.assert_allclose(np.asarray(c_n), np.asarray(ref_c),
                               rtol=5e-2, atol=5e-2)

    # Exactness check: f32 everywhere, tight tolerance.
    logits32, (h32, c32) = jax.block_until_ready(fwd_f32(prep_f32, x_ids))
    np.testing.assert_allclose(np.asarray(logits32), np.asarray(ref_logits),
                               rtol=1e-4, atol=1e-4)
    np.testing.assert_allclose(np.asarray(h32), np.asarray(ref_h),
                               rtol=1e-4, atol=1e-4)
    np.testing.assert_allclose(np.asarray(c32), np.asarray(ref_c),
                               rtol=1e-4, atol=1e-4)

    # Multi-chunk / masked padded-tail path (exercises chunk-boundary carry).
    logits_ck, (h_ck, c_ck) = jax.block_until_ready(
        fwd_f32_chunked(prep_f32, x_ids))
    np.testing.assert_allclose(np.asarray(logits_ck), np.asarray(ref_logits),
                               rtol=1e-4, atol=1e-4)
    np.testing.assert_allclose(np.asarray(h_ck), np.asarray(ref_h),
                               rtol=1e-4, atol=1e-4)
    np.testing.assert_allclose(np.asarray(c_ck), np.asarray(ref_c),
                               rtol=1e-4, atol=1e-4)

    # hidden-provided path (forward(x, hidden) branch of the module).
    h_in = 0.1 * jax.random.normal(k_h, (2, batch, hidden_dim), jnp.float32)
    c_in = 0.1 * jax.random.normal(k_c, (2, batch, hidden_dim), jnp.float32)
    logits_h, (hh, ch) = jax.block_until_ready(
        fwd_f32(prep_f32, x_ids, (h_in, c_in)))
    ref_lh, (ref_hh, ref_ch) = _ref_forward(params, x_ids, (h_in, c_in))
    np.testing.assert_allclose(np.asarray(logits_h), np.asarray(ref_lh),
                               rtol=1e-4, atol=1e-4)
    np.testing.assert_allclose(np.asarray(hh), np.asarray(ref_hh),
                               rtol=1e-4, atol=1e-4)
    np.testing.assert_allclose(np.asarray(ch), np.asarray(ref_ch),
                               rtol=1e-4, atol=1e-4)

    print("KERNEL_OK")
</pallas_src>

<mosaic_0001>
module attributes {stable_mosaic.version = 11 : i64} {
  func.func @_matmul_bias_kernel(%arg0: i32, %arg1: i32, %arg2: memref<64x128xbf16, #tpu.memory_space<vmem>>, %arg3: memref<128x128xbf16, #tpu.memory_space<vmem>>, %arg4: memref<1x128xf32, #tpu.memory_space<vmem>>, %arg5: memref<64x128xf32, #tpu.memory_space<vmem>>) attributes {dimension_semantics = [#tpu.dimension_semantics<parallel>, #tpu.dimension_semantics<parallel>], iteration_bounds = array<i64: 1, 1>, scalar_prefetch = 0 : i64, scratch_operands = 0 : i64, tpu.core_type = #tpu.core_type<tc>, window_params = [{transform_indices = @transform_0, window_bounds = array<i64: 64, 128>}, {transform_indices = @transform_1, window_bounds = array<i64: 128, 128>}, {transform_indices = @transform_2, window_bounds = array<i64: 1, 128>}, {transform_indices = @transform_3, window_bounds = array<i64: 64, 128>}]} {
    %c0 = arith.constant 0 : index
    %c0_0 = arith.constant 0 : index
    %0 = vector.load %arg2[%c0, %c0_0] : memref<64x128xbf16, #tpu.memory_space<vmem>>, vector<64x128xbf16>
    %c0_1 = arith.constant 0 : index
    %c0_2 = arith.constant 0 : index
    %1 = vector.load %arg3[%c0_1, %c0_2] : memref<128x128xbf16, #tpu.memory_space<vmem>>, vector<128x128xbf16>
    %cst = arith.constant dense<0.000000e+00> : vector<64x128xf32>
    %2 = tpu.matmul %0, %1, %cst {dimension_numbers = #tpu.dot_dimension_numbers<[1], [0], [0], [1], [0, 0, 1, 1], [], []>} : vector<64x128xbf16>, vector<128x128xbf16>, vector<64x128xf32> -> vector<64x128xf32>
    %c0_3 = arith.constant 0 : index
    %c0_4 = arith.constant 0 : index
    %3 = vector.load %arg4[%c0_3, %c0_4] : memref<1x128xf32, #tpu.memory_space<vmem>>, vector<1x128xf32>
    %4 = vector.broadcast %3 : vector<1x128xf32> to vector<64x128xf32>
    %5 = arith.addf %2, %4 : vector<64x128xf32>
    %c0_5 = arith.constant 0 : index
    %c0_6 = arith.constant 0 : index
    %6 = vector.load %arg5[%c0_5, %c0_6] : memref<64x128xf32, #tpu.memory_space<vmem>>, vector<64x128xf32>
    tpu.vector_store %arg5[%c0_5, %c0_6], %5 {strides = array<i32>} : memref<64x128xf32, #tpu.memory_space<vmem>>, vector<64x128xf32>,
    return
  }
  func.func @transform_0(%arg0: i32, %arg1: i32) -> (i32, i32) {
    %c0_i32 = arith.constant 0 : i32
    %c0_i32_0 = arith.constant 0 : i32
    return %arg0, %c0_i32 : i32, i32
  }
  func.func @transform_1(%arg0: i32, %arg1: i32) -> (i32, i32) {
    %c0_i32 = arith.constant 0 : i32
    %c0_i32_0 = arith.constant 0 : i32
    return %c0_i32, %arg1 : i32, i32
  }
  func.func @transform_2(%arg0: i32, %arg1: i32) -> (i32, i32) {
    %c0_i32 = arith.constant 0 : i32
    %c0_i32_0 = arith.constant 0 : i32
    return %c0_i32, %arg1 : i32, i32
  }
  func.func @transform_3(%arg0: i32, %arg1: i32) -> (i32, i32) {
    %c0_i32 = arith.constant 0 : i32
    return %arg0, %arg1 : i32, i32
  }
}

module attributes {stable_mosaic.version = 11 : i64} {
  func.func @_fused_lstm2_kernel(%arg0: i32, %arg1: memref<64x32xbf16, #tpu.memory_space<vmem>>, %arg2: memref<32x512xbf16, #tpu.memory_space<vmem>>, %arg3: memref<1x512xf32, #tpu.memory_space<vmem>>, %arg4: memref<128x512xbf16, #tpu.memory_space<vmem>>, %arg5: memref<256x512xbf16, #tpu.memory_space<vmem>>, %arg6: memref<1x512xf32, #tpu.memory_space<vmem>>, %arg7: memref<2x8x128xf32, #tpu.memory_space<vmem>>, %arg8: memref<2x8x128xf32, #tpu.memory_space<vmem>>, %arg9: memref<64x128xf32, #tpu.memory_space<vmem>>, %arg10: memref<2x8x128xf32, #tpu.memory_space<vmem>>, %arg11: memref<2x8x128xf32, #tpu.memory_space<vmem>>, %arg12: memref<64x512xf32, #tpu.memory_space<vmem>>, %arg13: memref<8x256xbf16, #tpu.memory_space<vmem>>, %arg14: memref<8x128xf32, #tpu.memory_space<vmem>>, %arg15: memref<8x128xf32, #tpu.memory_space<vmem>>) attributes {dimension_semantics = [#tpu.dimension_semantics<arbitrary>], iteration_bounds = array<i64: 1>, scalar_prefetch = 0 : i64, scratch_operands = 4 : i64, tpu.core_type = #tpu.core_type<tc>, window_params = [{transform_indices = @transform_0, window_bounds = array<i64: 64, 32>}, {pipeline_mode = #tpu.pipeline_mode<synchronous>, transform_indices = @transform_1, window_bounds = array<i64: 32, 512>}, {pipeline_mode = #tpu.pipeline_mode<synchronous>, transform_indices = @transform_2, window_bounds = array<i64: 1, 512>}, {pipeline_mode = #tpu.pipeline_mode<synchronous>, transform_indices = @transform_3, window_bounds = array<i64: 128, 512>}, {pipeline_mode = #tpu.pipeline_mode<synchronous>, transform_indices = @transform_4, window_bounds = array<i64: 256, 512>}, {pipeline_mode = #tpu.pipeline_mode<synchronous>, transform_indices = @transform_5, window_bounds = array<i64: 1, 512>}, {pipeline_mode = #tpu.pipeline_mode<synchronous>, transform_indices = @transform_6, window_bounds = array<i64: 2, 8, 128>}, {pipeline_mode = #tpu.pipeline_mode<synchronous>, transform_indices = @transform_7, window_bounds = array<i64: 2, 8, 128>}, {transform_indices = @transform_8, window_bounds = array<i64: 64, 128>}, {pipeline_mode = #tpu.pipeline_mode<synchronous>, transform_indices = @transform_9, window_bounds = array<i64: 2, 8, 128>}, {pipeline_mode = #tpu.pipeline_mode<synchronous>, transform_indices = @transform_10, window_bounds = array<i64: 2, 8, 128>}]} {
    %c0_i32 = arith.constant 0 : i32
    %0 = arith.cmpi eq, %arg0, %c0_i32 : i32
    %1 = arith.extui %0 : i1 to i32
    %c0_i32_0 = arith.constant 0 : i32
    %2 = arith.cmpi ne, %1, %c0_i32_0 : i32
    scf.if %2 {
      %c0_273 = arith.constant 0 : index
      %c0_274 = arith.constant 0 : index
      %c0_275 = arith.constant 0 : index
      %615 = vector.load %arg7[%c0_273, %c0_274, %c0_275] : memref<2x8x128xf32, #tpu.memory_space<vmem>>, vector<1x8x128xf32>
      %616 = vector.shape_cast %615 : vector<1x8x128xf32> to vector<8x128xf32>
      %617 = arith.truncf %616 : vector<8x128xf32> to vector<8x128xbf16>
      %c0_276 = arith.constant 0 : index
      %c0_277 = arith.constant 0 : index
      %618 = vector.load %arg13[%c0_276, %c0_277] : memref<8x256xbf16, #tpu.memory_space<vmem>>, vector<8x128xbf16>
      tpu.vector_store %arg13[%c0_276, %c0_277], %617 {strides = array<i32>} : memref<8x256xbf16, #tpu.memory_space<vmem>>, vector<8x128xbf16>,
      %c1 = arith.constant 1 : index
      %c0_278 = arith.constant 0 : index
      %c0_279 = arith.constant 0 : index
      %619 = vector.load %arg7[%c1, %c0_278, %c0_279] : memref<2x8x128xf32, #tpu.memory_space<vmem>>, vector<1x8x128xf32>
      %620 = vector.shape_cast %619 : vector<1x8x128xf32> to vector<8x128xf32>
      %621 = arith.truncf %620 : vector<8x128xf32> to vector<8x128xbf16>
      %c0_280 = arith.constant 0 : index
      %c128_281 = arith.constant 128 : index
      %622 = vector.load %arg13[%c0_280, %c128_281] : memref<8x256xbf16, #tpu.memory_space<vmem>>, vector<8x128xbf16>
      tpu.vector_store %arg13[%c0_280, %c128_281], %621 {strides = array<i32>} : memref<8x256xbf16, #tpu.memory_space<vmem>>, vector<8x128xbf16>,
      %c0_282 = arith.constant 0 : index
      %c0_283 = arith.constant 0 : index
      %c0_284 = arith.constant 0 : index
      %623 = vector.load %arg8[%c0_282, %c0_283, %c0_284] : memref<2x8x128xf32, #tpu.memory_space<vmem>>, vector<1x8x128xf32>
      %624 = vector.shape_cast %623 : vector<1x8x128xf32> to vector<8x128xf32>
      %c0_285 = arith.constant 0 : index
      %c0_286 = arith.constant 0 : index
      %625 = vector.load %arg14[%c0_285, %c0_286] : memref<8x128xf32, #tpu.memory_space<vmem>>, vector<8x128xf32>
      tpu.vector_store %arg14[%c0_285, %c0_286], %624 {strides = array<i32>} : memref<8x128xf32, #tpu.memory_space<vmem>>, vector<8x128xf32>,
      %c1_287 = arith.constant 1 : index
      %c0_288 = arith.constant 0 : index
      %c0_289 = arith.constant 0 : index
      %626 = vector.load %arg8[%c1_287, %c0_288, %c0_289] : memref<2x8x128xf32, #tpu.memory_space<vmem>>, vector<1x8x128xf32>
      %627 = vector.shape_cast %626 : vector<1x8x128xf32> to vector<8x128xf32>
      %c0_290 = arith.constant 0 : index
      %c0_291 = arith.constant 0 : index
      %628 = vector.load %arg15[%c0_290, %c0_291] : memref<8x128xf32, #tpu.memory_space<vmem>>, vector<8x128xf32>
      tpu.vector_store %arg15[%c0_290, %c0_291], %627 {strides = array<i32>} : memref<8x128xf32, #tpu.memory_space<vmem>>, vector<8x128xf32>,
    } else {
    }
    %c0 = arith.constant 0 : index
    %c0_1 = arith.constant 0 : index
    %3 = vector.load %arg3[%c0, %c0_1] : memref<1x512xf32, #tpu.memory_space<vmem>>, vector<1x512xf32>
    %c0_2 = arith.constant 0 : index
    %c0_3 = arith.constant 0 : index
    %4 = vector.load %arg6[%c0_2, %c0_3] : memref<1x512xf32, #tpu.memory_space<vmem>>, vector<1x512xf32>
    %c0_4 = arith.constant 0 : index
    %c0_5 = arith.constant 0 : index
    %5 = vector.load %arg1[%c0_4, %c0_5] : memref<64x32xbf16, #tpu.memory_space<vmem>>, vector<64x32xbf16>
    %c0_6 = arith.constant 0 : index
    %c0_7 = arith.constant 0 : index
    %6 = vector.load %arg2[%c0_6, %c0_7] : memref<32x512xbf16, #tpu.memory_space<vmem>>, vector<32x512xbf16>
    %cst = arith.constant dense<0.000000e+00> : vector<64x512xf32>
    %7 = tpu.matmul %5, %6, %cst {dimension_numbers = #tpu.dot_dimension_numbers<[1], [0], [0], [1], [0, 0, 1, 1], [], []>} : vector<64x32xbf16>, vector<32x512xbf16>, vector<64x512xf32> -> vector<64x512xf32>
    %8 = vector.broadcast %3 : vector<1x512xf32> to vector<64x512xf32>
    %9 = arith.addf %7, %8 : vector<64x512xf32>
    %c0_8 = arith.constant 0 : index
    %c0_9 = arith.constant 0 : index
    %10 = vector.load %arg12[%c0_8, %c0_9] : memref<64x512xf32, #tpu.memory_space<vmem>>, vector<64x512xf32>
    tpu.vector_store %arg12[%c0_8, %c0_9], %9 {strides = array<i32>} : memref<64x512xf32, #tpu.memory_space<vmem>>, vector<64x512xf32>,
    %c0_10 = arith.constant 0 : index
    %c0_11 = arith.constant 0 : index
    %11 = vector.load %arg13[%c0_10, %c0_11] : memref<8x256xbf16, #tpu.memory_space<vmem>>, vector<8x128xbf16>
    %c0_12 = arith.constant 0 : index
    %c0_13 = arith.constant 0 : index
    %12 = vector.load %arg12[%c0_12, %c0_13] : memref<64x512xf32, #tpu.memory_space<vmem>>, vector<8x512xf32>
    %c0_14 = arith.constant 0 : index
    %c0_15 = arith.constant 0 : index
    %13 = vector.load %arg4[%c0_14, %c0_15] : memref<128x512xbf16, #tpu.memory_space<vmem>>, vector<128x512xbf16>
    %cst_16 = arith.constant dense<0.000000e+00> : vector<8x512xf32>
    %14 = tpu.matmul %11, %13, %cst_16 {dimension_numbers = #tpu.dot_dimension_numbers<[1], [0], [0], [1], [0, 0, 1, 1], [], []>} : vector<8x128xbf16>, vector<128x512xbf16>, vector<8x512xf32> -> vector<8x512xf32>
    %15 = arith.addf %12, %14 : vector<8x512xf32>
    %c0_17 = arith.constant 0 : index
    %c0_18 = arith.constant 0 : index
    %16 = vector.load %arg14[%c0_17, %c0_18] : memref<8x128xf32, #tpu.memory_space<vmem>>, vector<8x128xf32>
    %17 = vector.extract_strided_slice %15 {offsets = [0, 0], sizes = [8, 128], strides = [1, 1]} : vector<8x512xf32> to vector<8x128xf32>
    %18 = arith.negf %17 : vector<8x128xf32>
    %19 = math.exp %18 : vector<8x128xf32>
    %cst_19 = arith.constant 1.000000e+00 : f32
    %20 = vector.broadcast %cst_19 : f32 to vector<8x128xf32>
    %21 = arith.addf %20, %19 : vector<8x128xf32>
    %22 = arith.divf %20, %21 : vector<8x128xf32>
    %23 = vector.extract_strided_slice %15 {offsets = [0, 128], sizes = [8, 128], strides = [1, 1]} : vector<8x512xf32> to vector<8x128xf32>
    %24 = arith.negf %23 : vector<8x128xf32>
    %25 = math.exp %24 : vector<8x128xf32>
    %cst_20 = arith.constant 1.000000e+00 : f32
    %26 = vector.broadcast %cst_20 : f32 to vector<8x128xf32>
    %27 = arith.addf %26, %25 : vector<8x128xf32>
    %28 = arith.divf %26, %27 : vector<8x128xf32>
    %29 = vector.extract_strided_slice %15 {offsets = [0, 256], sizes = [8, 128], strides = [1, 1]} : vector<8x512xf32> to vector<8x128xf32>
    %30 = math.tanh %29 : vector<8x128xf32>
    %31 = vector.extract_strided_slice %15 {offsets = [0, 384], sizes = [8, 128], strides = [1, 1]} : vector<8x512xf32> to vector<8x128xf32>
    %32 = arith.negf %31 : vector<8x128xf32>
    %33 = math.exp %32 : vector<8x128xf32>
    %cst_21 = arith.constant 1.000000e+00 : f32
    %34 = vector.broadcast %cst_21 : f32 to vector<8x128xf32>
    %35 = arith.addf %34, %33 : vector<8x128xf32>
    %36 = arith.divf %34, %35 : vector<8x128xf32>
    %37 = arith.mulf %28, %16 : vector<8x128xf32>
    %38 = arith.mulf %22, %30 : vector<8x128xf32>
    %39 = arith.addf %37, %38 : vector<8x128xf32>
    %40 = math.tanh %39 : vector<8x128xf32>
    %41 = arith.mulf %36, %40 : vector<8x128xf32>
    %c0_22 = arith.constant 0 : index
    %c0_23 = arith.constant 0 : index
    %42 = vector.load %arg14[%c0_22, %c0_23] : memref<8x128xf32, #tpu.memory_space<vmem>>, vector<8x128xf32>
    tpu.vector_store %arg14[%c0_22, %c0_23], %39 {strides = array<i32>} : memref<8x128xf32, #tpu.memory_space<vmem>>, vector<8x128xf32>,
    %43 = arith.truncf %41 : vector<8x128xf32> to vector<8x128xbf16>
    %c0_24 = arith.constant 0 : index
    %c0_25 = arith.constant 0 : index
    %44 = vector.load %arg13[%c0_24, %c0_25] : memref<8x256xbf16, #tpu.memory_space<vmem>>, vector<8x128xbf16>
    tpu.vector_store %arg13[%c0_24, %c0_25], %43 {strides = array<i32>} : memref<8x256xbf16, #tpu.memory_space<vmem>>, vector<8x128xbf16>,
    %c1_i32 = arith.constant 1 : i32
    %c0_26 = arith.constant 0 : index
    %c0_27 = arith.constant 0 : index
    %45 = vector.load %arg13[%c0_26, %c0_27] : memref<8x256xbf16, #tpu.memory_space<vmem>>, vector<8x128xbf16>
    %c8_i32 = arith.constant 8 : i32
    %46 = arith.muli %c1_i32, %c8_i32 : i32
    %47 = tpu.assume_multiple %46, 8 : i32
    %48 = arith.index_cast %47 : i32 to index
    %c0_28 = arith.constant 0 : index
    %49 = vector.load %arg12[%48, %c0_28] : memref<64x512xf32, #tpu.memory_space<vmem>>, vector<8x512xf32>
    %c0_29 = arith.constant 0 : index
    %c0_30 = arith.constant 0 : index
    %50 = vector.load %arg4[%c0_29, %c0_30] : memref<128x512xbf16, #tpu.memory_space<vmem>>, vector<128x512xbf16>
    %cst_31 = arith.constant dense<0.000000e+00> : vector<8x512xf32>
    %51 = tpu.matmul %45, %50, %cst_31 {dimension_numbers = #tpu.dot_dimension_numbers<[1], [0], [0], [1], [0, 0, 1, 1], [], []>} : vector<8x128xbf16>, vector<128x512xbf16>, vector<8x512xf32> -> vector<8x512xf32>
    %52 = arith.addf %49, %51 : vector<8x512xf32>
    %c0_32 = arith.constant 0 : index
    %c0_33 = arith.constant 0 : index
    %53 = vector.load %arg14[%c0_32, %c0_33] : memref<8x128xf32, #tpu.memory_space<vmem>>, vector<8x128xf32>
    %54 = vector.extract_strided_slice %52 {offsets = [0, 0], sizes = [8, 128], strides = [1, 1]} : vector<8x512xf32> to vector<8x128xf32>
    %55 = arith.negf %54 : vector<8x128xf32>
    %56 = math.exp %55 : vector<8x128xf32>
    %cst_34 = arith.constant 1.000000e+00 : f32
    %57 = vector.broadcast %cst_34 : f32 to vector<8x128xf32>
    %58 = arith.addf %57, %56 : vector<8x128xf32>
    %59 = arith.divf %57, %58 : vector<8x128xf32>
    %60 = vector.extract_strided_slice %52 {offsets = [0, 128], sizes = [8, 128], strides = [1, 1]} : vector<8x512xf32> to vector<8x128xf32>
    %61 = arith.negf %60 : vector<8x128xf32>
    %62 = math.exp %61 : vector<8x128xf32>
    %cst_35 = arith.constant 1.000000e+00 : f32
    %63 = vector.broadcast %cst_35 : f32 to vector<8x128xf32>
    %64 = arith.addf %63, %62 : vector<8x128xf32>
    %65 = arith.divf %63, %64 : vector<8x128xf32>
    %66 = vector.extract_strided_slice %52 {offsets = [0, 256], sizes = [8, 128], strides = [1, 1]} : vector<8x512xf32> to vector<8x128xf32>
    %67 = math.tanh %66 : vector<8x128xf32>
    %68 = vector.extract_strided_slice %52 {offsets = [0, 384], sizes = [8, 128], strides = [1, 1]} : vector<8x512xf32> to vector<8x128xf32>
    %69 = arith.negf %68 : vector<8x128xf32>
    %70 = math.exp %69 : vector<8x128xf32>
    %cst_36 = arith.constant 1.000000e+00 : f32
    %71 = vector.broadcast %cst_36 : f32 to vector<8x128xf32>
    %72 = arith.addf %71, %70 : vector<8x128xf32>
    %73 = arith.divf %71, %72 : vector<8x128xf32>
    %74 = arith.mulf %65, %53 : vector<8x128xf32>
    %75 = arith.mulf %59, %67 : vector<8x128xf32>
    %76 = arith.addf %74, %75 : vector<8x128xf32>
    %77 = math.tanh %76 : vector<8x128xf32>
    %78 = arith.mulf %73, %77 : vector<8x128xf32>
    %c0_37 = arith.constant 0 : index
    %c0_38 = arith.constant 0 : index
    %79 = vector.load %arg14[%c0_37, %c0_38] : memref<8x128xf32, #tpu.memory_space<vmem>>, vector<8x128xf32>
    tpu.vector_store %arg14[%c0_37, %c0_38], %76 {strides = array<i32>} : memref<8x128xf32, #tpu.memory_space<vmem>>, vector<8x128xf32>,
    %c1_i32_39 = arith.constant 1 : i32
    %80 = arith.subi %c1_i32, %c1_i32_39 : i32
    %c0_40 = arith.constant 0 : index
    %c0_41 = arith.constant 0 : index
    %81 = vector.load %arg13[%c0_40, %c0_41] : memref<8x256xbf16, #tpu.memory_space<vmem>>, vector<8x256xbf16>
    %c0_42 = arith.constant 0 : index
    %c0_43 = arith.constant 0 : index
    %82 = vector.load %arg5[%c0_42, %c0_43] : memref<256x512xbf16, #tpu.memory_space<vmem>>, vector<256x512xbf16>
    %cst_44 = arith.constant dense<0.000000e+00> : vector<8x512xf32>
    %83 = tpu.matmul %81, %82, %cst_44 {dimension_numbers = #tpu.dot_dimension_numbers<[1], [0], [0], [1], [0, 0, 1, 1], [], []>} : vector<8x256xbf16>, vector<256x512xbf16>, vector<8x512xf32> -> vector<8x512xf32>
    %84 = vector.broadcast %4 : vector<1x512xf32> to vector<8x512xf32>
    %85 = arith.addf %83, %84 : vector<8x512xf32>
    %c0_45 = arith.constant 0 : index
    %c0_46 = arith.constant 0 : index
    %86 = vector.load %arg15[%c0_45, %c0_46] : memref<8x128xf32, #tpu.memory_space<vmem>>, vector<8x128xf32>
    %87 = vector.extract_strided_slice %85 {offsets = [0, 0], sizes = [8, 128], strides = [1, 1]} : vector<8x512xf32> to vector<8x128xf32>
    %88 = arith.negf %87 : vector<8x128xf32>
    %89 = math.exp %88 : vector<8x128xf32>
    %cst_47 = arith.constant 1.000000e+00 : f32
    %90 = vector.broadcast %cst_47 : f32 to vector<8x128xf32>
    %91 = arith.addf %90, %89 : vector<8x128xf32>
    %92 = arith.divf %90, %91 : vector<8x128xf32>
    %93 = vector.extract_strided_slice %85 {offsets = [0, 128], sizes = [8, 128], strides = [1, 1]} : vector<8x512xf32> to vector<8x128xf32>
    %94 = arith.negf %93 : vector<8x128xf32>
    %95 = math.exp %94 : vector<8x128xf32>
    %cst_48 = arith.constant 1.000000e+00 : f32
    %96 = vector.broadcast %cst_48 : f32 to vector<8x128xf32>
    %97 = arith.addf %96, %95 : vector<8x128xf32>
    %98 = arith.divf %96, %97 : vector<8x128xf32>
    %99 = vector.extract_strided_slice %85 {offsets = [0, 256], sizes = [8, 128], strides = [1, 1]} : vector<8x512xf32> to vector<8x128xf32>
    %100 = math.tanh %99 : vector<8x128xf32>
    %101 = vector.extract_strided_slice %85 {offsets = [0, 384], sizes = [8, 128], strides = [1, 1]} : vector<8x512xf32> to vector<8x128xf32>
    %102 = arith.negf %101 : vector<8x128xf32>
    %103 = math.exp %102 : vector<8x128xf32>
    %cst_49 = arith.constant 1.000000e+00 : f32
    %104 = vector.broadcast %cst_49 : f32 to vector<8x128xf32>
    %105 = arith.addf %104, %103 : vector<8x128xf32>
    %106 = arith.divf %104, %105 : vector<8x128xf32>
    %107 = arith.mulf %98, %86 : vector<8x128xf32>
    %108 = arith.mulf %92, %100 : vector<8x128xf32>
    %109 = arith.addf %107, %108 : vector<8x128xf32>
    %110 = math.tanh %109 : vector<8x128xf32>
    %111 = arith.mulf %106, %110 : vector<8x128xf32>
    %c8_i32_50 = arith.constant 8 : i32
    %112 = arith.muli %80, %c8_i32_50 : i32
    %113 = tpu.assume_multiple %112, 8 : i32
    %114 = arith.index_cast %113 : i32 to index
    %c0_51 = arith.constant 0 : index
    %115 = vector.load %arg9[%114, %c0_51] : memref<64x128xf32, #tpu.memory_space<vmem>>, vector<8x128xf32>
    tpu.vector_store %arg9[%114, %c0_51], %111 {strides = array<i32>} : memref<64x128xf32, #tpu.memory_space<vmem>>, vector<8x128xf32>,
    %c0_52 = arith.constant 0 : index
    %c0_53 = arith.constant 0 : index
    %116 = vector.load %arg15[%c0_52, %c0_53] : memref<8x128xf32, #tpu.memory_space<vmem>>, vector<8x128xf32>
    tpu.vector_store %arg15[%c0_52, %c0_53], %109 {strides = array<i32>} : memref<8x128xf32, #tpu.memory_space<vmem>>, vector<8x128xf32>,
    %117 = arith.truncf %78 : vector<8x128xf32> to vector<8x128xbf16>
    %c0_54 = arith.constant 0 : index
    %c0_55 = arith.constant 0 : index
    %118 = vector.load %arg13[%c0_54, %c0_55] : memref<8x256xbf16, #tpu.memory_space<vmem>>, vector<8x128xbf16>
    tpu.vector_store %arg13[%c0_54, %c0_55], %117 {strides = array<i32>} : memref<8x256xbf16, #tpu.memory_space<vmem>>, vector<8x128xbf16>,
    %119 = arith.truncf %111 : vector<8x128xf32> to vector<8x128xbf16>
    %c0_56 = arith.constant 0 : index
    %c128 = arith.constant 128 : index
    %120 = vector.load %arg13[%c0_56, %c128] : memref<8x256xbf16, #tpu.memory_space<vmem>>, vector<8x128xbf16>
    tpu.vector_store %arg13[%c0_56, %c128], %119 {strides = array<i32>} : memref<8x256xbf16, #tpu.memory_space<vmem>>, vector<8x128xbf16>,
    %c2_i32 = arith.constant 2 : i32
    %c0_57 = arith.constant 0 : index
    %c0_58 = arith.constant 0 : index
    %121 = vector.load %arg13[%c0_57, %c0_58] : memref<8x256xbf16, #tpu.memory_space<vmem>>, vector<8x128xbf16>
    %c8_i32_59 = arith.constant 8 : i32
    %122 = arith.muli %c2_i32, %c8_i32_59 : i32
    %123 = tpu.assume_multiple %122, 8 : i32
    %124 = arith.index_cast %123 : i32 to index
    %c0_60 = arith.constant 0 : index
    %125 = vector.load %arg12[%124, %c0_60] : memref<64x512xf32, #tpu.memory_space<vmem>>, vector<8x512xf32>
    %c0_61 = arith.constant 0 : index
    %c0_62 = arith.constant 0 : index
    %126 = vector.load %arg4[%c0_61, %c0_62] : memref<128x512xbf16, #tpu.memory_space<vmem>>, vector<128x512xbf16>
    %cst_63 = arith.constant dense<0.000000e+00> : vector<8x512xf32>
    %127 = tpu.matmul %121, %126, %cst_63 {dimension_numbers = #tpu.dot_dimension_numbers<[1], [0], [0], [1], [0, 0, 1, 1], [], []>} : vector<8x128xbf16>, vector<128x512xbf16>, vector<8x512xf32> -> vector<8x512xf32>
    %128 = arith.addf %125, %127 : vector<8x512xf32>
    %c0_64 = arith.constant 0 : index
    %c0_65 = arith.constant 0 : index
    %129 = vector.load %arg14[%c0_64, %c0_65] : memref<8x128xf32, #tpu.memory_space<vmem>>, vector<8x128xf32>
    %130 = vector.extract_strided_slice %128 {offsets = [0, 0], sizes = [8, 128], strides = [1, 1]} : vector<8x512xf32> to vector<8x128xf32>
    %131 = arith.negf %130 : vector<8x128xf32>
    %132 = math.exp %131 : vector<8x128xf32>
    %cst_66 = arith.constant 1.000000e+00 : f32
    %133 = vector.broadcast %cst_66 : f32 to vector<8x128xf32>
    %134 = arith.addf %133, %132 : vector<8x128xf32>
    %135 = arith.divf %133, %134 : vector<8x128xf32>
    %136 = vector.extract_strided_slice %128 {offsets = [0, 128], sizes = [8, 128], strides = [1, 1]} : vector<8x512xf32> to vector<8x128xf32>
    %137 = arith.negf %136 : vector<8x128xf32>
    %138 = math.exp %137 : vector<8x128xf32>
    %cst_67 = arith.constant 1.000000e+00 : f32
    %139 = vector.broadcast %cst_67 : f32 to vector<8x128xf32>
    %140 = arith.addf %139, %138 : vector<8x128xf32>
    %141 = arith.divf %139, %140 : vector<8x128xf32>
    %142 = vector.extract_strided_slice %128 {offsets = [0, 256], sizes = [8, 128], strides = [1, 1]} : vector<8x512xf32> to vector<8x128xf32>
    %143 = math.tanh %142 : vector<8x128xf32>
    %144 = vector.extract_strided_slice %128 {offsets = [0, 384], sizes = [8, 128], strides = [1, 1]} : vector<8x512xf32> to vector<8x128xf32>
    %145 = arith.negf %144 : vector<8x128xf32>
    %146 = math.exp %145 : vector<8x128xf32>
    %cst_68 = arith.constant 1.000000e+00 : f32
    %147 = vector.broadcast %cst_68 : f32 to vector<8x128xf32>
    %148 = arith.addf %147, %146 : vector<8x128xf32>
    %149 = arith.divf %147, %148 : vector<8x128xf32>
    %150 = arith.mulf %141, %129 : vector<8x128xf32>
    %151 = arith.mulf %135, %143 : vector<8x128xf32>
    %152 = arith.addf %150, %151 : vector<8x128xf32>
    %153 = math.tanh %152 : vector<8x128xf32>
    %154 = arith.mulf %149, %153 : vector<8x128xf32>
    %c0_69 = arith.constant 0 : index
    %c0_70 = arith.constant 0 : index
    %155 = vector.load %arg14[%c0_69, %c0_70] : memref<8x128xf32, #tpu.memory_space<vmem>>, vector<8x128xf32>
    tpu.vector_store %arg14[%c0_69, %c0_70], %152 {strides = array<i32>} : memref<8x128xf32, #tpu.memory_space<vmem>>, vector<8x128xf32>,
    %c1_i32_71 = arith.constant 1 : i32
    %156 = arith.subi %c2_i32, %c1_i32_71 : i32
    %c0_72 = arith.constant 0 : index
    %c0_73 = arith.constant 0 : index
    %157 = vector.load %arg13[%c0_72, %c0_73] : memref<8x256xbf16, #tpu.memory_space<vmem>>, vector<8x256xbf16>
    %c0_74 = arith.constant 0 : index
    %c0_75 = arith.constant 0 : index
    %158 = vector.load %arg5[%c0_74, %c0_75] : memref<256x512xbf16, #tpu.memory_space<vmem>>, vector<256x512xbf16>
    %cst_76 = arith.constant dense<0.000000e+00> : vector<8x512xf32>
    %159 = tpu.matmul %157, %158, %cst_76 {dimension_numbers = #tpu.dot_dimension_numbers<[1], [0], [0], [1], [0, 0, 1, 1], [], []>} : vector<8x256xbf16>, vector<256x512xbf16>, vector<8x512xf32> -> vector<8x512xf32>
    %160 = vector.broadcast %4 : vector<1x512xf32> to vector<8x512xf32>
    %161 = arith.addf %159, %160 : vector<8x512xf32>
    %c0_77 = arith.constant 0 : index
    %c0_78 = arith.constant 0 : index
    %162 = vector.load %arg15[%c0_77, %c0_78] : memref<8x128xf32, #tpu.memory_space<vmem>>, vector<8x128xf32>
    %163 = vector.extract_strided_slice %161 {offsets = [0, 0], sizes = [8, 128], strides = [1, 1]} : vector<8x512xf32> to vector<8x128xf32>
    %164 = arith.negf %163 : vector<8x128xf32>
    %165 = math.exp %164 : vector<8x128xf32>
    %cst_79 = arith.constant 1.000000e+00 : f32
    %166 = vector.broadcast %cst_79 : f32 to vector<8x128xf32>
    %167 = arith.addf %166, %165 : vector<8x128xf32>
    %168 = arith.divf %166, %167 : vector<8x128xf32>
    %169 = vector.extract_strided_slice %161 {offsets = [0, 128], sizes = [8, 128], strides = [1, 1]} : vector<8x512xf32> to vector<8x128xf32>
    %170 = arith.negf %169 : vector<8x128xf32>
    %171 = math.exp %170 : vector<8x128xf32>
    %cst_80 = arith.constant 1.000000e+00 : f32
    %172 = vector.broadcast %cst_80 : f32 to vector<8x128xf32>
    %173 = arith.addf %172, %171 : vector<8x128xf32>
    %174 = arith.divf %172, %173 : vector<8x128xf32>
    %175 = vector.extract_strided_slice %161 {offsets = [0, 256], sizes = [8, 128], strides = [1, 1]} : vector<8x512xf32> to vector<8x128xf32>
    %176 = math.tanh %175 : vector<8x128xf32>
    %177 = vector.extract_strided_slice %161 {offsets = [0, 384], sizes = [8, 128], strides = [1, 1]} : vector<8x512xf32> to vector<8x128xf32>
    %178 = arith.negf %177 : vector<8x128xf32>
    %179 = math.exp %178 : vector<8x128xf32>
    %cst_81 = arith.constant 1.000000e+00 : f32
    %180 = vector.broadcast %cst_81 : f32 to vector<8x128xf32>
    %181 = arith.addf %180, %179 : vector<8x128xf32>
    %182 = arith.divf %180, %181 : vector<8x128xf32>
    %183 = arith.mulf %174, %162 : vector<8x128xf32>
    %184 = arith.mulf %168, %176 : vector<8x128xf32>
    %185 = arith.addf %183, %184 : vector<8x128xf32>
    %186 = math.tanh %185 : vector<8x128xf32>
    %187 = arith.mulf %182, %186 : vector<8x128xf32>
    %c8_i32_82 = arith.constant 8 : i32
    %188 = arith.muli %156, %c8_i32_82 : i32
    %189 = tpu.assume_multiple %188, 8 : i32
    %190 = arith.index_cast %189 : i32 to index
    %c0_83 = arith.constant 0 : index
    %191 = vector.load %arg9[%190, %c0_83] : memref<64x128xf32, #tpu.memory_space<vmem>>, vector<8x128xf32>
    tpu.vector_store %arg9[%190, %c0_83], %187 {strides = array<i32>} : memref<64x128xf32, #tpu.memory_space<vmem>>, vector<8x128xf32>,
    %c0_84 = arith.constant 0 : index
    %c0_85 = arith.constant 0 : index
    %192 = vector.load %arg15[%c0_84, %c0_85] : memref<8x128xf32, #tpu.memory_space<vmem>>, vector<8x128xf32>
    tpu.vector_store %arg15[%c0_84, %c0_85], %185 {strides = array<i32>} : memref<8x128xf32, #tpu.memory_space<vmem>>, vector<8x128xf32>,
    %193 = arith.truncf %154 : vector<8x128xf32> to vector<8x128xbf16>
    %c0_86 = arith.constant 0 : index
    %c0_87 = arith.constant 0 : index
    %194 = vector.load %arg13[%c0_86, %c0_87] : memref<8x256xbf16, #tpu.memory_space<vmem>>, vector<8x128xbf16>
    tpu.vector_store %arg13[%c0_86, %c0_87], %193 {strides = array<i32>} : memref<8x256xbf16, #tpu.memory_space<vmem>>, vector<8x128xbf16>,
    %195 = arith.truncf %187 : vector<8x128xf32> to vector<8x128xbf16>
    %c0_88 = arith.constant 0 : index
    %c128_89 = arith.constant 128 : index
    %196 = vector.load %arg13[%c0_88, %c128_89] : memref<8x256xbf16, #tpu.memory_space<vmem>>, vector<8x128xbf16>
    tpu.vector_store %arg13[%c0_88, %c128_89], %195 {strides = array<i32>} : memref<8x256xbf16, #tpu.memory_space<vmem>>, vector<8x128xbf16>,
    %c3_i32 = arith.constant 3 : i32
    %c0_90 = arith.constant 0 : index
    %c0_91 = arith.constant 0 : index
    %197 = vector.load %arg13[%c0_90, %c0_91] : memref<8x256xbf16, #tpu.memory_space<vmem>>, vector<8x128xbf16>
    %c8_i32_92 = arith.constant 8 : i32
    %198 = arith.muli %c3_i32, %c8_i32_92 : i32
    %199 = tpu.assume_multiple %198, 8 : i32
    %200 = arith.index_cast %199 : i32 to index
    %c0_93 = arith.constant 0 : index
    %201 = vector.load %arg12[%200, %c0_93] : memref<64x512xf32, #tpu.memory_space<vmem>>, vector<8x512xf32>
    %c0_94 = arith.constant 0 : index
    %c0_95 = arith.constant 0 : index
    %202 = vector.load %arg4[%c0_94, %c0_95] : memref<128x512xbf16, #tpu.memory_space<vmem>>, vector<128x512xbf16>
    %cst_96 = arith.constant dense<0.000000e+00> : vector<8x512xf32>
    %203 = tpu.matmul %197, %202, %cst_96 {dimension_numbers = #tpu.dot_dimension_numbers<[1], [0], [0], [1], [0, 0, 1, 1], [], []>} : vector<8x128xbf16>, vector<128x512xbf16>, vector<8x512xf32> -> vector<8x512xf32>
    %204 = arith.addf %201, %203 : vector<8x512xf32>
    %c0_97 = arith.constant 0 : index
    %c0_98 = arith.constant 0 : index
    %205 = vector.load %arg14[%c0_97, %c0_98] : memref<8x128xf32, #tpu.memory_space<vmem>>, vector<8x128xf32>
    %206 = vector.extract_strided_slice %204 {offsets = [0, 0], sizes = [8, 128], strides = [1, 1]} : vector<8x512xf32> to vector<8x128xf32>
    %207 = arith.negf %206 : vector<8x128xf32>
    %208 = math.exp %207 : vector<8x128xf32>
    %cst_99 = arith.constant 1.000000e+00 : f32
    %209 = vector.broadcast %cst_99 : f32 to vector<8x128xf32>
    %210 = arith.addf %209, %208 : vector<8x128xf32>
    %211 = arith.divf %209, %210 : vector<8x128xf32>
    %212 = vector.extract_strided_slice %204 {offsets = [0, 128], sizes = [8, 128], strides = [1, 1]} : vector<8x512xf32> to vector<8x128xf32>
    %213 = arith.negf %212 : vector<8x128xf32>
    %214 = math.exp %213 : vector<8x128xf32>
    %cst_100 = arith.constant 1.000000e+00 : f32
    %215 = vector.broadcast %cst_100 : f32 to vector<8x128xf32>
    %216 = arith.addf %215, %214 : vector<8x128xf32>
    %217 = arith.divf %215, %216 : vector<8x128xf32>
    %218 = vector.extract_strided_slice %204 {offsets = [0, 256], sizes = [8, 128], strides = [1, 1]} : vector<8x512xf32> to vector<8x128xf32>
    %219 = math.tanh %218 : vector<8x128xf32>
    %220 = vector.extract_strided_slice %204 {offsets = [0, 384], sizes = [8, 128], strides = [1, 1]} : vector<8x512xf32> to vector<8x128xf32>
    %221 = arith.negf %220 : vector<8x128xf32>
    %222 = math.exp %221 : vector<8x128xf32>
    %cst_101 = arith.constant 1.000000e+00 : f32
    %223 = vector.broadcast %cst_101 : f32 to vector<8x128xf32>
    %224 = arith.addf %223, %222 : vector<8x128xf32>
    %225 = arith.divf %223, %224 : vector<8x128xf32>
    %226 = arith.mulf %217, %205 : vector<8x128xf32>
    %227 = arith.mulf %211, %219 : vector<8x128xf32>
    %228 = arith.addf %226, %227 : vector<8x128xf32>
    %229 = math.tanh %228 : vector<8x128xf32>
    %230 = arith.mulf %225, %229 : vector<8x128xf32>
    %c0_102 = arith.constant 0 : index
    %c0_103 = arith.constant 0 : index
    %231 = vector.load %arg14[%c0_102, %c0_103] : memref<8x128xf32, #tpu.memory_space<vmem>>, vector<8x128xf32>
    tpu.vector_store %arg14[%c0_102, %c0_103], %228 {strides = array<i32>} : memref<8x128xf32, #tpu.memory_space<vmem>>, vector<8x128xf32>,
    %c1_i32_104 = arith.constant 1 : i32
    %232 = arith.subi %c3_i32, %c1_i32_104 : i32
    %c0_105 = arith.constant 0 : index
    %c0_106 = arith.constant 0 : index
    %233 = vector.load %arg13[%c0_105, %c0_106] : memref<8x256xbf16, #tpu.memory_space<vmem>>, vector<8x256xbf16>
    %c0_107 = arith.constant 0 : index
    %c0_108 = arith.constant 0 : index
    %234 = vector.load %arg5[%c0_107, %c0_108] : memref<256x512xbf16, #tpu.memory_space<vmem>>, vector<256x512xbf16>
    %cst_109 = arith.constant dense<0.000000e+00> : vector<8x512xf32>
    %235 = tpu.matmul %233, %234, %cst_109 {dimension_numbers = #tpu.dot_dimension_numbers<[1], [0], [0], [1], [0, 0, 1, 1], [], []>} : vector<8x256xbf16>, vector<256x512xbf16>, vector<8x512xf32> -> vector<8x512xf32>
    %236 = vector.broadcast %4 : vector<1x512xf32> to vector<8x512xf32>
    %237 = arith.addf %235, %236 : vector<8x512xf32>
    %c0_110 = arith.constant 0 : index
    %c0_111 = arith.constant 0 : index
    %238 = vector.load %arg15[%c0_110, %c0_111] : memref<8x128xf32, #tpu.memory_space<vmem>>, vector<8x128xf32>
    %239 = vector.extract_strided_slice %237 {offsets = [0, 0], sizes = [8, 128], strides = [1, 1]} : vector<8x512xf32> to vector<8x128xf32>
    %240 = arith.negf %239 : vector<8x128xf32>
    %241 = math.exp %240 : vector<8x128xf32>
    %cst_112 = arith.constant 1.000000e+00 : f32
    %242 = vector.broadcast %cst_112 : f32 to vector<8x128xf32>
    %243 = arith.addf %242, %241 : vector<8x128xf32>
    %244 = arith.divf %242, %243 : vector<8x128xf32>
    %245 = vector.extract_strided_slice %237 {offsets = [0, 128], sizes = [8, 128], strides = [1, 1]} : vector<8x512xf32> to vector<8x128xf32>
    %246 = arith.negf %245 : vector<8x128xf32>
    %247 = math.exp %246 : vector<8x128xf32>
    %cst_113 = arith.constant 1.000000e+00 : f32
    %248 = vector.broadcast %cst_113 : f32 to vector<8x128xf32>
    %249 = arith.addf %248, %247 : vector<8x128xf32>
    %250 = arith.divf %248, %249 : vector<8x128xf32>
    %251 = vector.extract_strided_slice %237 {offsets = [0, 256], sizes = [8, 128], strides = [1, 1]} : vector<8x512xf32> to vector<8x128xf32>
    %252 = math.tanh %251 : vector<8x128xf32>
    %253 = vector.extract_strided_slice %237 {offsets = [0, 384], sizes = [8, 128], strides = [1, 1]} : vector<8x512xf32> to vector<8x128xf32>
    %254 = arith.negf %253 : vector<8x128xf32>
    %255 = math.exp %254 : vector<8x128xf32>
    %cst_114 = arith.constant 1.000000e+00 : f32
    %256 = vector.broadcast %cst_114 : f32 to vector<8x128xf32>
    %257 = arith.addf %256, %255 : vector<8x128xf32>
    %258 = arith.divf %256, %257 : vector<8x128xf32>
    %259 = arith.mulf %250, %238 : vector<8x128xf32>
    %260 = arith.mulf %244, %252 : vector<8x128xf32>
    %261 = arith.addf %259, %260 : vector<8x128xf32>
    %262 = math.tanh %261 : vector<8x128xf32>
    %263 = arith.mulf %258, %262 : vector<8x128xf32>
    %c8_i32_115 = arith.constant 8 : i32
    %264 = arith.muli %232, %c8_i32_115 : i32
    %265 = tpu.assume_multiple %264, 8 : i32
    %266 = arith.index_cast %265 : i32 to index
    %c0_116 = arith.constant 0 : index
    %267 = vector.load %arg9[%266, %c0_116] : memref<64x128xf32, #tpu.memory_space<vmem>>, vector<8x128xf32>
    tpu.vector_store %arg9[%266, %c0_116], %263 {strides = array<i32>} : memref<64x128xf32, #tpu.memory_space<vmem>>, vector<8x128xf32>,
    %c0_117 = arith.constant 0 : index
    %c0_118 = arith.constant 0 : index
    %268 = vector.load %arg15[%c0_117, %c0_118] : memref<8x128xf32, #tpu.memory_space<vmem>>, vector<8x128xf32>
    tpu.vector_store %arg15[%c0_117, %c0_118], %261 {strides = array<i32>} : memref<8x128xf32, #tpu.memory_space<vmem>>, vector<8x128xf32>,
    %269 = arith.truncf %230 : vector<8x128xf32> to vector<8x128xbf16>
    %c0_119 = arith.constant 0 : index
    %c0_120 = arith.constant 0 : index
    %270 = vector.load %arg13[%c0_119, %c0_120] : memref<8x256xbf16, #tpu.memory_space<vmem>>, vector<8x128xbf16>
    tpu.vector_store %arg13[%c0_119, %c0_120], %269 {strides = array<i32>} : memref<8x256xbf16, #tpu.memory_space<vmem>>, vector<8x128xbf16>,
    %271 = arith.truncf %263 : vector<8x128xf32> to vector<8x128xbf16>
    %c0_121 = arith.constant 0 : index
    %c128_122 = arith.constant 128 : index
    %272 = vector.load %arg13[%c0_121, %c128_122] : memref<8x256xbf16, #tpu.memory_space<vmem>>, vector<8x128xbf16>
    tpu.vector_store %arg13[%c0_121, %c128_122], %271 {strides = array<i32>} : memref<8x256xbf16, #tpu.memory_space<vmem>>, vector<8x128xbf16>,
    %c4_i32 = arith.constant 4 : i32
    %c0_123 = arith.constant 0 : index
    %c0_124 = arith.constant 0 : index
    %273 = vector.load %arg13[%c0_123, %c0_124] : memref<8x256xbf16, #tpu.memory_space<vmem>>, vector<8x128xbf16>
    %c8_i32_125 = arith.constant 8 : i32
    %274 = arith.muli %c4_i32, %c8_i32_125 : i32
    %275 = tpu.assume_multiple %274, 8 : i32
    %276 = arith.index_cast %275 : i32 to index
    %c0_126 = arith.constant 0 : index
    %277 = vector.load %arg12[%276, %c0_126] : memref<64x512xf32, #tpu.memory_space<vmem>>, vector<8x512xf32>
    %c0_127 = arith.constant 0 : index
    %c0_128 = arith.constant 0 : index
    %278 = vector.load %arg4[%c0_127, %c0_128] : memref<128x512xbf16, #tpu.memory_space<vmem>>, vector<128x512xbf16>
    %cst_129 = arith.constant dense<0.000000e+00> : vector<8x512xf32>
    %279 = tpu.matmul %273, %278, %cst_129 {dimension_numbers = #tpu.dot_dimension_numbers<[1], [0], [0], [1], [0, 0, 1, 1], [], []>} : vector<8x128xbf16>, vector<128x512xbf16>, vector<8x512xf32> -> vector<8x512xf32>
    %280 = arith.addf %277, %279 : vector<8x512xf32>
    %c0_130 = arith.constant 0 : index
    %c0_131 = arith.constant 0 : index
    %281 = vector.load %arg14[%c0_130, %c0_131] : memref<8x128xf32, #tpu.memory_space<vmem>>, vector<8x128xf32>
    %282 = vector.extract_strided_slice %280 {offsets = [0, 0], sizes = [8, 128], strides = [1, 1]} : vector<8x512xf32> to vector<8x128xf32>
    %283 = arith.negf %282 : vector<8x128xf32>
    %284 = math.exp %283 : vector<8x128xf32>
    %cst_132 = arith.constant 1.000000e+00 : f32
    %285 = vector.broadcast %cst_132 : f32 to vector<8x128xf32>
    %286 = arith.addf %285, %284 : vector<8x128xf32>
    %287 = arith.divf %285, %286 : vector<8x128xf32>
    %288 = vector.extract_strided_slice %280 {offsets = [0, 128], sizes = [8, 128], strides = [1, 1]} : vector<8x512xf32> to vector<8x128xf32>
    %289 = arith.negf %288 : vector<8x128xf32>
    %290 = math.exp %289 : vector<8x128xf32>
    %cst_133 = arith.constant 1.000000e+00 : f32
    %291 = vector.broadcast %cst_133 : f32 to vector<8x128xf32>
    %292 = arith.addf %291, %290 : vector<8x128xf32>
    %293 = arith.divf %291, %292 : vector<8x128xf32>
    %294 = vector.extract_strided_slice %280 {offsets = [0, 256], sizes = [8, 128], strides = [1, 1]} : vector<8x512xf32> to vector<8x128xf32>
    %295 = math.tanh %294 : vector<8x128xf32>
    %296 = vector.extract_strided_slice %280 {offsets = [0, 384], sizes = [8, 128], strides = [1, 1]} : vector<8x512xf32> to vector<8x128xf32>
    %297 = arith.negf %296 : vector<8x128xf32>
    %298 = math.exp %297 : vector<8x128xf32>
    %cst_134 = arith.constant 1.000000e+00 : f32
    %299 = vector.broadcast %cst_134 : f32 to vector<8x128xf32>
    %300 = arith.addf %299, %298 : vector<8x128xf32>
    %301 = arith.divf %299, %300 : vector<8x128xf32>
    %302 = arith.mulf %293, %281 : vector<8x128xf32>
    %303 = arith.mulf %287, %295 : vector<8x128xf32>
    %304 = arith.addf %302, %303 : vector<8x128xf32>
    %305 = math.tanh %304 : vector<8x128xf32>
    %306 = arith.mulf %301, %305 : vector<8x128xf32>
    %c0_135 = arith.constant 0 : index
    %c0_136 = arith.constant 0 : index
    %307 = vector.load %arg14[%c0_135, %c0_136] : memref<8x128xf32, #tpu.memory_space<vmem>>, vector<8x128xf32>
    tpu.vector_store %arg14[%c0_135, %c0_136], %304 {strides = array<i32>} : memref<8x128xf32, #tpu.memory_space<vmem>>, vector<8x128xf32>,
    %c1_i32_137 = arith.constant 1 : i32
    %308 = arith.subi %c4_i32, %c1_i32_137 : i32
    %c0_138 = arith.constant 0 : index
    %c0_139 = arith.constant 0 : index
    %309 = vector.load %arg13[%c0_138, %c0_139] : memref<8x256xbf16, #tpu.memory_space<vmem>>, vector<8x256xbf16>
    %c0_140 = arith.constant 0 : index
    %c0_141 = arith.constant 0 : index
    %310 = vector.load %arg5[%c0_140, %c0_141] : memref<256x512xbf16, #tpu.memory_space<vmem>>, vector<256x512xbf16>
    %cst_142 = arith.constant dense<0.000000e+00> : vector<8x512xf32>
    %311 = tpu.matmul %309, %310, %cst_142 {dimension_numbers = #tpu.dot_dimension_numbers<[1], [0], [0], [1], [0, 0, 1, 1], [], []>} : vector<8x256xbf16>, vector<256x512xbf16>, vector<8x512xf32> -> vector<8x512xf32>
    %312 = vector.broadcast %4 : vector<1x512xf32> to vector<8x512xf32>
    %313 = arith.addf %311, %312 : vector<8x512xf32>
    %c0_143 = arith.constant 0 : index
    %c0_144 = arith.constant 0 : index
    %314 = vector.load %arg15[%c0_143, %c0_144] : memref<8x128xf32, #tpu.memory_space<vmem>>, vector<8x128xf32>
    %315 = vector.extract_strided_slice %313 {offsets = [0, 0], sizes = [8, 128], strides = [1, 1]} : vector<8x512xf32> to vector<8x128xf32>
    %316 = arith.negf %315 : vector<8x128xf32>
    %317 = math.exp %316 : vector<8x128xf32>
    %cst_145 = arith.constant 1.000000e+00 : f32
    %318 = vector.broadcast %cst_145 : f32 to vector<8x128xf32>
    %319 = arith.addf %318, %317 : vector<8x128xf32>
    %320 = arith.divf %318, %319 : vector<8x128xf32>
    %321 = vector.extract_strided_slice %313 {offsets = [0, 128], sizes = [8, 128], strides = [1, 1]} : vector<8x512xf32> to vector<8x128xf32>
    %322 = arith.negf %321 : vector<8x128xf32>
    %323 = math.exp %322 : vector<8x128xf32>
    %cst_146 = arith.constant 1.000000e+00 : f32
    %324 = vector.broadcast %cst_146 : f32 to vector<8x128xf32>
    %325 = arith.addf %324, %323 : vector<8x128xf32>
    %326 = arith.divf %324, %325 : vector<8x128xf32>
    %327 = vector.extract_strided_slice %313 {offsets = [0, 256], sizes = [8, 128], strides = [1, 1]} : vector<8x512xf32> to vector<8x128xf32>
    %328 = math.tanh %327 : vector<8x128xf32>
    %329 = vector.extract_strided_slice %313 {offsets = [0, 384], sizes = [8, 128], strides = [1, 1]} : vector<8x512xf32> to vector<8x128xf32>
    %330 = arith.negf %329 : vector<8x128xf32>
    %331 = math.exp %330 : vector<8x128xf32>
    %cst_147 = arith.constant 1.000000e+00 : f32
    %332 = vector.broadcast %cst_147 : f32 to vector<8x128xf32>
    %333 = arith.addf %332, %331 : vector<8x128xf32>
    %334 = arith.divf %332, %333 : vector<8x128xf32>
    %335 = arith.mulf %326, %314 : vector<8x128xf32>
    %336 = arith.mulf %320, %328 : vector<8x128xf32>
    %337 = arith.addf %335, %336 : vector<8x128xf32>
    %338 = math.tanh %337 : vector<8x128xf32>
    %339 = arith.mulf %334, %338 : vector<8x128xf32>
    %c8_i32_148 = arith.constant 8 : i32
    %340 = arith.muli %308, %c8_i32_148 : i32
    %341 = tpu.assume_multiple %340, 8 : i32
    %342 = arith.index_cast %341 : i32 to index
    %c0_149 = arith.constant 0 : index
    %343 = vector.load %arg9[%342, %c0_149] : memref<64x128xf32, #tpu.memory_space<vmem>>, vector<8x128xf32>
    tpu.vector_store %arg9[%342, %c0_149], %339 {strides = array<i32>} : memref<64x128xf32, #tpu.memory_space<vmem>>, vector<8x128xf32>,
    %c0_150 = arith.constant 0 : index
    %c0_151 = arith.constant 0 : index
    %344 = vector.load %arg15[%c0_150, %c0_151] : memref<8x128xf32, #tpu.memory_space<vmem>>, vector<8x128xf32>
    tpu.vector_store %arg15[%c0_150, %c0_151], %337 {strides = array<i32>} : memref<8x128xf32, #tpu.memory_space<vmem>>, vector<8x128xf32>,
    %345 = arith.truncf %306 : vector<8x128xf32> to vector<8x128xbf16>
    %c0_152 = arith.constant 0 : index
    %c0_153 = arith.constant 0 : index
    %346 = vector.load %arg13[%c0_152, %c0_153] : memref<8x256xbf16, #tpu.memory_space<vmem>>, vector<8x128xbf16>
    tpu.vector_store %arg13[%c0_152, %c0_153], %345 {strides = array<i32>} : memref<8x256xbf16, #tpu.memory_space<vmem>>, vector<8x128xbf16>,
    %347 = arith.truncf %339 : vector<8x128xf32> to vector<8x128xbf16>
    %c0_154 = arith.constant 0 : index
    %c128_155 = arith.constant 128 : index
    %348 = vector.load %arg13[%c0_154, %c128_155] : memref<8x256xbf16, #tpu.memory_space<vmem>>, vector<8x128xbf16>
    tpu.vector_store %arg13[%c0_154, %c128_155], %347 {strides = array<i32>} : memref<8x256xbf16, #tpu.memory_space<vmem>>, vector<8x128xbf16>,
    %c5_i32 = arith.constant 5 : i32
    %c0_156 = arith.constant 0 : index
    %c0_157 = arith.constant 0 : index
    %349 = vector.load %arg13[%c0_156, %c0_157] : memref<8x256xbf16, #tpu.memory_space<vmem>>, vector<8x128xbf16>
    %c8_i32_158 = arith.constant 8 : i32
    %350 = arith.muli %c5_i32, %c8_i32_158 : i32
    %351 = tpu.assume_multiple %350, 8 : i32
    %352 = arith.index_cast %351 : i32 to index
    %c0_159 = arith.constant 0 : index
    %353 = vector.load %arg12[%352, %c0_159] : memref<64x512xf32, #tpu.memory_space<vmem>>, vector<8x512xf32>
    %c0_160 = arith.constant 0 : index
    %c0_161 = arith.constant 0 : index
    %354 = vector.load %arg4[%c0_160, %c0_161] : memref<128x512xbf16, #tpu.memory_space<vmem>>, vector<128x512xbf16>
    %cst_162 = arith.constant dense<0.000000e+00> : vector<8x512xf32>
    %355 = tpu.matmul %349, %354, %cst_162 {dimension_numbers = #tpu.dot_dimension_numbers<[1], [0], [0], [1], [0, 0, 1, 1], [], []>} : vector<8x128xbf16>, vector<128x512xbf16>, vector<8x512xf32> -> vector<8x512xf32>
    %356 = arith.addf %353, %355 : vector<8x512xf32>
    %c0_163 = arith.constant 0 : index
    %c0_164 = arith.constant 0 : index
    %357 = vector.load %arg14[%c0_163, %c0_164] : memref<8x128xf32, #tpu.memory_space<vmem>>, vector<8x128xf32>
    %358 = vector.extract_strided_slice %356 {offsets = [0, 0], sizes = [8, 128], strides = [1, 1]} : vector<8x512xf32> to vector<8x128xf32>
    %359 = arith.negf %358 : vector<8x128xf32>
    %360 = math.exp %359 : vector<8x128xf32>
    %cst_165 = arith.constant 1.000000e+00 : f32
    %361 = vector.broadcast %cst_165 : f32 to vector<8x128xf32>
    %362 = arith.addf %361, %360 : vector<8x128xf32>
    %363 = arith.divf %361, %362 : vector<8x128xf32>
    %364 = vector.extract_strided_slice %356 {offsets = [0, 128], sizes = [8, 128], strides = [1, 1]} : vector<8x512xf32> to vector<8x128xf32>
    %365 = arith.negf %364 : vector<8x128xf32>
    %366 = math.exp %365 : vector<8x128xf32>
    %cst_166 = arith.constant 1.000000e+00 : f32
    %367 = vector.broadcast %cst_166 : f32 to vector<8x128xf32>
    %368 = arith.addf %367, %366 : vector<8x128xf32>
    %369 = arith.divf %367, %368 : vector<8x128xf32>
    %370 = vector.extract_strided_slice %356 {offsets = [0, 256], sizes = [8, 128], strides = [1, 1]} : vector<8x512xf32> to vector<8x128xf32>
    %371 = math.tanh %370 : vector<8x128xf32>
    %372 = vector.extract_strided_slice %356 {offsets = [0, 384], sizes = [8, 128], strides = [1, 1]} : vector<8x512xf32> to vector<8x128xf32>
    %373 = arith.negf %372 : vector<8x128xf32>
    %374 = math.exp %373 : vector<8x128xf32>
    %cst_167 = arith.constant 1.000000e+00 : f32
    %375 = vector.broadcast %cst_167 : f32 to vector<8x128xf32>
    %376 = arith.addf %375, %374 : vector<8x128xf32>
    %377 = arith.divf %375, %376 : vector<8x128xf32>
    %378 = arith.mulf %369, %357 : vector<8x128xf32>
    %379 = arith.mulf %363, %371 : vector<8x128xf32>
    %380 = arith.addf %378, %379 : vector<8x128xf32>
    %381 = math.tanh %380 : vector<8x128xf32>
    %382 = arith.mulf %377, %381 : vector<8x128xf32>
    %c0_168 = arith.constant 0 : index
    %c0_169 = arith.constant 0 : index
    %383 = vector.load %arg14[%c0_168, %c0_169] : memref<8x128xf32, #tpu.memory_space<vmem>>, vector<8x128xf32>
    tpu.vector_store %arg14[%c0_168, %c0_169], %380 {strides = array<i32>} : memref<8x128xf32, #tpu.memory_space<vmem>>, vector<8x128xf32>,
    %c1_i32_170 = arith.constant 1 : i32
    %384 = arith.subi %c5_i32, %c1_i32_170 : i32
    %c0_171 = arith.constant 0 : index
    %c0_172 = arith.constant 0 : index
    %385 = vector.load %arg13[%c0_171, %c0_172] : memref<8x256xbf16, #tpu.memory_space<vmem>>, vector<8x256xbf16>
    %c0_173 = arith.constant 0 : index
    %c0_174 = arith.constant 0 : index
    %386 = vector.load %arg5[%c0_173, %c0_174] : memref<256x512xbf16, #tpu.memory_space<vmem>>, vector<256x512xbf16>
    %cst_175 = arith.constant dense<0.000000e+00> : vector<8x512xf32>
    %387 = tpu.matmul %385, %386, %cst_175 {dimension_numbers = #tpu.dot_dimension_numbers<[1], [0], [0], [1], [0, 0, 1, 1], [], []>} : vector<8x256xbf16>, vector<256x512xbf16>, vector<8x512xf32> -> vector<8x512xf32>
    %388 = vector.broadcast %4 : vector<1x512xf32> to vector<8x512xf32>
    %389 = arith.addf %387, %388 : vector<8x512xf32>
    %c0_176 = arith.constant 0 : index
    %c0_177 = arith.constant 0 : index
    %390 = vector.load %arg15[%c0_176, %c0_177] : memref<8x128xf32, #tpu.memory_space<vmem>>, vector<8x128xf32>
    %391 = vector.extract_strided_slice %389 {offsets = [0, 0], sizes = [8, 128], strides = [1, 1]} : vector<8x512xf32> to vector<8x128xf32>
    %392 = arith.negf %391 : vector<8x128xf32>
    %393 = math.exp %392 : vector<8x128xf32>
    %cst_178 = arith.constant 1.000000e+00 : f32
    %394 = vector.broadcast %cst_178 : f32 to vector<8x128xf32>
    %395 = arith.addf %394, %393 : vector<8x128xf32>
    %396 = arith.divf %394, %395 : vector<8x128xf32>
    %397 = vector.extract_strided_slice %389 {offsets = [0, 128], sizes = [8, 128], strides = [1, 1]} : vector<8x512xf32> to vector<8x128xf32>
    %398 = arith.negf %397 : vector<8x128xf32>
    %399 = math.exp %398 : vector<8x128xf32>
    %cst_179 = arith.constant 1.000000e+00 : f32
    %400 = vector.broadcast %cst_179 : f32 to vector<8x128xf32>
    %401 = arith.addf %400, %399 : vector<8x128xf32>
    %402 = arith.divf %400, %401 : vector<8x128xf32>
    %403 = vector.extract_strided_slice %389 {offsets = [0, 256], sizes = [8, 128], strides = [1, 1]} : vector<8x512xf32> to vector<8x128xf32>
    %404 = math.tanh %403 : vector<8x128xf32>
    %405 = vector.extract_strided_slice %389 {offsets = [0, 384], sizes = [8, 128], strides = [1, 1]} : vector<8x512xf32> to vector<8x128xf32>
    %406 = arith.negf %405 : vector<8x128xf32>
    %407 = math.exp %406 : vector<8x128xf32>
    %cst_180 = arith.constant 1.000000e+00 : f32
    %408 = vector.broadcast %cst_180 : f32 to vector<8x128xf32>
    %409 = arith.addf %408, %407 : vector<8x128xf32>
    %410 = arith.divf %408, %409 : vector<8x128xf32>
    %411 = arith.mulf %402, %390 : vector<8x128xf32>
    %412 = arith.mulf %396, %404 : vector<8x128xf32>
    %413 = arith.addf %411, %412 : vector<8x128xf32>
    %414 = math.tanh %413 : vector<8x128xf32>
    %415 = arith.mulf %410, %414 : vector<8x128xf32>
    %c8_i32_181 = arith.constant 8 : i32
    %416 = arith.muli %384, %c8_i32_181 : i32
    %417 = tpu.assume_multiple %416, 8 : i32
    %418 = arith.index_cast %417 : i32 to index
    %c0_182 = arith.constant 0 : index
    %419 = vector.load %arg9[%418, %c0_182] : memref<64x128xf32, #tpu.memory_space<vmem>>, vector<8x128xf32>
    tpu.vector_store %arg9[%418, %c0_182], %415 {strides = array<i32>} : memref<64x128xf32, #tpu.memory_space<vmem>>, vector<8x128xf32>,
    %c0_183 = arith.constant 0 : index
    %c0_184 = arith.constant 0 : index
    %420 = vector.load %arg15[%c0_183, %c0_184] : memref<8x128xf32, #tpu.memory_space<vmem>>, vector<8x128xf32>
    tpu.vector_store %arg15[%c0_183, %c0_184], %413 {strides = array<i32>} : memref<8x128xf32, #tpu.memory_space<vmem>>, vector<8x128xf32>,
    %421 = arith.truncf %382 : vector<8x128xf32> to vector<8x128xbf16>
    %c0_185 = arith.constant 0 : index
    %c0_186 = arith.constant 0 : index
    %422 = vector.load %arg13[%c0_185, %c0_186] : memref<8x256xbf16, #tpu.memory_space<vmem>>, vector<8x128xbf16>
    tpu.vector_store %arg13[%c0_185, %c0_186], %421 {strides = array<i32>} : memref<8x256xbf16, #tpu.memory_space<vmem>>, vector<8x128xbf16>,
    %423 = arith.truncf %415 : vector<8x128xf32> to vector<8x128xbf16>
    %c0_187 = arith.constant 0 : index
    %c128_188 = arith.constant 128 : index
    %424 = vector.load %arg13[%c0_187, %c128_188] : memref<8x256xbf16, #tpu.memory_space<vmem>>, vector<8x128xbf16>
    tpu.vector_store %arg13[%c0_187, %c128_188], %423 {strides = array<i32>} : memref<8x256xbf16, #tpu.memory_space<vmem>>, vector<8x128xbf16>,
    %c6_i32 = arith.constant 6 : i32
    %c0_189 = arith.constant 0 : index
    %c0_190 = arith.constant 0 : index
    %425 = vector.load %arg13[%c0_189, %c0_190] : memref<8x256xbf16, #tpu.memory_space<vmem>>, vector<8x128xbf16>
    %c8_i32_191 = arith.constant 8 : i32
    %426 = arith.muli %c6_i32, %c8_i32_191 : i32
    %427 = tpu.assume_multiple %426, 8 : i32
    %428 = arith.index_cast %427 : i32 to index
    %c0_192 = arith.constant 0 : index
    %429 = vector.load %arg12[%428, %c0_192] : memref<64x512xf32, #tpu.memory_space<vmem>>, vector<8x512xf32>
    %c0_193 = arith.constant 0 : index
    %c0_194 = arith.constant 0 : index
    %430 = vector.load %arg4[%c0_193, %c0_194] : memref<128x512xbf16, #tpu.memory_space<vmem>>, vector<128x512xbf16>
    %cst_195 = arith.constant dense<0.000000e+00> : vector<8x512xf32>
    %431 = tpu.matmul %425, %430, %cst_195 {dimension_numbers = #tpu.dot_dimension_numbers<[1], [0], [0], [1], [0, 0, 1, 1], [], []>} : vector<8x128xbf16>, vector<128x512xbf16>, vector<8x512xf32> -> vector<8x512xf32>
    %432 = arith.addf %429, %431 : vector<8x512xf32>
    %c0_196 = arith.constant 0 : index
    %c0_197 = arith.constant 0 : index
    %433 = vector.load %arg14[%c0_196, %c0_197] : memref<8x128xf32, #tpu.memory_space<vmem>>, vector<8x128xf32>
    %434 = vector.extract_strided_slice %432 {offsets = [0, 0], sizes = [8, 128], strides = [1, 1]} : vector<8x512xf32> to vector<8x128xf32>
    %435 = arith.negf %434 : vector<8x128xf32>
    %436 = math.exp %435 : vector<8x128xf32>
    %cst_198 = arith.constant 1.000000e+00 : f32
    %437 = vector.broadcast %cst_198 : f32 to vector<8x128xf32>
    %438 = arith.addf %437, %436 : vector<8x128xf32>
    %439 = arith.divf %437, %438 : vector<8x128xf32>
    %440 = vector.extract_strided_slice %432 {offsets = [0, 128], sizes = [8, 128], strides = [1, 1]} : vector<8x512xf32> to vector<8x128xf32>
    %441 = arith.negf %440 : vector<8x128xf32>
    %442 = math.exp %441 : vector<8x128xf32>
    %cst_199 = arith.constant 1.000000e+00 : f32
    %443 = vector.broadcast %cst_199 : f32 to vector<8x128xf32>
    %444 = arith.addf %443, %442 : vector<8x128xf32>
    %445 = arith.divf %443, %444 : vector<8x128xf32>
    %446 = vector.extract_strided_slice %432 {offsets = [0, 256], sizes = [8, 128], strides = [1, 1]} : vector<8x512xf32> to vector<8x128xf32>
    %447 = math.tanh %446 : vector<8x128xf32>
    %448 = vector.extract_strided_slice %432 {offsets = [0, 384], sizes = [8, 128], strides = [1, 1]} : vector<8x512xf32> to vector<8x128xf32>
    %449 = arith.negf %448 : vector<8x128xf32>
    %450 = math.exp %449 : vector<8x128xf32>
    %cst_200 = arith.constant 1.000000e+00 : f32
    %451 = vector.broadcast %cst_200 : f32 to vector<8x128xf32>
    %452 = arith.addf %451, %450 : vector<8x128xf32>
    %453 = arith.divf %451, %452 : vector<8x128xf32>
    %454 = arith.mulf %445, %433 : vector<8x128xf32>
    %455 = arith.mulf %439, %447 : vector<8x128xf32>
    %456 = arith.addf %454, %455 : vector<8x128xf32>
    %457 = math.tanh %456 : vector<8x128xf32>
    %458 = arith.mulf %453, %457 : vector<8x128xf32>
    %c0_201 = arith.constant 0 : index
    %c0_202 = arith.constant 0 : index
    %459 = vector.load %arg14[%c0_201, %c0_202] : memref<8x128xf32, #tpu.memory_space<vmem>>, vector<8x128xf32>
    tpu.vector_store %arg14[%c0_201, %c0_202], %456 {strides = array<i32>} : memref<8x128xf32, #tpu.memory_space<vmem>>, vector<8x128xf32>,
    %c1_i32_203 = arith.constant 1 : i32
    %460 = arith.subi %c6_i32, %c1_i32_203 : i32
    %c0_204 = arith.constant 0 : index
    %c0_205 = arith.constant 0 : index
    %461 = vector.load %arg13[%c0_204, %c0_205] : memref<8x256xbf16, #tpu.memory_space<vmem>>, vector<8x256xbf16>
    %c0_206 = arith.constant 0 : index
    %c0_207 = arith.constant 0 : index
    %462 = vector.load %arg5[%c0_206, %c0_207] : memref<256x512xbf16, #tpu.memory_space<vmem>>, vector<256x512xbf16>
    %cst_208 = arith.constant dense<0.000000e+00> : vector<8x512xf32>
    %463 = tpu.matmul %461, %462, %cst_208 {dimension_numbers = #tpu.dot_dimension_numbers<[1], [0], [0], [1], [0, 0, 1, 1], [], []>} : vector<8x256xbf16>, vector<256x512xbf16>, vector<8x512xf32> -> vector<8x512xf32>
    %464 = vector.broadcast %4 : vector<1x512xf32> to vector<8x512xf32>
    %465 = arith.addf %463, %464 : vector<8x512xf32>
    %c0_209 = arith.constant 0 : index
    %c0_210 = arith.constant 0 : index
    %466 = vector.load %arg15[%c0_209, %c0_210] : memref<8x128xf32, #tpu.memory_space<vmem>>, vector<8x128xf32>
    %467 = vector.extract_strided_slice %465 {offsets = [0, 0], sizes = [8, 128], strides = [1, 1]} : vector<8x512xf32> to vector<8x128xf32>
    %468 = arith.negf %467 : vector<8x128xf32>
    %469 = math.exp %468 : vector<8x128xf32>
    %cst_211 = arith.constant 1.000000e+00 : f32
    %470 = vector.broadcast %cst_211 : f32 to vector<8x128xf32>
    %471 = arith.addf %470, %469 : vector<8x128xf32>
    %472 = arith.divf %470, %471 : vector<8x128xf32>
    %473 = vector.extract_strided_slice %465 {offsets = [0, 128], sizes = [8, 128], strides = [1, 1]} : vector<8x512xf32> to vector<8x128xf32>
    %474 = arith.negf %473 : vector<8x128xf32>
    %475 = math.exp %474 : vector<8x128xf32>
    %cst_212 = arith.constant 1.000000e+00 : f32
    %476 = vector.broadcast %cst_212 : f32 to vector<8x128xf32>
    %477 = arith.addf %476, %475 : vector<8x128xf32>
    %478 = arith.divf %476, %477 : vector<8x128xf32>
    %479 = vector.extract_strided_slice %465 {offsets = [0, 256], sizes = [8, 128], strides = [1, 1]} : vector<8x512xf32> to vector<8x128xf32>
    %480 = math.tanh %479 : vector<8x128xf32>
    %481 = vector.extract_strided_slice %465 {offsets = [0, 384], sizes = [8, 128], strides = [1, 1]} : vector<8x512xf32> to vector<8x128xf32>
    %482 = arith.negf %481 : vector<8x128xf32>
    %483 = math.exp %482 : vector<8x128xf32>
    %cst_213 = arith.constant 1.000000e+00 : f32
    %484 = vector.broadcast %cst_213 : f32 to vector<8x128xf32>
    %485 = arith.addf %484, %483 : vector<8x128xf32>
    %486 = arith.divf %484, %485 : vector<8x128xf32>
    %487 = arith.mulf %478, %466 : vector<8x128xf32>
    %488 = arith.mulf %472, %480 : vector<8x128xf32>
    %489 = arith.addf %487, %488 : vector<8x128xf32>
    %490 = math.tanh %489 : vector<8x128xf32>
    %491 = arith.mulf %486, %490 : vector<8x128xf32>
    %c8_i32_214 = arith.constant 8 : i32
    %492 = arith.muli %460, %c8_i32_214 : i32
    %493 = tpu.assume_multiple %492, 8 : i32
    %494 = arith.index_cast %493 : i32 to index
    %c0_215 = arith.constant 0 : index
    %495 = vector.load %arg9[%494, %c0_215] : memref<64x128xf32, #tpu.memory_space<vmem>>, vector<8x128xf32>
    tpu.vector_store %arg9[%494, %c0_215], %491 {strides = array<i32>} : memref<64x128xf32, #tpu.memory_space<vmem>>, vector<8x128xf32>,
    %c0_216 = arith.constant 0 : index
    %c0_217 = arith.constant 0 : index
    %496 = vector.load %arg15[%c0_216, %c0_217] : memref<8x128xf32, #tpu.memory_space<vmem>>, vector<8x128xf32>
    tpu.vector_store %arg15[%c0_216, %c0_217], %489 {strides = array<i32>} : memref<8x128xf32, #tpu.memory_space<vmem>>, vector<8x128xf32>,
    %497 = arith.truncf %458 : vector<8x128xf32> to vector<8x128xbf16>
    %c0_218 = arith.constant 0 : index
    %c0_219 = arith.constant 0 : index
    %498 = vector.load %arg13[%c0_218, %c0_219] : memref<8x256xbf16, #tpu.memory_space<vmem>>, vector<8x128xbf16>
    tpu.vector_store %arg13[%c0_218, %c0_219], %497 {strides = array<i32>} : memref<8x256xbf16, #tpu.memory_space<vmem>>, vector<8x128xbf16>,
    %499 = arith.truncf %491 : vector<8x128xf32> to vector<8x128xbf16>
    %c0_220 = arith.constant 0 : index
    %c128_221 = arith.constant 128 : index
    %500 = vector.load %arg13[%c0_220, %c128_221] : memref<8x256xbf16, #tpu.memory_space<vmem>>, vector<8x128xbf16>
    tpu.vector_store %arg13[%c0_220, %c128_221], %499 {strides = array<i32>} : memref<8x256xbf16, #tpu.memory_space<vmem>>, vector<8x128xbf16>,
    %c7_i32 = arith.constant 7 : i32
    %c0_222 = arith.constant 0 : index
    %c0_223 = arith.constant 0 : index
    %501 = vector.load %arg13[%c0_222, %c0_223] : memref<8x256xbf16, #tpu.memory_space<vmem>>, vector<8x128xbf16>
    %c8_i32_224 = arith.constant 8 : i32
    %502 = arith.muli %c7_i32, %c8_i32_224 : i32
    %503 = tpu.assume_multiple %502, 8 : i32
    %504 = arith.index_cast %503 : i32 to index
    %c0_225 = arith.constant 0 : index
    %505 = vector.load %arg12[%504, %c0_225] : memref<64x512xf32, #tpu.memory_space<vmem>>, vector<8x512xf32>
    %c0_226 = arith.constant 0 : index
    %c0_227 = arith.constant 0 : index
    %506 = vector.load %arg4[%c0_226, %c0_227] : memref<128x512xbf16, #tpu.memory_space<vmem>>, vector<128x512xbf16>
    %cst_228 = arith.constant dense<0.000000e+00> : vector<8x512xf32>
    %507 = tpu.matmul %501, %506, %cst_228 {dimension_numbers = #tpu.dot_dimension_numbers<[1], [0], [0], [1], [0, 0, 1, 1], [], []>} : vector<8x128xbf16>, vector<128x512xbf16>, vector<8x512xf32> -> vector<8x512xf32>
    %508 = arith.addf %505, %507 : vector<8x512xf32>
    %c0_229 = arith.constant 0 : index
    %c0_230 = arith.constant 0 : index
    %509 = vector.load %arg14[%c0_229, %c0_230] : memref<8x128xf32, #tpu.memory_space<vmem>>, vector<8x128xf32>
    %510 = vector.extract_strided_slice %508 {offsets = [0, 0], sizes = [8, 128], strides = [1, 1]} : vector<8x512xf32> to vector<8x128xf32>
    %511 = arith.negf %510 : vector<8x128xf32>
    %512 = math.exp %511 : vector<8x128xf32>
    %cst_231 = arith.constant 1.000000e+00 : f32
    %513 = vector.broadcast %cst_231 : f32 to vector<8x128xf32>
    %514 = arith.addf %513, %512 : vector<8x128xf32>
    %515 = arith.divf %513, %514 : vector<8x128xf32>
    %516 = vector.extract_strided_slice %508 {offsets = [0, 128], sizes = [8, 128], strides = [1, 1]} : vector<8x512xf32> to vector<8x128xf32>
    %517 = arith.negf %516 : vector<8x128xf32>
    %518 = math.exp %517 : vector<8x128xf32>
    %cst_232 = arith.constant 1.000000e+00 : f32
    %519 = vector.broadcast %cst_232 : f32 to vector<8x128xf32>
    %520 = arith.addf %519, %518 : vector<8x128xf32>
    %521 = arith.divf %519, %520 : vector<8x128xf32>
    %522 = vector.extract_strided_slice %508 {offsets = [0, 256], sizes = [8, 128], strides = [1, 1]} : vector<8x512xf32> to vector<8x128xf32>
    %523 = math.tanh %522 : vector<8x128xf32>
    %524 = vector.extract_strided_slice %508 {offsets = [0, 384], sizes = [8, 128], strides = [1, 1]} : vector<8x512xf32> to vector<8x128xf32>
    %525 = arith.negf %524 : vector<8x128xf32>
    %526 = math.exp %525 : vector<8x128xf32>
    %cst_233 = arith.constant 1.000000e+00 : f32
    %527 = vector.broadcast %cst_233 : f32 to vector<8x128xf32>
    %528 = arith.addf %527, %526 : vector<8x128xf32>
    %529 = arith.divf %527, %528 : vector<8x128xf32>
    %530 = arith.mulf %521, %509 : vector<8x128xf32>
    %531 = arith.mulf %515, %523 : vector<8x128xf32>
    %532 = arith.addf %530, %531 : vector<8x128xf32>
    %533 = math.tanh %532 : vector<8x128xf32>
    %534 = arith.mulf %529, %533 : vector<8x128xf32>
    %c0_234 = arith.constant 0 : index
    %c0_235 = arith.constant 0 : index
    %535 = vector.load %arg14[%c0_234, %c0_235] : memref<8x128xf32, #tpu.memory_space<vmem>>, vector<8x128xf32>
    tpu.vector_store %arg14[%c0_234, %c0_235], %532 {strides = array<i32>} : memref<8x128xf32, #tpu.memory_space<vmem>>, vector<8x128xf32>,
    %c1_i32_236 = arith.constant 1 : i32
    %536 = arith.subi %c7_i32, %c1_i32_236 : i32
    %c0_237 = arith.constant 0 : index
    %c0_238 = arith.constant 0 : index
    %537 = vector.load %arg13[%c0_237, %c0_238] : memref<8x256xbf16, #tpu.memory_space<vmem>>, vector<8x256xbf16>
    %c0_239 = arith.constant 0 : index
    %c0_240 = arith.constant 0 : index
    %538 = vector.load %arg5[%c0_239, %c0_240] : memref<256x512xbf16, #tpu.memory_space<vmem>>, vector<256x512xbf16>
    %cst_241 = arith.constant dense<0.000000e+00> : vector<8x512xf32>
    %539 = tpu.matmul %537, %538, %cst_241 {dimension_numbers = #tpu.dot_dimension_numbers<[1], [0], [0], [1], [0, 0, 1, 1], [], []>} : vector<8x256xbf16>, vector<256x512xbf16>, vector<8x512xf32> -> vector<8x512xf32>
    %540 = vector.broadcast %4 : vector<1x512xf32> to vector<8x512xf32>
    %541 = arith.addf %539, %540 : vector<8x512xf32>
    %c0_242 = arith.constant 0 : index
    %c0_243 = arith.constant 0 : index
    %542 = vector.load %arg15[%c0_242, %c0_243] : memref<8x128xf32, #tpu.memory_space<vmem>>, vector<8x128xf32>
    %543 = vector.extract_strided_slice %541 {offsets = [0, 0], sizes = [8, 128], strides = [1, 1]} : vector<8x512xf32> to vector<8x128xf32>
    %544 = arith.negf %543 : vector<8x128xf32>
    %545 = math.exp %544 : vector<8x128xf32>
    %cst_244 = arith.constant 1.000000e+00 : f32
    %546 = vector.broadcast %cst_244 : f32 to vector<8x128xf32>
    %547 = arith.addf %546, %545 : vector<8x128xf32>
    %548 = arith.divf %546, %547 : vector<8x128xf32>
    %549 = vector.extract_strided_slice %541 {offsets = [0, 128], sizes = [8, 128], strides = [1, 1]} : vector<8x512xf32> to vector<8x128xf32>
    %550 = arith.negf %549 : vector<8x128xf32>
    %551 = math.exp %550 : vector<8x128xf32>
    %cst_245 = arith.constant 1.000000e+00 : f32
    %552 = vector.broadcast %cst_245 : f32 to vector<8x128xf32>
    %553 = arith.addf %552, %551 : vector<8x128xf32>
    %554 = arith.divf %552, %553 : vector<8x128xf32>
    %555 = vector.extract_strided_slice %541 {offsets = [0, 256], sizes = [8, 128], strides = [1, 1]} : vector<8x512xf32> to vector<8x128xf32>
    %556 = math.tanh %555 : vector<8x128xf32>
    %557 = vector.extract_strided_slice %541 {offsets = [0, 384], sizes = [8, 128], strides = [1, 1]} : vector<8x512xf32> to vector<8x128xf32>
    %558 = arith.negf %557 : vector<8x128xf32>
    %559 = math.exp %558 : vector<8x128xf32>
    %cst_246 = arith.constant 1.000000e+00 : f32
    %560 = vector.broadcast %cst_246 : f32 to vector<8x128xf32>
    %561 = arith.addf %560, %559 : vector<8x128xf32>
    %562 = arith.divf %560, %561 : vector<8x128xf32>
    %563 = arith.mulf %554, %542 : vector<8x128xf32>
    %564 = arith.mulf %548, %556 : vector<8x128xf32>
    %565 = arith.addf %563, %564 : vector<8x128xf32>
    %566 = math.tanh %565 : vector<8x128xf32>
    %567 = arith.mulf %562, %566 : vector<8x128xf32>
    %c8_i32_247 = arith.constant 8 : i32
    %568 = arith.muli %536, %c8_i32_247 : i32
    %569 = tpu.assume_multiple %568, 8 : i32
    %570 = arith.index_cast %569 : i32 to index
    %c0_248 = arith.constant 0 : index
    %571 = vector.load %arg9[%570, %c0_248] : memref<64x128xf32, #tpu.memory_space<vmem>>, vector<8x128xf32>
    tpu.vector_store %arg9[%570, %c0_248], %567 {strides = array<i32>} : memref<64x128xf32, #tpu.memory_space<vmem>>, vector<8x128xf32>,
    %c0_249 = arith.constant 0 : index
    %c0_250 = arith.constant 0 : index
    %572 = vector.load %arg15[%c0_249, %c0_250] : memref<8x128xf32, #tpu.memory_space<vmem>>, vector<8x128xf32>
    tpu.vector_store %arg15[%c0_249, %c0_250], %565 {strides = array<i32>} : memref<8x128xf32, #tpu.memory_space<vmem>>, vector<8x128xf32>,
    %573 = arith.truncf %534 : vector<8x128xf32> to vector<8x128xbf16>
    %c0_251 = arith.constant 0 : index
    %c0_252 = arith.constant 0 : index
    %574 = vector.load %arg13[%c0_251, %c0_252] : memref<8x256xbf16, #tpu.memory_space<vmem>>, vector<8x128xbf16>
    tpu.vector_store %arg13[%c0_251, %c0_252], %573 {strides = array<i32>} : memref<8x256xbf16, #tpu.memory_space<vmem>>, vector<8x128xbf16>,
    %575 = arith.truncf %567 : vector<8x128xf32> to vector<8x128xbf16>
    %c0_253 = arith.constant 0 : index
    %c128_254 = arith.constant 128 : index
    %576 = vector.load %arg13[%c0_253, %c128_254] : memref<8x256xbf16, #tpu.memory_space<vmem>>, vector<8x128xbf16>
    tpu.vector_store %arg13[%c0_253, %c128_254], %575 {strides = array<i32>} : memref<8x256xbf16, #tpu.memory_space<vmem>>, vector<8x128xbf16>,
    %c7_i32_255 = arith.constant 7 : i32
    %c0_256 = arith.constant 0 : index
    %c0_257 = arith.constant 0 : index
    %577 = vector.load %arg13[%c0_256, %c0_257] : memref<8x256xbf16, #tpu.memory_space<vmem>>, vector<8x256xbf16>
    %c0_258 = arith.constant 0 : index
    %c0_259 = arith.constant 0 : index
    %578 = vector.load %arg5[%c0_258, %c0_259] : memref<256x512xbf16, #tpu.memory_space<vmem>>, vector<256x512xbf16>
    %cst_260 = arith.constant dense<0.000000e+00> : vector<8x512xf32>
    %579 = tpu.matmul %577, %578, %cst_260 {dimension_numbers = #tpu.dot_dimension_numbers<[1], [0], [0], [1], [0, 0, 1, 1], [], []>} : vector<8x256xbf16>, vector<256x512xbf16>, vector<8x512xf32> -> vector<8x512xf32>
    %580 = vector.broadcast %4 : vector<1x512xf32> to vector<8x512xf32>
    %581 = arith.addf %579, %580 : vector<8x512xf32>
    %c0_261 = arith.constant 0 : index
    %c0_262 = arith.constant 0 : index
    %582 = vector.load %arg15[%c0_261, %c0_262] : memref<8x128xf32, #tpu.memory_space<vmem>>, vector<8x128xf32>
    %583 = vector.extract_strided_slice %581 {offsets = [0, 0], sizes = [8, 128], strides = [1, 1]} : vector<8x512xf32> to vector<8x128xf32>
    %584 = arith.negf %583 : vector<8x128xf32>
    %585 = math.exp %584 : vector<8x128xf32>
    %cst_263 = arith.constant 1.000000e+00 : f32
    %586 = vector.broadcast %cst_263 : f32 to vector<8x128xf32>
    %587 = arith.addf %586, %585 : vector<8x128xf32>
    %588 = arith.divf %586, %587 : vector<8x128xf32>
    %589 = vector.extract_strided_slice %581 {offsets = [0, 128], sizes = [8, 128], strides = [1, 1]} : vector<8x512xf32> to vector<8x128xf32>
    %590 = arith.negf %589 : vector<8x128xf32>
    %591 = math.exp %590 : vector<8x128xf32>
    %cst_264 = arith.constant 1.000000e+00 : f32
    %592 = vector.broadcast %cst_264 : f32 to vector<8x128xf32>
    %593 = arith.addf %592, %591 : vector<8x128xf32>
    %594 = arith.divf %592, %593 : vector<8x128xf32>
    %595 = vector.extract_strided_slice %581 {offsets = [0, 256], sizes = [8, 128], strides = [1, 1]} : vector<8x512xf32> to vector<8x128xf32>
    %596 = math.tanh %595 : vector<8x128xf32>
    %597 = vector.extract_strided_slice %581 {offsets = [0, 384], sizes = [8, 128], strides = [1, 1]} : vector<8x512xf32> to vector<8x128xf32>
    %598 = arith.negf %597 : vector<8x128xf32>
    %599 = math.exp %598 : vector<8x128xf32>
    %cst_265 = arith.constant 1.000000e+00 : f32
    %600 = vector.broadcast %cst_265 : f32 to vector<8x128xf32>
    %601 = arith.addf %600, %599 : vector<8x128xf32>
    %602 = arith.divf %600, %601 : vector<8x128xf32>
    %603 = arith.mulf %594, %582 : vector<8x128xf32>
    %604 = arith.mulf %588, %596 : vector<8x128xf32>
    %605 = arith.addf %603, %604 : vector<8x128xf32>
    %606 = math.tanh %605 : vector<8x128xf32>
    %607 = arith.mulf %602, %606 : vector<8x128xf32>
    %c56 = arith.constant 56 : index
    %c0_266 = arith.constant 0 : index
    %608 = vector.load %arg9[%c56, %c0_266] : memref<64x128xf32, #tpu.memory_space<vmem>>, vector<8x128xf32>
    tpu.vector_store %arg9[%c56, %c0_266], %607 {strides = array<i32>} : memref<64x128xf32, #tpu.memory_space<vmem>>, vector<8x128xf32>,
    %c0_267 = arith.constant 0 : index
    %c0_268 = arith.constant 0 : index
    %609 = vector.load %arg15[%c0_267, %c0_268] : memref<8x128xf32, #tpu.memory_space<vmem>>, vector<8x128xf32>
    tpu.vector_store %arg15[%c0_267, %c0_268], %605 {strides = array<i32>} : memref<8x128xf32, #tpu.memory_space<vmem>>, vector<8x128xf32>,
    %610 = arith.truncf %607 : vector<8x128xf32> to vector<8x128xbf16>
    %c0_269 = arith.constant 0 : index
    %c128_270 = arith.constant 128 : index
    %611 = vector.load %arg13[%c0_269, %c128_270] : memref<8x256xbf16, #tpu.memory_space<vmem>>, vector<8x128xbf16>
    tpu.vector_store %arg13[%c0_269, %c128_270], %610 {strides = array<i32>} : memref<8x256xbf16, #tpu.memory_space<vmem>>, vector<8x128xbf16>,
    %c0_i32_271 = arith.constant 0 : i32
    %612 = arith.cmpi eq, %arg0, %c0_i32_271 : i32
    %613 = arith.extui %612 : i1 to i32
    %c0_i32_272 = arith.constant 0 : i32
    %614 = arith.cmpi ne, %613, %c0_i32_272 : i32
    scf.if %614 {
      %c0_273 = arith.constant 0 : index
      %c0_274 = arith.constant 0 : index
      %615 = vector.load %arg13[%c0_273, %c0_274] : memref<8x256xbf16, #tpu.memory_space<vmem>>, vector<8x128xbf16>
      %616 = arith.extf %615 : vector<8x128xbf16> to vector<8x128xf32>
      %c0_275 = arith.constant 0 : index
      %c0_276 = arith.constant 0 : index
      %c0_277 = arith.constant 0 : index
      %617 = vector.load %arg10[%c0_275, %c0_276, %c0_277] : memref<2x8x128xf32, #tpu.memory_space<vmem>>, vector<1x8x128xf32>
      %618 = vector.shape_cast %617 : vector<1x8x128xf32> to vector<8x128xf32>
      %619 = vector.shape_cast %616 : vector<8x128xf32> to vector<1x8x128xf32>
      tpu.vector_store %arg10[%c0_275, %c0_276, %c0_277], %619 {strides = array<i32>} : memref<2x8x128xf32, #tpu.memory_space<vmem>>, vector<1x8x128xf32>,
      %c0_278 = arith.constant 0 : index
      %c128_279 = arith.constant 128 : index
      %620 = vector.load %arg13[%c0_278, %c128_279] : memref<8x256xbf16, #tpu.memory_space<vmem>>, vector<8x128xbf16>
      %621 = arith.extf %620 : vector<8x128xbf16> to vector<8x128xf32>
      %c1 = arith.constant 1 : index
      %c0_280 = arith.constant 0 : index
      %c0_281 = arith.constant 0 : index
      %622 = vector.load %arg10[%c1, %c0_280, %c0_281] : memref<2x8x128xf32, #tpu.memory_space<vmem>>, vector<1x8x128xf32>
      %623 = vector.shape_cast %622 : vector<1x8x128xf32> to vector<8x128xf32>
      %624 = vector.shape_cast %621 : vector<8x128xf32> to vector<1x8x128xf32>
      tpu.vector_store %arg10[%c1, %c0_280, %c0_281], %624 {strides = array<i32>} : memref<2x8x128xf32, #tpu.memory_space<vmem>>, vector<1x8x128xf32>,
      %c0_282 = arith.constant 0 : index
      %c0_283 = arith.constant 0 : index
      %625 = vector.load %arg14[%c0_282, %c0_283] : memref<8x128xf32, #tpu.memory_space<vmem>>, vector<8x128xf32>
      %c0_284 = arith.constant 0 : index
      %c0_285 = arith.constant 0 : index
      %c0_286 = arith.constant 0 : index
      %626 = vector.load %arg11[%c0_284, %c0_285, %c0_286] : memref<2x8x128xf32, #tpu.memory_space<vmem>>, vector<1x8x128xf32>
      %627 = vector.shape_cast %626 : vector<1x8x128xf32> to vector<8x128xf32>
      %628 = vector.shape_cast %625 : vector<8x128xf32> to vector<1x8x128xf32>
      tpu.vector_store %arg11[%c0_284, %c0_285, %c0_286], %628 {strides = array<i32>} : memref<2x8x128xf32, #tpu.memory_space<vmem>>, vector<1x8x128xf32>,
      %c0_287 = arith.constant 0 : index
      %c0_288 = arith.constant 0 : index
      %629 = vector.load %arg15[%c0_287, %c0_288] : memref<8x128xf32, #tpu.memory_space<vmem>>, vector<8x128xf32>
      %c1_289 = arith.constant 1 : index
      %c0_290 = arith.constant 0 : index
      %c0_291 = arith.constant 0 : index
      %630 = vector.load %arg11[%c1_289, %c0_290, %c0_291] : memref<2x8x128xf32, #tpu.memory_space<vmem>>, vector<1x8x128xf32>
      %631 = vector.shape_cast %630 : vector<1x8x128xf32> to vector<8x128xf32>
      %632 = vector.shape_cast %629 : vector<8x128xf32> to vector<1x8x128xf32>
      tpu.vector_store %arg11[%c1_289, %c0_290, %c0_291], %632 {strides = array<i32>} : memref<2x8x128xf32, #tpu.memory_space<vmem>>, vector<1x8x128xf32>,
    } else {
    }
    return
  }
  func.func @transform_0(%arg0: i32) -> (i32, i32) {
    %c0_i32 = arith.constant 0 : i32
    %c0_i32_0 = arith.constant 0 : i32
    return %arg0, %c0_i32 : i32, i32
  }
  func.func @transform_1(%arg0: i32) -> (i32, i32) {
    %c0_i32 = arith.constant 0 : i32
    %c0_i32_0 = arith.constant 0 : i32
    %c0_i32_1 = arith.constant 0 : i32
    return %c0_i32, %c0_i32_0 : i32, i32
  }
  func.func @transform_2(%arg0: i32) -> (i32, i32) {
    %c0_i32 = arith.constant 0 : i32
    %c0_i32_0 = arith.constant 0 : i32
    %c0_i32_1 = arith.constant 0 : i32
    return %c0_i32, %c0_i32_0 : i32, i32
  }
  func.func @transform_3(%arg0: i32) -> (i32, i32) {
    %c0_i32 = arith.constant 0 : i32
    %c0_i32_0 = arith.constant 0 : i32
    %c0_i32_1 = arith.constant 0 : i32
    return %c0_i32, %c0_i32_0 : i32, i32
  }
  func.func @transform_4(%arg0: i32) -> (i32, i32) {
    %c0_i32 = arith.constant 0 : i32
    %c0_i32_0 = arith.constant 0 : i32
    %c0_i32_1 = arith.constant 0 : i32
    return %c0_i32, %c0_i32_0 : i32, i32
  }
  func.func @transform_5(%arg0: i32) -> (i32, i32) {
    %c0_i32 = arith.constant 0 : i32
    %c0_i32_0 = arith.constant 0 : i32
    %c0_i32_1 = arith.constant 0 : i32
    return %c0_i32, %c0_i32_0 : i32, i32
  }
  func.func @transform_6(%arg0: i32) -> (i32, i32, i32) {
    %c0_i32 = arith.constant 0 : i32
    %c0_i32_0 = arith.constant 0 : i32
    %c0_i32_1 = arith.constant 0 : i32
    %c0_i32_2 = arith.constant 0 : i32
    return %c0_i32, %c0_i32_0, %c0_i32_1 : i32, i32, i32
  }
  func.func @transform_7(%arg0: i32) -> (i32, i32, i32) {
    %c0_i32 = arith.constant 0 : i32
    %c0_i32_0 = arith.constant 0 : i32
    %c0_i32_1 = arith.constant 0 : i32
    %c0_i32_2 = arith.constant 0 : i32
    return %c0_i32, %c0_i32_0, %c0_i32_1 : i32, i32, i32
  }
  func.func @transform_8(%arg0: i32) -> (i32, i32) {
    %c0_i32 = arith.constant 0 : i32
    %c0_i32_0 = arith.constant 0 : i32
    return %arg0, %c0_i32 : i32, i32
  }
  func.func @transform_9(%arg0: i32) -> (i32, i32, i32) {
    %c0_i32 = arith.constant 0 : i32
    %c0_i32_0 = arith.constant 0 : i32
    %c0_i32_1 = arith.constant 0 : i32
    %c0_i32_2 = arith.constant 0 : i32
    return %c0_i32, %c0_i32_0, %c0_i32_1 : i32, i32, i32
  }
  func.func @transform_10(%arg0: i32) -> (i32, i32, i32) {
    %c0_i32 = arith.constant 0 : i32
    %c0_i32_0 = arith.constant 0 : i32
    %c0_i32_1 = arith.constant 0 : i32
    %c0_i32_2 = arith.constant 0 : i32
    return %c0_i32, %c0_i32_0, %c0_i32_1 : i32, i32, i32
  }
}

</mosaic_0001>

<bundles_post_ra>
// kernel: rnn_model_forward.3
= control target key start
LH: loop header
LB: loop body
LE: loop exit
PB: predicated region body
PF: predicated region fallthrough
CT: control target
= control target key end

     0   :  { %s355_s1 = inlined_call_operand.vmem [shape: bf16[128,128], index: 1, kind: input, shape index: {}]   ;;  %s356_s0 = inlined_call_operand.vmem [shape: bf16[64,128], index: 0, kind: input, shape index: {}]   ;;  %s357_s2 = inlined_call_operand.vmem [shape: f32[1,128], index: 2, kind: input, shape index: {}]   ;;  %s358_s3 = inlined_call_operand.vmem [shape: f32[64,50], index: 3, kind: output, shape index: {}]  }
   0x1   :  { %v260_v0 = vld [vmem:[%s355_s1 + $0x38] sm:$0xff]   ;;  %v261_v1 = vld [vmem:[%s355_s1 + $0x30] sm:$0xff]   ;;  %v262_v2 = vld [vmem:[%s355_s1 + $0x28] sm:$0xff]  }
   0x2   :  { %220 = vmatprep.subr.bf16.mxu0 %v260_v0  ;;  %244 = vmatprep.subr.bf16.mxu1 %v260_v0  ;;  %v263_v3 = vld [vmem:[%s355_s1 + $0x20] sm:$0xff]   ;;  %v269_v5 = vld [vmem:[%s356_s0 + $0x10] sm:$0xff]   ;;  %v264_v6 = vld [vmem:[%s355_s1 + $0x18] sm:$0xff]  }
   0x3   :  { %221 = vmatpush3.bf16.msra.mxu0 %v260_v0  ;;  %252 = vmatpush3.bf16.msra.mxu1 %v260_v0  ;;  %v268_v4 = vld [vmem:[%s356_s0] sm:$0xff]   ;;  %v265_v7 = vld [vmem:[%s355_s1 + $0x10] sm:$0xff]   ;;  %v266_v8 = vld [vmem:[%s355_s1 + $0x8] sm:$0xff]  }
   0x4   :  { %222 = vmatprep.subr.bf16.mxu0 %v261_v1  ;;  %245 = vmatprep.subr.bf16.mxu1 %v261_v1  ;;  %v267_v9 = vld [vmem:[%s355_s1] sm:$0xff]   ;;  %v270_v10 = vld [vmem:[%s356_s0 + $0x8] sm:$0xff]   ;;  %v271_v11 = vld [vmem:[%s356_s0 + $0x18] sm:$0xff]  }
   0x5   :  { %236 = vmatprep.mubr.bf16.mxu0 %v268_v4  ;;  %240 = vmatprep.mubr.bf16.mxu1 %v269_v5  ;;  %v195_v12 = vld [vmem:[%s357_s2] ss:$0 sm:$0xff] }
   0x7   :  { %223 = vmatpush3.bf16.msra.mxu0 %v261_v1  ;;  %253 = vmatpush3.bf16.msra.mxu1 %v261_v1 }
   0x8   :  { %224 = vmatprep.subr.bf16.mxu0 %v262_v2  ;;  %246 = vmatprep.subr.bf16.mxu1 %v262_v2 }
   0xb   :  { %225 = vmatpush3.bf16.msra.mxu0 %v262_v2  ;;  %254 = vmatpush3.bf16.msra.mxu1 %v262_v2 }
   0xc   :  { %226 = vmatprep.subr.bf16.mxu0 %v263_v3  ;;  %247 = vmatprep.subr.bf16.mxu1 %v263_v3 }
   0xf   :  { %227 = vmatpush3.bf16.msra.mxu0 %v263_v3  ;;  %255 = vmatpush3.bf16.msra.mxu1 %v263_v3 }
  0x10   :  { %228 = vmatprep.subr.bf16.mxu0 %v264_v6  ;;  %248 = vmatprep.subr.bf16.mxu1 %v264_v6 }
  0x13   :  { %229 = vmatpush3.bf16.msra.mxu0 %v264_v6  ;;  %256 = vmatpush3.bf16.msra.mxu1 %v264_v6 }
  0x14   :  { %230 = vmatprep.subr.bf16.mxu0 %v265_v7  ;;  %249 = vmatprep.subr.bf16.mxu1 %v265_v7 }
  0x17   :  { %231 = vmatpush3.bf16.msra.mxu0 %v265_v7  ;;  %257 = vmatpush3.bf16.msra.mxu1 %v265_v7 }
  0x18   :  { %232 = vmatprep.subr.bf16.mxu0 %v266_v8  ;;  %250 = vmatprep.subr.bf16.mxu1 %v266_v8 }
  0x1b   :  { %233 = vmatpush3.bf16.msra.mxu0 %v266_v8  ;;  %258 = vmatpush3.bf16.msra.mxu1 %v266_v8 }
  0x1c   :  { %234 = vmatprep.subr.bf16.mxu0 %v267_v9  ;;  %251 = vmatprep.subr.bf16.mxu1 %v267_v9 }
  0x1f   :  { %235 = vmatpush3.bf16.msra.mxu0 %v267_v9  ;;  %259 = vmatpush3.bf16.msra.mxu1 %v267_v9 }
  0x22   :  { %237 = vmatmul.mubr.bf16.vlgmr.msra.gmra.mxu0 %v270_v10  ;;  %241 = vmatmul.mubr.bf16.vlgmr.msra.gmra.mxu1 %v271_v11 }
  0xe2   :  { %v238_v13 = vpop.f32.mrf.mxu0  ;;  %v242_v14 = vpop.f32.mrf.mxu1 }
  0xe3   :  { %v161_v15 = vadd.f32 %v238_v13, %v195_v12  ;;  %v177_v16 = vadd.f32 %v242_v14, %v195_v12 }
  0xe4   :  { %v152_v17 = vpop.f32.mrf.mxu0  ;;  %v168_v18 = vpop.f32.mrf.mxu1 }
  0xe5   :  { %185 = vst [vmem:[%s358_s3 + $0x10] sm:$0xff] %v161_v15  ;;  %189 = vst [vmem:[%s358_s3 + $0x30] sm:$0xff] %v177_v16  ;;  %v153_v19 = vadd.f32 %v195_v12, %v152_v17  ;;  %v169_v20 = vadd.f32 %v195_v12, %v168_v18 }
  0xe6   :  { %v239_v21 = vpop.f32.mrf.mxu0  ;;  %v243_v22 = vpop.f32.mrf.mxu1 }
  0xe7   :  { %183 = vst [vmem:[%s358_s3] sm:$0xff] %v153_v19  ;;  %187 = vst [vmem:[%s358_s3 + $0x20] sm:$0xff] %v169_v20  ;;  %v164_v23 = vadd.f32 %v239_v21, %v195_v12  ;;  %v180_v24 = vadd.f32 %v243_v22, %v195_v12 }
  0xe8   :  { %v155_v25 = vpop.f32.mrf.mxu0  ;;  %v171_v26 = vpop.f32.mrf.mxu1 }
  0xe9   :  { %186 = vst [vmem:[%s358_s3 + $0x18] sm:$0xff] %v164_v23  ;;  %190 = vst [vmem:[%s358_s3 + $0x38] sm:$0xff] %v180_v24  ;;  %v156_v27 = vadd.f32 %v195_v12, %v155_v25  ;;  %v172_v28 = vadd.f32 %v195_v12, %v171_v26 }
  0xeb   :  { %184 = vst [vmem:[%s358_s3 + $0x8] sm:$0xff] %v156_v27  ;;  %188 = vst [vmem:[%s358_s3 + $0x28] sm:$0xff] %v172_v28 }

// kernel: rnn_model_forward.2
= control target key start
LH: loop header
LB: loop body
LE: loop exit
PB: predicated region body
PF: predicated region fallthrough
CT: control target
= control target key end

     0   :  { %16 = vsyncpa [#allocation7], 0  ;;  %s11144_s0 = inlined_call_operand.vmem [shape: bf16[64,32], index: 0, kind: input, shape index: {}]   ;;  %s11145_s1 = inlined_call_operand.vmem [shape: bf16[32,512], index: 1, kind: input, shape index: {}]   ;;  %s11146_s2 = inlined_call_operand.vmem [shape: f32[1,512], index: 2, kind: input, shape index: {}]   ;;  %s11147_s3 = inlined_call_operand.vmem [shape: bf16[128,512], index: 3, kind: input, shape index: {}]   ;;  %s11148_s4 = inlined_call_operand.hbm [shape: bf16[256,512], index: 4, kind: input, shape index: {}]   ;;  %s11149_s5 = inlined_call_operand.vmem [shape: f32[1,512], index: 5, kind: input, shape index: {}]   ;;  %s11150_s6 = inlined_call_operand.vmem [shape: f32[2,8,128], index: 6, kind: input, shape index: {}, may-alias: {6,7}]   ;;  %s11151_s7 = inlined_call_operand.vmem [shape: f32[2,8,128], index: 7, kind: input, shape index: {}, may-alias: {6,7}]   ;;  %s11152_s8 = inlined_call_operand.vmem [shape: f32[64,128], index: 8, kind: output, shape index: {0}]   ;;  %s11153_s9 = inlined_call_operand.hbm [shape: f32[2,8,128], index: 9, kind: output, shape index: {1}]   ;;  %s11154_s10 = inlined_call_operand.hbm [shape: f32[2,8,128], index: 10, kind: output, shape index: {2}]  }
   0x1   :  { %17 = vsyncpa [#allocation8], 0 }
   0x2   :  { %18 = vsyncpa [#allocation11], 0  ;;  %s8816_s13 = smov [#allocation6]  }
   0x3   :  { %s32_s14 = sshll.u32 %s8816_s13, 4  ;;  %s33_s14 = int_to_ptr.vmem [resolvable:$true] %s32_s14 }
   0x4   :  { %s8758_s15 = scalar_lea.vmem %s33_s14, 8192  ;;  %p8763_p1 = scmp.lt.s32.totalorder %s33_s14, %s33_s14 }
   0x5   :  { %p8759_p0 = scmp.ne.s32.totalorder %s33_s14, %s8758_s15  ;;  %p8764_p2 = scmp.lt.s32.totalorder %s8758_s15, %s8758_s15 }
   0x7   :  { %p8765_p3 = por %p8764_p2, %p8763_p1 }
   0x9   :  { %p8766_p4 = pnand %p8765_p3, %p8759_p0 }
   0xb   :  { %8769 = shalt.err (!%p8766_p4)
}
   0xc   :  { %s8817_s16 = smov 256   ;;  %s8818_s17 = smov 16  }
   0xd   :  { %38 = dma.hbm_to_vmem [thread:$0]  %s11148_s4, 8192, %s33_s14, [#allocation7], %s8817_s16, %s8817_s16, %s8818_s17  }
   0xe   :  { %8810 = dma.done.wait [#allocation7], 8192  }
   0xf   :  { %8811 = vsyncadd [#allocation7], 4294959104  ;;  %v11159_v0 = vmov 0   ;;  %v7886_v1 = vld [vmem:[%s11145_s1 + $0x24] ss:$16 sps:$4 sm:$0xff]   ;;  %vm164_vm0 = vcmask 261120   ;;  %v84_v51 = vlaneseq }
  0x10   :  { %209 = vmatprep.mubr.bf16.mxu0 %v11159_v0  ;;  %282 = vmatprep.mubr.bf16.mxu1 %v11159_v0  ;;  %v7888_v2 = vld [vmem:[%s11145_s1 + $0x2c] ss:$16 sps:$4 sm:$0xff]   ;;  %v7890_v3 = vld [vmem:[%s11145_s1 + $0x20] ss:$16 sps:$4 sm:$0xff]   ;;  %v7891_v4 = vld [vmem:[%s11145_s1 + $0x28] ss:$16 sps:$4 sm:$0xff]  }
  0x11   :  { %189 = vmatprep.subr.bf16.mxu0 %v7886_v1  ;;  %262 = vmatprep.subr.bf16.mxu1 %v7888_v2  ;;  %v7892_v5 = vld [vmem:[%s11145_s1 + $0x4] ss:$16 sps:$4 sm:$0xff]   ;;  %v7894_v6 = vld [vmem:[%s11145_s1 + $0xc] ss:$16 sps:$4 sm:$0xff]   ;;  %v7896_v7 = vld [vmem:[%s11145_s1] ss:$16 sps:$4 sm:$0xff]  }
  0x12   :  { %190 = vmatpush1.bf16.msra.mxu0 %v7890_v3  ;;  %263 = vmatpush1.bf16.msra.mxu1 %v7891_v4  ;;  %v7897_v8 = vld [vmem:[%s11145_s1 + $0x8] ss:$16 sps:$4 sm:$0xff]   ;;  %v7898_v9 = vld [vmem:[%s11144_s0] sm:$0xff]   ;;  %v8929_v13 = vld [vmem:[%s11147_s3 + $0xec] ss:$16 sps:$4 sm:$0xff]   ;;  %v9134_v52 = vshrl.u32 %v84_v51, 7 }
  0x13   :  { %191 = vmatprep.subr.bf16.mxu0 %v7892_v5  ;;  %264 = vmatprep.subr.bf16.mxu1 %v7894_v6  ;;  %v8914_v10 = vld [vmem:[%s11147_s3 + $0xe0] ss:$16 sps:$4 sm:$0xff]   ;;  %v8919_v11 = vld [vmem:[%s11147_s3 + $0xe4] ss:$16 sps:$4 sm:$0xff]   ;;  %v8924_v12 = vld [vmem:[%s11147_s3 + $0xe8] ss:$16 sps:$4 sm:$0xff]  }
  0x14   :  { %v8936_v14 = vld [vmem:[%s11147_s3 + $0xc4] ss:$16 sps:$4 sm:$0xff]   ;;  %v8943_v15 = vld [vmem:[%s11147_s3 + $0xc0] ss:$16 sps:$4 sm:$0xff]   ;;  %v8948_v16 = vld [vmem:[%s11147_s3 + $0xcc] ss:$16 sps:$4 sm:$0xff]  }
  0x15   :  { %v8955_v17 = vld [vmem:[%s11147_s3 + $0xc8] ss:$16 sps:$4 sm:$0xff]   ;;  %v8962_v18 = vld [vmem:[%s11147_s3 + $0xa4] ss:$16 sps:$4 sm:$0xff]   ;;  %v8972_v20 = vld [vmem:[%s11147_s3 + $0xac] ss:$16 sps:$4 sm:$0xff]  }
  0x16   :  { %192 = vmatpush1.bf16.msra.mxu0 %v7896_v7  ;;  %265 = vmatpush1.bf16.msra.mxu1 %v7897_v8  ;;  %v7911_v19 = vld [vmem:[%s11144_s0 + $0x8] sm:$0xff]   ;;  %v8979_v21 = vld [vmem:[%s11147_s3 + $0xa0] ss:$16 sps:$4 sm:$0xff]   ;;  %v8991_v23 = vld [vmem:[%s11147_s3 + $0x84] ss:$16 sps:$4 sm:$0xff]   ;;  %v11155_v53 = vsub.s32 2, %v9134_v52 }
  0x17   :  { %552 = vmatprep.subr.bf16.mxu0 %v8919_v11  ;;  %593 = vmatprep.subr.bf16.mxu1 %v8929_v13  ;;  %v8984_v22 = vld [vmem:[%s11147_s3 + $0xa8] ss:$16 sps:$4 sm:$0xff]   ;;  %v8996_v24 = vld [vmem:[%s11147_s3 + $0x8c] ss:$16 sps:$4 sm:$0xff]   ;;  %v9003_v25 = vld [vmem:[%s11147_s3 + $0x80] ss:$16 sps:$4 sm:$0xff]  }
  0x18   :  { %v9010_v26 = vld [vmem:[%s11147_s3 + $0x88] ss:$16 sps:$4 sm:$0xff]   ;;  %v9017_v27 = vld [vmem:[%s11147_s3 + $0x64] ss:$16 sps:$4 sm:$0xff]   ;;  %v9022_v28 = vld [vmem:[%s11147_s3 + $0x6c] ss:$16 sps:$4 sm:$0xff]  }
  0x19   :  { %6988 = vmatmul.mubr.msk.bf16.vlgmr.msra.gmra.mxu0 %vm164_vm0, %v7898_v9  ;;  %6992 = vmatmul.mubr.msk.bf16.vlgmr.msra.gmra.mxu1 %vm164_vm0, %v7898_v9  ;;  %v7924_v29 = vld [vmem:[%s11144_s0 + $0x10] sm:$0xff]   ;;  %v9037_v31 = vld [vmem:[%s11147_s3 + $0x68] ss:$16 sps:$4 sm:$0xff]   ;;  %v9051_v33 = vld [vmem:[%s11147_s3 + $0x4c] ss:$16 sps:$4 sm:$0xff]   ;;  %v11158_v54 = vsub.s32 0, %v9134_v52 }
  0x1a   :  { %553 = vmatpush1.bf16.msra.mxu0 %v8914_v10  ;;  %594 = vmatpush1.bf16.msra.mxu1 %v8924_v12  ;;  %v9032_v30 = vld [vmem:[%s11147_s3 + $0x60] ss:$16 sps:$4 sm:$0xff]   ;;  %v9044_v32 = vld [vmem:[%s11147_s3 + $0x44] ss:$16 sps:$4 sm:$0xff]   ;;  %v7934_v35 = vld [vmem:[%s11147_s3 + $0x48] ss:$16 sps:$4 sm:$0xff]  }
  0x1b   :  { %554 = vmatprep.subr.bf16.mxu0 %v8936_v14  ;;  %595 = vmatprep.subr.bf16.mxu1 %v8948_v16  ;;  %v7931_v34 = vld [vmem:[%s11147_s3 + $0x40] ss:$16 sps:$4 sm:$0xff]   ;;  %v7940_v36 = vld [vmem:[%s11147_s3 + $0x24] ss:$16 sps:$4 sm:$0xff]   ;;  %v7937_v37 = vld [vmem:[%s11144_s0 + $0x18] sm:$0xff]   ;;  %v11156_v55 = vsub.s32 3, %v9134_v52 }
  0x1c   :  { %219 = vmatprep.mubr.bf16.mxu0 %v11159_v0  ;;  %292 = vmatprep.mubr.bf16.mxu1 %v11159_v0  ;;  %v7943_v38 = vld [vmem:[%s11147_s3 + $0x2c] ss:$16 sps:$4 sm:$0xff]   ;;  %v7938_v39 = vld [vmem:[%s11147_s3 + $0x20] ss:$16 sps:$4 sm:$0xff]   ;;  %v7941_v40 = vld [vmem:[%s11147_s3 + $0x28] ss:$16 sps:$4 sm:$0xff]  }
  0x1d   :  { %v53_v41 = vld [vmem:[%s11150_s6] sm:$0xff]  ;;  %v7949_v43 = vld [vmem:[%s11147_s3 + $0xc] ss:$16 sps:$4 sm:$0xff]   ;;  %v7947_v47 = vld [vmem:[%s11147_s3 + $0x8] ss:$16 sps:$4 sm:$0xff]   ;;  %v11157_v60 = vsub.s32 1, %v9134_v52 }
  0x1e   :  { %555 = vmatpush1.bf16.msra.mxu0 %v8943_v15  ;;  %596 = vmatpush1.bf16.msra.mxu1 %v8955_v17  ;;  %v7946_v42 = vld [vmem:[%s11147_s3 + $0x4] ss:$16 sps:$4 sm:$0xff]   ;;  %v6974_v44 = vld [vmem:[%s11150_s6 + $0x8] sm:$0xff]  ;;  %v7944_v46 = vld [vmem:[%s11147_s3] ss:$16 sps:$4 sm:$0xff]   ;;  %s8820_s23 = smov [#allocation10]  }
  0x1f   :  { %556 = vmatprep.subr.bf16.mxu0 %v8962_v18  ;;  %597 = vmatprep.subr.bf16.mxu1 %v8972_v20  ;;  %v7837_v45 = vpack.c.bf16 %v6974_v44, %v53_v41  ;;  %v9128_v49 = vld [vmem:[#allocation6 + $0xe4] ss:$16 sps:$4 sm:$0xff]   ;;  %v9130_v50 = vld [vmem:[#allocation6 + $0xec] ss:$16 sps:$4 sm:$0xff]   ;;  %v65_v56 = vld [vmem:[%s11146_s2] sm:$0xf] }
  0x20   :  { %v9148_v59 = vrot.slane %v65_v56, %v11155_v53  ;;  %v87_v63 = vrot.slane %v65_v56, %v11158_v54  ;;  %v9159_v1 = vrot.slane %v65_v56, %v11156_v55  ;;  %v91_v4 = vrot.slane %v65_v56, %v11157_v60  ;;  %v9325_v53 = vld [vmem:[#allocation6 + $0x4] ss:$16 sps:$4 sm:$0xff]   ;;  %v9327_v55 = vld [vmem:[#allocation6 + $0xc] ss:$16 sps:$4 sm:$0xff]   ;;  %v9331_v60 = vld [vmem:[#allocation6] ss:$16 sps:$4 sm:$0xff]  }
  0x21   :  { %6989 = vmatmul.mubr.msk.bf16.gmra.mxu0 %vm164_vm0, %v7911_v19  ;;  %6993 = vmatmul.mubr.msk.bf16.gmra.mxu1 %vm164_vm0, %v7911_v19  ;;  %7838 = vst [vmem:[#allocation3] sm:$0xff] %v7837_v45   ;;  %v9333_v54 = vld [vmem:[#allocation6 + $0x8] ss:$16 sps:$4 sm:$0xff]   ;;  %s6949_s2 = sshll.u32 %s8820_s23, 4  ;;  %s6950_s2 = int_to_ptr.vmem [resolvable:$true] %s6949_s2 }
  0x22   :  { %557 = vmatpush1.bf16.msra.mxu0 %v8979_v21  ;;  %598 = vmatpush1.bf16.msra.mxu1 %v8984_v22  ;;  %s8770_s24 = scalar_lea.vmem %s6950_s2, 256  ;;  %p8775_p6 = scmp.lt.s32.totalorder %s6950_s2, %s6950_s2 }
  0x23   :  { %558 = vmatprep.subr.bf16.mxu0 %v8991_v23  ;;  %599 = vmatprep.subr.bf16.mxu1 %v8996_v24  ;;  %p8771_p5 = scmp.ne.s32.totalorder %s6950_s2, %s8770_s24  ;;  %p8776_p7 = scmp.lt.s32.totalorder %s8770_s24, %s8770_s24 }
  0x24   :  { %229 = vmatprep.mubr.bf16.mxu0 %v11159_v0  ;;  %302 = vmatprep.mubr.bf16.mxu1 %v11159_v0 }
  0x25   :  { %p8777_p8 = por %p8776_p7, %p8775_p6 }
  0x26   :  { %559 = vmatpush1.bf16.msra.mxu0 %v9003_v25  ;;  %600 = vmatpush1.bf16.msra.mxu1 %v9010_v26 }
  0x27   :  { %560 = vmatprep.subr.bf16.mxu0 %v9017_v27  ;;  %601 = vmatprep.subr.bf16.mxu1 %v9022_v28  ;;  %p8778_p9 = pnand %p8777_p8, %p8771_p5 }
  0x28   :  { %v355_v48 = vld [vmem:[#allocation3] sm:$0xf] }
  0x29   :  { %6990 = vmatmul.mubr.msk.bf16.gmra.mxu0 %vm164_vm0, %v7924_v29  ;;  %6994 = vmatmul.mubr.msk.bf16.gmra.mxu1 %vm164_vm0, %v7924_v29 }
  0x2a   :  { %561 = vmatpush1.bf16.msra.mxu0 %v9032_v30  ;;  %602 = vmatpush1.bf16.msra.mxu1 %v9037_v31 }
  0x2b   :  { %562 = vmatprep.subr.bf16.mxu0 %v9044_v32  ;;  %603 = vmatprep.subr.bf16.mxu1 %v9051_v33 }
  0x2c   :  { %239 = vmatprep.mubr.bf16.mxu0 %v11159_v0  ;;  %312 = vmatprep.mubr.bf16.mxu1 %v11159_v0 }
  0x2e   :  { %563 = vmatpush1.bf16.msra.mxu0 %v7931_v34  ;;  %604 = vmatpush1.bf16.msra.mxu1 %v7934_v35 }
  0x2f   :  { %564 = vmatprep.subr.bf16.mxu0 %v7940_v36  ;;  %605 = vmatprep.subr.bf16.mxu1 %v7943_v38 }
  0x31   :  { %6991 = vmatmul.mubr.msk.bf16.gmra.mxu0 %vm164_vm0, %v7937_v37  ;;  %6995 = vmatmul.mubr.msk.bf16.gmra.mxu1 %vm164_vm0, %v7937_v37 }
  0x32   :  { %565 = vmatpush1.bf16.msra.mxu0 %v7938_v39  ;;  %606 = vmatpush1.bf16.msra.mxu1 %v7941_v40 }
  0x33   :  { %566 = vmatprep.subr.bf16.mxu0 %v7946_v42  ;;  %607 = vmatprep.subr.bf16.mxu1 %v7949_v43 }
  0x34   :  { %584 = vmatprep.mubr.bf16.mxu0 %v11159_v0  ;;  %625 = vmatprep.mubr.bf16.mxu1 %v11159_v0 }
  0x36   :  { %567 = vmatpush1.bf16.msra.mxu0 %v7944_v46  ;;  %608 = vmatpush1.bf16.msra.mxu1 %v7947_v47 }
  0x37   :  { %866 = vmatprep.subr.bf16.mxu0 %v8919_v11  ;;  %907 = vmatprep.subr.bf16.mxu1 %v8929_v13 }
  0x39   :  { %585 = vmatmul.mubr.bf16.vlgmr.msra.gmra.mxu0 %v355_v48  ;;  %626 = vmatmul.mubr.bf16.vlgmr.msra.gmra.mxu1 %v355_v48 }
  0x3a   :  { %867 = vmatpush1.bf16.msra.mxu0 %v8914_v10  ;;  %908 = vmatpush1.bf16.msra.mxu1 %v8924_v12 }
  0x3b   :  { %868 = vmatprep.subr.bf16.mxu0 %v8936_v14  ;;  %909 = vmatprep.subr.bf16.mxu1 %v8948_v16 }
  0x3c   :  { %898 = vmatprep.mubr.bf16.mxu0 %v11159_v0  ;;  %939 = vmatprep.mubr.bf16.mxu1 %v11159_v0  ;;  %v9337_v0 = vld [vmem:[#allocation6 + $0x1e4] ss:$16 sps:$4 sm:$0xff]  }
  0x3e   :  { %869 = vmatpush1.bf16.msra.mxu0 %v8943_v15  ;;  %910 = vmatpush1.bf16.msra.mxu1 %v8955_v17 }
  0x3f   :  { %870 = vmatprep.subr.bf16.mxu0 %v8962_v18  ;;  %911 = vmatprep.subr.bf16.mxu1 %v8972_v20 }
  0x42   :  { %871 = vmatpush1.bf16.msra.mxu0 %v8979_v21  ;;  %912 = vmatpush1.bf16.msra.mxu1 %v8984_v22 }
  0x43   :  { %872 = vmatprep.subr.bf16.mxu0 %v8991_v23  ;;  %913 = vmatprep.subr.bf16.mxu1 %v8996_v24 }
  0x46   :  { %873 = vmatpush1.bf16.msra.mxu0 %v9003_v25  ;;  %914 = vmatpush1.bf16.msra.mxu1 %v9010_v26 }
  0x47   :  { %874 = vmatprep.subr.bf16.mxu0 %v9017_v27  ;;  %915 = vmatprep.subr.bf16.mxu1 %v9022_v28 }
  0x4a   :  { %875 = vmatpush1.bf16.msra.mxu0 %v9032_v30  ;;  %916 = vmatpush1.bf16.msra.mxu1 %v9037_v31 }
  0x4b   :  { %876 = vmatprep.subr.bf16.mxu0 %v9044_v32  ;;  %917 = vmatprep.subr.bf16.mxu1 %v9051_v33 }
  0x4e   :  { %877 = vmatpush1.bf16.msra.mxu0 %v7931_v34  ;;  %918 = vmatpush1.bf16.msra.mxu1 %v7934_v35 }
  0x4f   :  { %878 = vmatprep.subr.bf16.mxu0 %v7940_v36  ;;  %919 = vmatprep.subr.bf16.mxu1 %v7943_v38 }
  0x52   :  { %879 = vmatpush1.bf16.msra.mxu0 %v7938_v39  ;;  %920 = vmatpush1.bf16.msra.mxu1 %v7941_v40 }
  0x53   :  { %880 = vmatprep.subr.bf16.mxu0 %v7946_v42  ;;  %921 = vmatprep.subr.bf16.mxu1 %v7949_v43 }
  0x56   :  { %881 = vmatpush1.bf16.msra.mxu0 %v7944_v46  ;;  %922 = vmatpush1.bf16.msra.mxu1 %v7947_v47 }
  0x57   :  { %1391 = vmatprep.subr.bf16.mxu0 %v9128_v49  ;;  %1432 = vmatprep.subr.bf16.mxu1 %v9130_v50 }
  0xd9   :  { %v9142_v57 = vpop.f32.mrf.mxu0  ;;  %v9144_v58 = vpop.f32.mrf.mxu1 }
  0xdb   :  { %v9151_v61 = vpop.f32.mrf.mxu0  ;;  %v9153_v62 = vpop.f32.mrf.mxu1 }
  0xdd   :  { %v215_v2 = vpop.f32.mrf.mxu0  ;;  %v288_v3 = vpop.f32.mrf.mxu1 }
  0xde   :  { %v9163_v5 = vadd.f32 %v215_v2, %v87_v63  ;;  %v9166_v6 = vadd.f32 %v288_v3, %v9148_v59 }
  0xdf   :  { %v217_v7 = vpop.f32.mrf.mxu0  ;;  %v290_v8 = vpop.f32.mrf.mxu1 }
  0xe0   :  { %v9168_v9 = vadd.f32 %v217_v7, %v91_v4  ;;  %v9171_v10 = vadd.f32 %v290_v8, %v9159_v1 }
  0xe1   :  { %v221_v11 = vpop.f32.mrf.mxu0  ;;  %v294_v12 = vpop.f32.mrf.mxu1 }
  0xe2   :  { %v9173_v13 = vadd.f32 %v221_v11, %v87_v63  ;;  %v9176_v14 = vadd.f32 %v294_v12, %v9148_v59 }
  0xe3   :  { %v223_v15 = vpop.f32.mrf.mxu0  ;;  %v296_v16 = vpop.f32.mrf.mxu1 }
  0xe4   :  { %11341 = vst [vmem:[#allocation15_spill] sm:$0xff] %v9173_v13  ;;  %11342 = vst [vmem:[#allocation16_spill] sm:$0xff] %v9176_v14  ;;  %v9178_v17 = vadd.f32 %v223_v15, %v91_v4  ;;  %v9181_v18 = vadd.f32 %v296_v16, %v9159_v1  ;;  %v212_v15 = vadd.f32 %v9142_v57, %v87_v63  ;;  %v9405_v14 = vld [vmem:[#allocation6 + $0x148] ss:$16 sps:$4 sm:$0xff]   ;;  %v9409_v13 = vld [vmem:[#allocation6 + $0x124] ss:$16 sps:$4 sm:$0xff]  }
  0xe5   :  { %v225_v19 = vpop.f32.mrf.mxu0  ;;  %v298_v20 = vpop.f32.mrf.mxu1  ;;  %11376 = vst [vmem:[#allocation50_spill] sm:$0xff] %v9405_v14  ;;  %11377 = vst [vmem:[#allocation51_spill] sm:$0xff] %v9409_v13 }
  0xe6   :  { %11343 = vst [vmem:[#allocation17_spill] sm:$0xff] %v9178_v17  ;;  %11344 = vst [vmem:[#allocation18_spill] sm:$0xff] %v9181_v18  ;;  %v9183_v21 = vadd.f32 %v225_v19, %v87_v63  ;;  %v9186_v22 = vadd.f32 %v298_v20, %v9148_v59  ;;  %v9399_v18 = vld [vmem:[#allocation6 + $0x14c] ss:$16 sps:$4 sm:$0xff]   ;;  %v9403_v17 = vld [vmem:[#allocation6 + $0x140] ss:$16 sps:$4 sm:$0xff]  }
  0xe7   :  { %v227_v23 = vpop.f32.mrf.mxu0  ;;  %v300_v24 = vpop.f32.mrf.mxu1  ;;  %11374 = vst [vmem:[#allocation48_spill] sm:$0xff] %v9399_v18  ;;  %11375 = vst [vmem:[#allocation49_spill] sm:$0xff] %v9403_v17 }
  0xe8   :  { %11345 = vst [vmem:[#allocation19_spill] sm:$0xff] %v9183_v21  ;;  %11346 = vst [vmem:[#allocation20_spill] sm:$0xff] %v9186_v22  ;;  %v9188_v25 = vadd.f32 %v227_v23, %v91_v4  ;;  %v9191_v26 = vadd.f32 %v300_v24, %v9159_v1  ;;  %v214_v24 = vadd.f32 %v9151_v61, %v91_v4  ;;  %v9393_v22 = vld [vmem:[#allocation6 + $0x168] ss:$16 sps:$4 sm:$0xff]   ;;  %v9397_v21 = vld [vmem:[#allocation6 + $0x144] ss:$16 sps:$4 sm:$0xff]  }
  0xe9   :  { %v231_v27 = vpop.f32.mrf.mxu0  ;;  %v304_v28 = vpop.f32.mrf.mxu1  ;;  %11372 = vst [vmem:[#allocation46_spill] sm:$0xff] %v9393_v22  ;;  %11373 = vst [vmem:[#allocation47_spill] sm:$0xff] %v9397_v21 }
  0xea   :  { %11347 = vst [vmem:[#allocation21_spill] sm:$0xff] %v9188_v25  ;;  %11348 = vst [vmem:[#allocation22_spill] sm:$0xff] %v9191_v26  ;;  %v9193_v29 = vadd.f32 %v231_v27, %v87_v63  ;;  %v9196_v30 = vadd.f32 %v304_v28, %v9148_v59  ;;  %v9387_v26 = vld [vmem:[#allocation6 + $0x16c] ss:$16 sps:$4 sm:$0xff]   ;;  %v9391_v25 = vld [vmem:[#allocation6 + $0x160] ss:$16 sps:$4 sm:$0xff]  }
  0xeb   :  { %v233_v31 = vpop.f32.mrf.mxu0  ;;  %v306_v32 = vpop.f32.mrf.mxu1  ;;  %11370 = vst [vmem:[#allocation44_spill] sm:$0xff] %v9387_v26  ;;  %11371 = vst [vmem:[#allocation45_spill] sm:$0xff] %v9391_v25 }
  0xec   :  { %11349 = vst [vmem:[#allocation23_spill] sm:$0xff] %v9193_v29  ;;  %11350 = vst [vmem:[#allocation24_spill] sm:$0xff] %v9196_v30  ;;  %v9198_v33 = vadd.f32 %v233_v31, %v91_v4  ;;  %v9201_v34 = vadd.f32 %v306_v32, %v9159_v1  ;;  %v9381_v30 = vld [vmem:[#allocation6 + $0x188] ss:$16 sps:$4 sm:$0xff]   ;;  %v9385_v29 = vld [vmem:[#allocation6 + $0x164] ss:$16 sps:$4 sm:$0xff]  }
  0xed   :  { %v235_v35 = vpop.f32.mrf.mxu0  ;;  %v308_v36 = vpop.f32.mrf.mxu1  ;;  %11368 = vst [vmem:[#allocation42_spill] sm:$0xff] %v9381_v30  ;;  %11369 = vst [vmem:[#allocation43_spill] sm:$0xff] %v9385_v29 }
  0xee   :  { %11351 = vst [vmem:[#allocation25_spill] sm:$0xff] %v9198_v33  ;;  %11352 = vst [vmem:[#allocation26_spill] sm:$0xff] %v9201_v34  ;;  %v9203_v37 = vadd.f32 %v235_v35, %v87_v63  ;;  %v9206_v38 = vadd.f32 %v308_v36, %v9148_v59  ;;  %v9375_v34 = vld [vmem:[#allocation6 + $0x18c] ss:$16 sps:$4 sm:$0xff]   ;;  %v9379_v33 = vld [vmem:[#allocation6 + $0x180] ss:$16 sps:$4 sm:$0xff]  }
  0xef   :  { %v237_v39 = vpop.f32.mrf.mxu0  ;;  %v310_v40 = vpop.f32.mrf.mxu1  ;;  %11366 = vst [vmem:[#allocation40_spill] sm:$0xff] %v9375_v34  ;;  %11367 = vst [vmem:[#allocation41_spill] sm:$0xff] %v9379_v33 }
  0xf0   :  { %11353 = vst [vmem:[#allocation27_spill] sm:$0xff] %v9203_v37  ;;  %11354 = vst [vmem:[#allocation28_spill] sm:$0xff] %v9206_v38  ;;  %v9208_v41 = vadd.f32 %v237_v39, %v91_v4  ;;  %v9211_v42 = vadd.f32 %v310_v40, %v9159_v1  ;;  %v9369_v38 = vld [vmem:[#allocation6 + $0x1a8] ss:$16 sps:$4 sm:$0xff]   ;;  %v9373_v37 = vld [vmem:[#allocation6 + $0x184] ss:$16 sps:$4 sm:$0xff]  }
  0xf1   :  { %v241_v43 = vpop.f32.mrf.mxu0  ;;  %v314_v44 = vpop.f32.mrf.mxu1  ;;  %11365 = vst [vmem:[#allocation39_spill] sm:$0xff] %v9373_v37 }
  0xf2   :  { %11355 = vst [vmem:[#allocation29_spill] sm:$0xff] %v9208_v41  ;;  %11356 = vst [vmem:[#allocation30_spill] sm:$0xff] %v9211_v42  ;;  %v9213_v45 = vadd.f32 %v241_v43, %v87_v63  ;;  %v9216_v46 = vadd.f32 %v314_v44, %v9148_v59  ;;  %v9363_v42 = vld [vmem:[#allocation6 + $0x1ac] ss:$16 sps:$4 sm:$0xff]   ;;  %v9367_v41 = vld [vmem:[#allocation6 + $0x1a0] ss:$16 sps:$4 sm:$0xff]  }
  0xf3   :  { %v243_v47 = vpop.f32.mrf.mxu0  ;;  %v316_v48 = vpop.f32.mrf.mxu1 }
  0xf4   :  { %11357 = vst [vmem:[#allocation31_spill] sm:$0xff] %v9213_v45  ;;  %11358 = vst [vmem:[#allocation32_spill] sm:$0xff] %v9216_v46  ;;  %v9218_v51 = vadd.f32 %v243_v47, %v91_v4  ;;  %v9221_v56 = vadd.f32 %v316_v48, %v9159_v1  ;;  %v285_v47 = vadd.f32 %v9144_v58, %v9148_v59  ;;  %v9357_v46 = vld [vmem:[#allocation6 + $0x1c8] ss:$16 sps:$4 sm:$0xff]   ;;  %v9361_v45 = vld [vmem:[#allocation6 + $0x1a4] ss:$16 sps:$4 sm:$0xff]  }
  0xf5   :  { %v245_v2 = vpop.f32.mrf.mxu0  ;;  %v318_v3 = vpop.f32.mrf.mxu1 }
  0xf6   :  { %11359 = vst [vmem:[#allocation33_spill] sm:$0xff] %v9218_v51  ;;  %11360 = vst [vmem:[#allocation34_spill] sm:$0xff] %v9221_v56  ;;  %v9223_v7 = vadd.f32 %v245_v2, %v87_v63  ;;  %v9226_v8 = vadd.f32 %v318_v3, %v9148_v59  ;;  %v287_v63 = vadd.f32 %v9153_v62, %v9159_v1  ;;  %v60_v62 = vld [vmem:[%s11151_s7] sm:$0xff]  ;;  %v9355_v51 = vld [vmem:[#allocation6 + $0x1c0] ss:$16 sps:$4 sm:$0xff]  }
  0xf7   :  { %v247_v11 = vpop.f32.mrf.mxu0  ;;  %v320_v12 = vpop.f32.mrf.mxu1  ;;  %v9351_v56 = vld [vmem:[#allocation6 + $0x1cc] ss:$16 sps:$4 sm:$0xff]  }
  0xf8   :  { %11361 = vst [vmem:[#allocation35_spill] sm:$0xff] %v9223_v7  ;;  %11362 = vst [vmem:[#allocation36_spill] sm:$0xff] %v9226_v8  ;;  %v9229_v16 = vadd.f32 %v247_v11, %v91_v4  ;;  %v9232_v19 = vadd.f32 %v320_v12, %v9159_v1  ;;  %v9339_v8 = vld [vmem:[#allocation6 + $0x1ec] ss:$16 sps:$4 sm:$0xff]   ;;  %v9349_v7 = vld [vmem:[#allocation6 + $0x1c4] ss:$16 sps:$4 sm:$0xff]  }
  0xf9   :  { %v586_v20 = vpop.f32.mrf.mxu0  ;;  %v627_v23 = vpop.f32.mrf.mxu1 }
  0xfa   :  { %11363 = vst [vmem:[#allocation37_spill] sm:$0xff] %v9229_v16  ;;  %11364 = vst [vmem:[#allocation38_spill] sm:$0xff] %v9232_v19  ;;  %v634_v27 = vadd.f32 %v586_v20, %v212_v15  ;;  %v636_v48 = vadd.f32 %v627_v23, %v285_v47  ;;  %v9261_v47 = vld [vmem:[#allocation6 + $0xc8] ss:$16 sps:$4 sm:$0xff]   ;;  %v9343_v19 = vld [vmem:[#allocation6 + $0x1e0] ss:$16 sps:$4 sm:$0xff]  }
  0xfb   :  { %v588_v28 = vpop.f32.mrf.mxu0  ;;  %v629_v31 = vpop.f32.mrf.mxu1  ;;  %v9345_v16 = vld [vmem:[#allocation6 + $0x1e8] ss:$16 sps:$4 sm:$0xff]  }
  0xfc   :  { %v7028_v32 = vmul.f32 -1.442695, %v634_v27  ;;  %v635_v35 = vadd.f32 %v588_v28, %v214_v24  ;;  %v637_v44 = vadd.f32 %v629_v31, %v287_v63 }
  0xfd   :  { %v590_v36 = vpop.f32.mrf.mxu0  ;;  %v631_v39 = vpop.f32.mrf.mxu1 }
  0xfe   :  { %8480 = vpow2.f32 %v7028_v32  ;;  %v7029_v40 = vmul.f32 -1.442695, %v635_v35  ;;  %v7030_v61 = vmul.f32 -1.442695, %v637_v44  ;;  %v9245_v35 = vld [vmem:[#allocation6 + $0xe0] ss:$16 sps:$4 sm:$0xff]  }
  0xff   :  { %v591_v43 = vpop.f32.mrf.mxu0  ;;  %v632_v57 = vpop.f32.mrf.mxu1  ;;  %v9247_v36 = vld [vmem:[#allocation6 + $0xe8] ss:$16 sps:$4 sm:$0xff]   ;;  %v9249_v39 = vld [vmem:[#allocation6 + $0xc4] ss:$16 sps:$4 sm:$0xff]   ;;  %v9259_v44 = vld [vmem:[#allocation6 + $0xc0] ss:$16 sps:$4 sm:$0xff]  }
 0x100   :  { %8482 = vpow2.f32 %v7029_v40  ;;  %v9253_v57 = vld [vmem:[#allocation6 + $0xcc] ss:$16 sps:$4 sm:$0xff]  }
 0x101   :  { %8484 = vpow2.f32 %v7030_v61  ;;  %v9263_v61 = vld [vmem:[#allocation6 + $0xa4] ss:$16 sps:$4 sm:$0xff]  }
 0x10b   :  { %v8481_v4 = vpop.eup %8480 }
 0x10c   :  { %v642_v2 = vadd.f32 1.0, %v8481_v4  ;;  %v9265_v4 = vld [vmem:[#allocation6 + $0xac] ss:$16 sps:$4 sm:$0xff]  }
 0x10d   :  { %v8483_v3 = vpop.eup %8482 }
 0x10e   :  { %8486 = vrcp.f32 %v642_v2  ;;  %v648_v11 = vadd.f32 1.0, %v8483_v3  ;;  %v8485_v12 = vpop.eup %8484  ;;  %v9273_v2 = vld [vmem:[#allocation6 + $0xa8] ss:$16 sps:$4 sm:$0xff]   ;;  %v9277_v3 = vld [vmem:[#allocation6 + $0x84] ss:$16 sps:$4 sm:$0xff]  }
 0x10f   :  { %8488 = vtanh.f32 %v636_v48  ;;  %v655_v24 = vadd.f32 1.0, %v8485_v12  ;;  %v9271_v48 = vld [vmem:[#allocation6 + $0xa0] ss:$16 sps:$4 sm:$0xff]  }
 0x110   :  { %8490 = vrcp.f32 %v648_v11  ;;  %v9279_v11 = vld [vmem:[#allocation6 + $0x8c] ss:$16 sps:$4 sm:$0xff]   ;;  %v9283_v12 = vld [vmem:[#allocation6 + $0x80] ss:$16 sps:$4 sm:$0xff]  }
 0x111   :  { %8492 = vrcp.f32 %v655_v24  ;;  %v9297_v24 = vld [vmem:[#allocation6 + $0x68] ss:$16 sps:$4 sm:$0xff]  }
 0x11b   :  { %v8487_v15 = vpop.eup %8486 }
 0x11c   :  { %v8489_v1 = vpop.eup %8488 }
 0x11d   :  { %v8491_v20 = vpop.eup %8490  ;;  %v659_v58 = vmul.f32 %v8489_v1, %v8487_v15  ;;  %v9285_v15 = vld [vmem:[#allocation6 + $0x88] ss:$16 sps:$4 sm:$0xff]   ;;  %v9291_v1 = vld [vmem:[#allocation6 + $0x6c] ss:$16 sps:$4 sm:$0xff]  }
 0x11e   :  { %v658_v59 = vmul.f32 %v8491_v20, %v60_v62  ;;  %v8493_v23 = vpop.eup %8492  ;;  %v9289_v62 = vld [vmem:[#allocation6 + $0x64] ss:$16 sps:$4 sm:$0xff]   ;;  %v9295_v20 = vld [vmem:[#allocation6 + $0x60] ss:$16 sps:$4 sm:$0xff]  }
 0x120   :  { %v9242_v27 = vadd.f32 %v659_v58, %v658_v59  ;;  %v9301_v58 = vld [vmem:[#allocation6 + $0x44] ss:$16 sps:$4 sm:$0xff]   ;;  %v9303_v59 = vld [vmem:[#allocation6 + $0x4c] ss:$16 sps:$4 sm:$0xff]  }
 0x122   :  { %8494 = vtanh.f32 %v9242_v27 }
 0x12f   :  { %v8495_v28 = vpop.eup %8494 }
 0x130   :  { %v662_v31 = vmul.f32 %v8495_v28, %v8493_v23  ;;  %v9307_v23 = vld [vmem:[#allocation6 + $0x40] ss:$16 sps:$4 sm:$0xff]   ;;  %v9309_v28 = vld [vmem:[#allocation6 + $0x48] ss:$16 sps:$4 sm:$0xff]  }
 0x132   :  { %v664_v32 = vpack.c.bf16 %v662_v31, %v662_v31  ;;  %v9313_v31 = vld [vmem:[#allocation6 + $0x24] ss:$16 sps:$4 sm:$0xff]  }
 0x134   :  { %665 = vst [vmem:[#allocation3] sm:$0xf] %v664_v32  ;;  %v9315_v32 = vld [vmem:[#allocation6 + $0x2c] ss:$16 sps:$4 sm:$0xff]  }
 0x13b   :  { %v666_v40 = vld [vmem:[#allocation3] sm:$0xf] }
 0x13c   :  { %v9251_v43 = vld [vmem:[#allocation3] sm:$0xff]  ;;  %899 = vmatmul.mubr.bf16.vlgmr.msra.gmra.mxu0 %v666_v40  ;;  %940 = vmatmul.mubr.bf16.vlgmr.msra.gmra.mxu1 %v666_v40  ;;  %v9319_v40 = vld [vmem:[#allocation6 + $0x20] ss:$16 sps:$4 sm:$0xff]  }
 0x13d   :  { %v7067_v63 = vcombine.high %v9251_v43, %v9251_v43  ;;  %1392 = vmatpush1.bf16.msra.mxu0 %v9245_v35  ;;  %1433 = vmatpush1.bf16.msra.mxu1 %v9247_v36 }
 0x13e   :  { %1393 = vmatprep.subr.bf16.mxu0 %v9249_v39  ;;  %1434 = vmatprep.subr.bf16.mxu1 %v9253_v57 }
 0x13f   :  { %1423 = vmatprep.mubr.bf16.mxu0 %v7067_v63  ;;  %1464 = vmatprep.mubr.bf16.mxu1 %v7067_v63  ;;  %v9321_v63 = vld [vmem:[#allocation6 + $0x28] ss:$16 sps:$4 sm:$0xff]  }
 0x141   :  { %1394 = vmatpush1.bf16.msra.mxu0 %v9259_v44  ;;  %1435 = vmatpush1.bf16.msra.mxu1 %v9261_v47 }
 0x142   :  { %1395 = vmatprep.subr.bf16.mxu0 %v9263_v61  ;;  %1436 = vmatprep.subr.bf16.mxu1 %v9265_v4 }
 0x145   :  { %1396 = vmatpush1.bf16.msra.mxu0 %v9271_v48  ;;  %1437 = vmatpush1.bf16.msra.mxu1 %v9273_v2 }
 0x146   :  { %1397 = vmatprep.subr.bf16.mxu0 %v9277_v3  ;;  %1438 = vmatprep.subr.bf16.mxu1 %v9279_v11 }
 0x149   :  { %1398 = vmatpush1.bf16.msra.mxu0 %v9283_v12  ;;  %1439 = vmatpush1.bf16.msra.mxu1 %v9285_v15 }
 0x14a   :  { %1399 = vmatprep.subr.bf16.mxu0 %v9289_v62  ;;  %1440 = vmatprep.subr.bf16.mxu1 %v9291_v1 }
 0x14d   :  { %1400 = vmatpush1.bf16.msra.mxu0 %v9295_v20  ;;  %1441 = vmatpush1.bf16.msra.mxu1 %v9297_v24 }
 0x14e   :  { %1401 = vmatprep.subr.bf16.mxu0 %v9301_v58  ;;  %1442 = vmatprep.subr.bf16.mxu1 %v9303_v59 }
 0x151   :  { %1402 = vmatpush1.bf16.msra.mxu0 %v9307_v23  ;;  %1443 = vmatpush1.bf16.msra.mxu1 %v9309_v28 }
 0x152   :  { %1403 = vmatprep.subr.bf16.mxu0 %v9313_v31  ;;  %1444 = vmatprep.subr.bf16.mxu1 %v9315_v32 }
 0x155   :  { %1404 = vmatpush1.bf16.msra.mxu0 %v9319_v40  ;;  %1445 = vmatpush1.bf16.msra.mxu1 %v9321_v63 }
 0x156   :  { %1405 = vmatprep.subr.bf16.mxu0 %v9325_v53  ;;  %1446 = vmatprep.subr.bf16.mxu1 %v9327_v55 }
 0x159   :  { %1406 = vmatpush1.bf16.msra.mxu0 %v9331_v60  ;;  %1447 = vmatpush1.bf16.msra.mxu1 %v9333_v54 }
 0x15a   :  { %1407 = vmatprep.subr.bf16.mxu0 %v9337_v0  ;;  %1448 = vmatprep.subr.bf16.mxu1 %v9339_v8 }
 0x15d   :  { %1408 = vmatpush2.bf16.msra.mxu0 %v9343_v19  ;;  %1449 = vmatpush2.bf16.msra.mxu1 %v9345_v16 }
 0x15e   :  { %1409 = vmatprep.subr.bf16.mxu0 %v9349_v7  ;;  %1450 = vmatprep.subr.bf16.mxu1 %v9351_v56 }
 0x161   :  { %1410 = vmatpush2.bf16.msra.mxu0 %v9355_v51  ;;  %1451 = vmatpush2.bf16.msra.mxu1 %v9357_v46 }
 0x162   :  { %1411 = vmatprep.subr.bf16.mxu0 %v9361_v45  ;;  %1452 = vmatprep.subr.bf16.mxu1 %v9363_v42 }
 0x165   :  { %1412 = vmatpush2.bf16.msra.mxu0 %v9367_v41  ;;  %1453 = vmatpush2.bf16.msra.mxu1 %v9369_v38 }
 0x166   :  { %1413 = vmatprep.subr.bf16.mxu0 %v9373_v37  ;;  %1454 = vmatprep.subr.bf16.mxu1 %v9375_v34 }
 0x169   :  { %1414 = vmatpush2.bf16.msra.mxu0 %v9379_v33  ;;  %1455 = vmatpush2.bf16.msra.mxu1 %v9381_v30 }
 0x16a   :  { %1415 = vmatprep.subr.bf16.mxu0 %v9385_v29  ;;  %1456 = vmatprep.subr.bf16.mxu1 %v9387_v26  ;;  %v9411_v29 = vld [vmem:[#allocation6 + $0x12c] ss:$16 sps:$4 sm:$0xff]   ;;  %v9415_v26 = vld [vmem:[#allocation6 + $0x120] ss:$16 sps:$4 sm:$0xff]  }
 0x16b   :  { %11378 = vst [vmem:[#allocation52_spill] sm:$0xff] %v9411_v29  ;;  %11379 = vst [vmem:[#allocation53_spill] sm:$0xff] %v9415_v26 }
 0x16d   :  { %1416 = vmatpush2.bf16.msra.mxu0 %v9391_v25  ;;  %1457 = vmatpush2.bf16.msra.mxu1 %v9393_v22  ;;  %v9417_v25 = vld [vmem:[#allocation6 + $0x128] ss:$16 sps:$4 sm:$0xff]   ;;  %v9421_v22 = vld [vmem:[#allocation6 + $0x104] ss:$16 sps:$4 sm:$0xff]  }
 0x16e   :  { %1417 = vmatprep.subr.bf16.mxu0 %v9397_v21  ;;  %1458 = vmatprep.subr.bf16.mxu1 %v9399_v18  ;;  %11380 = vst [vmem:[#allocation54_spill] sm:$0xff] %v9417_v25  ;;  %11381 = vst [vmem:[#allocation55_spill] sm:$0xff] %v9421_v22  ;;  %v9423_v21 = vld [vmem:[#allocation6 + $0x10c] ss:$16 sps:$4 sm:$0xff]   ;;  %v9427_v18 = vld [vmem:[#allocation6 + $0x100] ss:$16 sps:$4 sm:$0xff]  }
 0x16f   :  { %11382 = vst [vmem:[#allocation56_spill] sm:$0xff] %v9423_v21  ;;  %11383 = vst [vmem:[#allocation57_spill] sm:$0xff] %v9427_v18 }
 0x171   :  { %1418 = vmatpush2.bf16.msra.mxu0 %v9403_v17  ;;  %1459 = vmatpush2.bf16.msra.mxu1 %v9405_v14  ;;  %v9429_v17 = vld [vmem:[#allocation6 + $0x108] ss:$16 sps:$4 sm:$0xff]  }
 0x172   :  { %1419 = vmatprep.subr.bf16.mxu0 %v9409_v13  ;;  %1460 = vmatprep.subr.bf16.mxu1 %v9411_v29  ;;  %11384 = vst [vmem:[#allocation58_spill] sm:$0xff] %v9429_v17  ;;  %v7066_v29 = vcombine.low %v9251_v43, %v9251_v43  ;;  %v9452_v43 = vld [vmem:[%s11147_s3 + $0xe0] ss:$16 sps:$4 sm:$0xff]  }
 0x173   :  { %11388 = vst [vmem:[#allocation61_spill] sm:$0xff] %v9452_v43 }
 0x175   :  { %1420 = vmatpush2.bf16.msra.mxu0 %v9415_v26  ;;  %1461 = vmatpush2.bf16.msra.mxu1 %v9417_v25  ;;  %v11385_v26 = vmov 0   ;;  %v9442_v25 = vld [vmem:[%s11147_s3 + $0xe4] ss:$16 sps:$4 sm:$0xff]  }
 0x176   :  { %1421 = vmatprep.subr.bf16.mxu0 %v9421_v22  ;;  %1462 = vmatprep.subr.bf16.mxu1 %v9423_v21  ;;  %11386 = vst [vmem:[#allocation59_spill] sm:$0xff] %v9442_v25 }
 0x179   :  { %1422 = vmatpush2.bf16.msra.mxu0 %v9427_v18  ;;  %1463 = vmatpush2.bf16.msra.mxu1 %v9429_v17  ;;  %v9447_v18 = vld [vmem:[%s11147_s3 + $0xec] ss:$16 sps:$4 sm:$0xff]  }
 0x17a   :  { %11387 = vst [vmem:[#allocation60_spill] sm:$0xff] %v9447_v18  ;;  %1704 = vmatprep.subr.bf16.mxu0 %v9442_v25  ;;  %1745 = vmatprep.subr.bf16.mxu1 %v9447_v18  ;;  %v9471_v17 = vld [vmem:[%s11147_s3 + $0xcc] ss:$16 sps:$4 sm:$0xff]   ;;  %v9476_v25 = vld [vmem:[%s11147_s3 + $0xc0] ss:$16 sps:$4 sm:$0xff]  }
 0x17b   :  { %11391 = vst [vmem:[#allocation64_spill] sm:$0xff] %v9471_v17  ;;  %11392 = vst [vmem:[#allocation65_spill] sm:$0xff] %v9476_v25  ;;  %v9495_v18 = vld [vmem:[%s11147_s3 + $0xac] ss:$16 sps:$4 sm:$0xff]  }
 0x17c   :  { %1424 = vmatmul.mubr.bf16.vlgmr.msra.gmra.mxu0 %v7066_v29  ;;  %1465 = vmatmul.mubr.bf16.vlgmr.msra.gmra.mxu1 %v7066_v29  ;;  %v9457_v29 = vld [vmem:[%s11147_s3 + $0xe8] ss:$16 sps:$4 sm:$0xff]   ;;  %11395 = vst [vmem:[#allocation68_spill] sm:$0xff] %v9495_v18 }
 0x17d   :  { %1736 = vmatprep.mubr.bf16.mxu0 %v11385_v26  ;;  %1777 = vmatprep.mubr.bf16.mxu1 %v11385_v26  ;;  %11389 = vst [vmem:[#allocation62_spill] sm:$0xff] %v9457_v29  ;;  %v9466_v26 = vld [vmem:[%s11147_s3 + $0xc4] ss:$16 sps:$4 sm:$0xff]  }
 0x17e   :  { %1705 = vmatpush1.bf16.msra.mxu0 %v9452_v43  ;;  %1746 = vmatpush1.bf16.msra.mxu1 %v9457_v29  ;;  %11390 = vst [vmem:[#allocation63_spill] sm:$0xff] %v9466_v26  ;;  %v9481_v43 = vld [vmem:[%s11147_s3 + $0xc8] ss:$16 sps:$4 sm:$0xff]   ;;  %v9490_v29 = vld [vmem:[%s11147_s3 + $0xa4] ss:$16 sps:$4 sm:$0xff]  }
 0x17f   :  { %11393 = vst [vmem:[#allocation66_spill] sm:$0xff] %v9481_v43  ;;  %1706 = vmatprep.subr.bf16.mxu0 %v9466_v26  ;;  %1747 = vmatprep.subr.bf16.mxu1 %v9471_v17  ;;  %11394 = vst [vmem:[#allocation67_spill] sm:$0xff] %v9490_v29  ;;  %v9500_v26 = vld [vmem:[%s11147_s3 + $0xa0] ss:$16 sps:$4 sm:$0xff]   ;;  %v9519_v17 = vld [vmem:[%s11147_s3 + $0x8c] ss:$16 sps:$4 sm:$0xff]  }
 0x180   :  { %11396 = vst [vmem:[#allocation69_spill] sm:$0xff] %v9500_v26  ;;  %11399 = vst [vmem:[#allocation72_spill] sm:$0xff] %v9519_v17 }
 0x182   :  { %1707 = vmatpush1.bf16.msra.mxu0 %v9476_v25  ;;  %1748 = vmatpush1.bf16.msra.mxu1 %v9481_v43  ;;  %v9505_v25 = vld [vmem:[%s11147_s3 + $0xa8] ss:$16 sps:$4 sm:$0xff]   ;;  %v9514_v43 = vld [vmem:[%s11147_s3 + $0x84] ss:$16 sps:$4 sm:$0xff]  }
 0x183   :  { %11397 = vst [vmem:[#allocation70_spill] sm:$0xff] %v9505_v25  ;;  %1708 = vmatprep.subr.bf16.mxu0 %v9490_v29  ;;  %1749 = vmatprep.subr.bf16.mxu1 %v9495_v18  ;;  %11398 = vst [vmem:[#allocation71_spill] sm:$0xff] %v9514_v43  ;;  %v9524_v29 = vld [vmem:[%s11147_s3 + $0x80] ss:$16 sps:$4 sm:$0xff]   ;;  %v9543_v18 = vld [vmem:[%s11147_s3 + $0x6c] ss:$16 sps:$4 sm:$0xff]  }
 0x184   :  { %11400 = vst [vmem:[#allocation73_spill] sm:$0xff] %v9524_v29  ;;  %11403 = vst [vmem:[#allocation76_spill] sm:$0xff] %v9543_v18 }
 0x186   :  { %1709 = vmatpush1.bf16.msra.mxu0 %v9500_v26  ;;  %1750 = vmatpush1.bf16.msra.mxu1 %v9505_v25  ;;  %v9529_v26 = vld [vmem:[%s11147_s3 + $0x88] ss:$16 sps:$4 sm:$0xff]   ;;  %v9538_v25 = vld [vmem:[%s11147_s3 + $0x64] ss:$16 sps:$4 sm:$0xff]  }
 0x187   :  { %11401 = vst [vmem:[#allocation74_spill] sm:$0xff] %v9529_v26  ;;  %1710 = vmatprep.subr.bf16.mxu0 %v9514_v43  ;;  %1751 = vmatprep.subr.bf16.mxu1 %v9519_v17  ;;  %11402 = vst [vmem:[#allocation75_spill] sm:$0xff] %v9538_v25  ;;  %v9548_v43 = vld [vmem:[%s11147_s3 + $0x60] ss:$16 sps:$4 sm:$0xff]   ;;  %v9567_v17 = vld [vmem:[%s11147_s3 + $0x4c] ss:$16 sps:$4 sm:$0xff]  }
 0x188   :  { %11404 = vst [vmem:[#allocation77_spill] sm:$0xff] %v9548_v43  ;;  %11407 = vst [vmem:[#allocation80_spill] sm:$0xff] %v9567_v17 }
 0x18a   :  { %1711 = vmatpush1.bf16.msra.mxu0 %v9524_v29  ;;  %1752 = vmatpush1.bf16.msra.mxu1 %v9529_v26  ;;  %v9553_v29 = vld [vmem:[%s11147_s3 + $0x68] ss:$16 sps:$4 sm:$0xff]   ;;  %v9562_v26 = vld [vmem:[%s11147_s3 + $0x44] ss:$16 sps:$4 sm:$0xff]  }
 0x18b   :  { %11405 = vst [vmem:[#allocation78_spill] sm:$0xff] %v9553_v29  ;;  %1712 = vmatprep.subr.bf16.mxu0 %v9538_v25  ;;  %1753 = vmatprep.subr.bf16.mxu1 %v9543_v18  ;;  %11406 = vst [vmem:[#allocation79_spill] sm:$0xff] %v9562_v26  ;;  %v9572_v25 = vld [vmem:[%s11147_s3 + $0x40] ss:$16 sps:$4 sm:$0xff]   ;;  %v9591_v18 = vld [vmem:[%s11147_s3 + $0x2c] ss:$16 sps:$4 sm:$0xff]  }
 0x18c   :  { %11408 = vst [vmem:[#allocation81_spill] sm:$0xff] %v9572_v25  ;;  %11411 = vst [vmem:[#allocation84_spill] sm:$0xff] %v9591_v18 }
 0x18e   :  { %1713 = vmatpush1.bf16.msra.mxu0 %v9548_v43  ;;  %1754 = vmatpush1.bf16.msra.mxu1 %v9553_v29  ;;  %v9577_v43 = vld [vmem:[%s11147_s3 + $0x48] ss:$16 sps:$4 sm:$0xff]   ;;  %v9586_v29 = vld [vmem:[%s11147_s3 + $0x24] ss:$16 sps:$4 sm:$0xff]  }
 0x18f   :  { %11409 = vst [vmem:[#allocation82_spill] sm:$0xff] %v9577_v43  ;;  %1714 = vmatprep.subr.bf16.mxu0 %v9562_v26  ;;  %1755 = vmatprep.subr.bf16.mxu1 %v9567_v17  ;;  %11410 = vst [vmem:[#allocation83_spill] sm:$0xff] %v9586_v29  ;;  %v9596_v26 = vld [vmem:[%s11147_s3 + $0x20] ss:$16 sps:$4 sm:$0xff]  }
 0x190   :  { %11412 = vst [vmem:[#allocation85_spill] sm:$0xff] %v9596_v26  ;;  %v9615_v17 = vld [vmem:[%s11147_s3] ss:$16 sps:$4 sm:$0xff]  }
 0x191   :  { %11415 = vst [vmem:[#allocation88_spill] sm:$0xff] %v9615_v17 }
 0x192   :  { %1715 = vmatpush1.bf16.msra.mxu0 %v9572_v25  ;;  %1756 = vmatpush1.bf16.msra.mxu1 %v9577_v43  ;;  %v9601_v25 = vld [vmem:[%s11147_s3 + $0x28] ss:$16 sps:$4 sm:$0xff]   ;;  %v9608_v43 = vld [vmem:[%s11147_s3 + $0x4] ss:$16 sps:$4 sm:$0xff]  }
 0x193   :  { %11413 = vst [vmem:[#allocation86_spill] sm:$0xff] %v9601_v25  ;;  %1716 = vmatprep.subr.bf16.mxu0 %v9586_v29  ;;  %1757 = vmatprep.subr.bf16.mxu1 %v9591_v18  ;;  %11414 = vst [vmem:[#allocation87_spill] sm:$0xff] %v9608_v43  ;;  %v9620_v29 = vld [vmem:[%s11147_s3 + $0x8] ss:$16 sps:$4 sm:$0xff]   ;;  %v9625_v18 = vld [vmem:[%s11147_s3 + $0xc] ss:$16 sps:$4 sm:$0xff]  }
 0x194   :  { %11416 = vst [vmem:[#allocation89_spill] sm:$0xff] %v9620_v29  ;;  %11417 = vst [vmem:[#allocation90_spill] sm:$0xff] %v9625_v18 }
 0x196   :  { %1717 = vmatpush1.bf16.msra.mxu0 %v9596_v26  ;;  %1758 = vmatpush1.bf16.msra.mxu1 %v9601_v25 }
 0x197   :  { %1718 = vmatprep.subr.bf16.mxu0 %v9608_v43  ;;  %1759 = vmatprep.subr.bf16.mxu1 %v9625_v18 }
 0x19a   :  { %1719 = vmatpush1.bf16.msra.mxu0 %v9615_v17  ;;  %1760 = vmatpush1.bf16.msra.mxu1 %v9620_v29 }
 0x19b   :  { %2208 = vmatprep.subr.bf16.mxu0 %v9128_v49  ;;  %2249 = vmatprep.subr.bf16.mxu1 %v9130_v50 }
 0x1fc   :  { %v900_v25 = vpop.f32.mrf.mxu0  ;;  %v941_v26 = vpop.f32.mrf.mxu1 }
 0x1fd   :  { %v948_v21 = vadd.f32 %v900_v25, %v9163_v5  ;;  %v950_v22 = vadd.f32 %v941_v26, %v9166_v6 }
 0x1fe   :  { %v902_v13 = vpop.f32.mrf.mxu0  ;;  %v943_v14 = vpop.f32.mrf.mxu1 }
 0x1ff   :  { %v7063_v30 = vmul.f32 -1.442695, %v948_v21  ;;  %v949_v43 = vadd.f32 %v902_v13, %v9168_v9  ;;  %v951_v18 = vadd.f32 %v943_v14, %v9171_v10  ;;  %v66_v14 = vld [vmem:[%s11149_s5] sm:$0xf] }
 0x200   :  { %v904_v33 = vpop.f32.mrf.mxu0  ;;  %v945_v34 = vpop.f32.mrf.mxu1 }
 0x201   :  { %8496 = vpow2.f32 %v7063_v30  ;;  %v7064_v17 = vmul.f32 -1.442695, %v949_v43 }
 0x202   :  { %v905_v29 = vpop.f32.mrf.mxu0  ;;  %v946_v37 = vpop.f32.mrf.mxu1 }
 0x203   :  { %8498 = vpow2.f32 %v7064_v17  ;;  %v11418_v17 = vsub.s32 0, %v9134_v52 }
 0x204   :  { %8500 = vtanh.f32 %v950_v22  ;;  %v11420_v22 = vsub.s32 1, %v9134_v52 }
 0x205   :  { %v9645_v30 = vrot.slane %v66_v14, %v11418_v17 }
 0x206   :  { %v9649_v33 = vrot.slane %v66_v14, %v11420_v22  ;;  %v7065_v22 = vmul.f32 -1.442695, %v951_v18 }
 0x207   :  { %11419 = vst [vmem:[#allocation91_spill] sm:$0xff] %v9645_v30 }
 0x208   :  { %11421 = vst [vmem:[#allocation92_spill] sm:$0xff] %v9649_v33 }
 0x20e   :  { %v8497_v5 = vpop.eup %8496 }
 0x20f   :  { %v956_v6 = vadd.f32 1.0, %v8497_v5 }
 0x210   :  { %v8499_v25 = vpop.eup %8498 }
 0x211   :  { %8502 = vrcp.f32 %v956_v6  ;;  %v962_v49 = vadd.f32 1.0, %v8499_v25  ;;  %v8501_v50 = vpop.eup %8500 }
 0x213   :  { %8504 = vrcp.f32 %v962_v49 }
 0x21e   :  { %v8503_v21 = vpop.eup %8502 }
 0x21f   :  { %v973_v26 = vmul.f32 %v8503_v21, %v8501_v50 }
 0x220   :  { %v8505_v9 = vpop.eup %8504 }
 0x221   :  { %v972_v10 = vmul.f32 %v8505_v9, %v9242_v27  ;;  %v11422_v9 = vsub.s32 3, %v9134_v52 }
 0x223   :  { %v9638_v13 = vadd.f32 %v973_v26, %v972_v10  ;;  %v9655_v10 = vrot.slane %v66_v14, %v11422_v9 }
 0x225   :  { %11423 = vst [vmem:[#allocation93_spill] sm:$0xff] %v9655_v10 }
 0x23c   :  { %v1425_v34 = vpop.f32.mrf.mxu0  ;;  %v1466_v37 = vpop.f32.mrf.mxu1 }
 0x23d   :  { %v1426_v43 = vadd.f32 %v1425_v34, %v9645_v30  ;;  %v11424_v34 = vsub.s32 2, %v9134_v52  ;;  %v6975_v52 = vld [vmem:[%s11151_s7 + $0x8] sm:$0xff] }
 0x23e   :  { %v1427_v29 = vpop.f32.mrf.mxu0  ;;  %v1468_v27 = vpop.f32.mrf.mxu1 }
 0x23f   :  { %v7132_v5 = vmul.f32 -1.442695, %v1426_v43  ;;  %v1428_v6 = vadd.f32 %v1427_v29, %v9649_v33  ;;  %v1469_v17 = vadd.f32 %v1468_v27, %v9655_v10  ;;  %v9660_v30 = vrot.slane %v66_v14, %v11424_v34 }
 0x240   :  { %v1429_v25 = vpop.f32.mrf.mxu0  ;;  %v1470_v49 = vpop.f32.mrf.mxu1 }
 0x241   :  { %8506 = vpow2.f32 %v7132_v5  ;;  %v7133_v50 = vmul.f32 -1.442695, %v1428_v6  ;;  %11425 = vst [vmem:[#allocation94_spill] sm:$0xff] %v9660_v30  ;;  %v7134_v43 = vmul.f32 -1.442695, %v1469_v17  ;;  %v1467_v5 = vadd.f32 %v1466_v37, %v9660_v30 }
 0x242   :  { %v1430_v21 = vpop.f32.mrf.mxu0  ;;  %v1471_v26 = vpop.f32.mrf.mxu1 }
 0x243   :  { %8508 = vpow2.f32 %v7133_v50 }
 0x244   :  { %8510 = vpow2.f32 %v7065_v22 }
 0x245   :  { %8512 = vpow2.f32 %v7134_v43 }
 0x24e   :  { %v8507_v29 = vpop.eup %8506 }
 0x24f   :  { %v1477_v6 = vadd.f32 1.0, %v8507_v29 }
 0x250   :  { %v8509_v25 = vpop.eup %8508 }
 0x251   :  { %8514 = vrcp.f32 %v1477_v6  ;;  %v1483_v49 = vadd.f32 1.0, %v8509_v25  ;;  %v8511_v50 = vpop.eup %8510 }
 0x252   :  { %8516 = vtanh.f32 %v1467_v5  ;;  %v8513_v21 = vpop.eup %8512  ;;  %v969_v18 = vadd.f32 1.0, %v8511_v50 }
 0x253   :  { %8518 = vrcp.f32 %v1483_v49  ;;  %v1490_v9 = vadd.f32 1.0, %v8513_v21 }
 0x254   :  { %8520 = vrcp.f32 %v969_v18  ;;  %v11468_v18 = vld [vmem:[#allocation80_spill] sm:$0xff] }
 0x255   :  { %8522 = vtanh.f32 %v9638_v13 }
 0x256   :  { %8524 = vrcp.f32 %v1490_v9  ;;  %v11472_v9 = vld [vmem:[#allocation84_spill] sm:$0xff] }
 0x25e   :  { %v8515_v27 = vpop.eup %8514 }
 0x25f   :  { %v8517_v14 = vpop.eup %8516 }
 0x260   :  { %v8519_v26 = vpop.eup %8518  ;;  %v1494_v17 = vmul.f32 %v8517_v14, %v8515_v27  ;;  %v11467_v27 = vld [vmem:[#allocation79_spill] sm:$0xff]  ;;  %v11470_v14 = vld [vmem:[#allocation82_spill] sm:$0xff] }
 0x261   :  { %v1493_v37 = vmul.f32 %v8519_v26, %v6975_v52  ;;  %v8521_v34 = vpop.eup %8520  ;;  %v11469_v52 = vld [vmem:[#allocation81_spill] sm:$0xff]  ;;  %v11471_v26 = vld [vmem:[#allocation83_spill] sm:$0xff] }
 0x262   :  { %v8523_v43 = vpop.eup %8522 }
 0x263   :  { %v9667_v22 = vadd.f32 %v1494_v17, %v1493_v37  ;;  %v8525_v29 = vpop.eup %8524  ;;  %v9670_v6 = vmul.f32 %v8523_v43, %v8521_v34  ;;  %v11473_v17 = vld [vmem:[#allocation85_spill] sm:$0xff]  ;;  %v11474_v37 = vld [vmem:[#allocation86_spill] sm:$0xff]  ;;  %v11475_v34 = vld [vmem:[#allocation87_spill] sm:$0xff] }
 0x264   :  { %v11476_v43 = vld [vmem:[#allocation90_spill] sm:$0xff] }
 0x265   :  { %8526 = vtanh.f32 %v9667_v22 }
 0x272   :  { %v8527_v5 = vpop.eup %8526 }
 0x273   :  { %v1497_v25 = vmul.f32 %v8527_v5, %v8525_v29  ;;  %v11477_v29 = vld [vmem:[#allocation88_spill] sm:$0xff]  ;;  %v11478_v5 = vld [vmem:[#allocation89_spill] sm:$0xff] }
 0x275   :  { %1498 = vst [vmem:[%s11152_s8] sm:$0xff] %v1497_v25  ;;  %v7842_v49 = vpack.c.bf16 %v1497_v25, %v9670_v6  ;;  %v8736_v21 = vpack.c.bf16 %v1497_v25, %v1497_v25  ;;  %v9776_v25 = vld [vmem:[#allocation6 + $0xec] ss:$16 sps:$4 sm:$0xff]  }
 0x277   :  { %7843 = vst [vmem:[#allocation3] sm:$0xff] %v7842_v49  }
 0x27e   :  { %v1504_v50 = vld [vmem:[#allocation3] sm:$0xf] }
 0x27f   :  { %1737 = vmatmul.mubr.bf16.vlgmr.msra.gmra.mxu0 %v1504_v50  ;;  %1778 = vmatmul.mubr.bf16.vlgmr.msra.gmra.mxu1 %v1504_v50 }
 0x280   :  { %2209 = vmatpush1.bf16.msra.mxu0 %v9245_v35  ;;  %2250 = vmatpush1.bf16.msra.mxu1 %v9247_v36  ;;  %v11442_v35 = vld [vmem:[#allocation55_spill] sm:$0xff]  ;;  %v11443_v36 = vld [vmem:[#allocation56_spill] sm:$0xff] }
 0x281   :  { %2240 = vmatprep.mubr.bf16.mxu0 %v8736_v21  ;;  %2281 = vmatprep.mubr.bf16.mxu1 %v8736_v21  ;;  %v11479_v21 = vld [vmem:[#allocation15_spill] sm:$0xff] }
 0x282   :  { %2210 = vmatprep.subr.bf16.mxu0 %v9249_v39  ;;  %2251 = vmatprep.subr.bf16.mxu1 %v9253_v57  ;;  %v11444_v39 = vld [vmem:[#allocation57_spill] sm:$0xff]  ;;  %v11445_v57 = vld [vmem:[#allocation58_spill] sm:$0xff] }
 0x284   :  { %2211 = vmatpush1.bf16.msra.mxu0 %v9259_v44  ;;  %2252 = vmatpush1.bf16.msra.mxu1 %v9261_v47  ;;  %v8737_v44 = vpack.c.bf16 %v9670_v6, %v9670_v6  ;;  %v11446_v47 = vld [vmem:[#allocation59_spill] sm:$0xff] }
 0x285   :  { %2212 = vmatprep.subr.bf16.mxu0 %v9263_v61  ;;  %2253 = vmatprep.subr.bf16.mxu1 %v9265_v4  ;;  %v11447_v61 = vld [vmem:[#allocation60_spill] sm:$0xff]  ;;  %v11448_v4 = vld [vmem:[#allocation61_spill] sm:$0xff] }
 0x286   :  { %v9774_v6 = vld [vmem:[#allocation6 + $0xe4] ss:$16 sps:$4 sm:$0xff]  }
 0x288   :  { %2213 = vmatpush1.bf16.msra.mxu0 %v9271_v48  ;;  %2254 = vmatpush1.bf16.msra.mxu1 %v9273_v2  ;;  %v11449_v48 = vld [vmem:[#allocation62_spill] sm:$0xff]  ;;  %v11450_v2 = vld [vmem:[#allocation63_spill] sm:$0xff] }
 0x289   :  { %2214 = vmatprep.subr.bf16.mxu0 %v9277_v3  ;;  %2255 = vmatprep.subr.bf16.mxu1 %v9279_v11  ;;  %v11451_v3 = vld [vmem:[#allocation64_spill] sm:$0xff]  ;;  %v11452_v11 = vmov 0  }
 0x28c   :  { %2215 = vmatpush1.bf16.msra.mxu0 %v9283_v12  ;;  %2256 = vmatpush1.bf16.msra.mxu1 %v9285_v15  ;;  %v11453_v12 = vld [vmem:[#allocation65_spill] sm:$0xff]  ;;  %v11454_v15 = vld [vmem:[#allocation66_spill] sm:$0xff] }
 0x28d   :  { %2216 = vmatprep.subr.bf16.mxu0 %v9289_v62  ;;  %2257 = vmatprep.subr.bf16.mxu1 %v9291_v1  ;;  %v11455_v62 = vld [vmem:[#allocation67_spill] sm:$0xff]  ;;  %v11456_v1 = vld [vmem:[#allocation68_spill] sm:$0xff] }
 0x290   :  { %2217 = vmatpush1.bf16.msra.mxu0 %v9295_v20  ;;  %2258 = vmatpush1.bf16.msra.mxu1 %v9297_v24  ;;  %v11457_v20 = vld [vmem:[#allocation69_spill] sm:$0xff]  ;;  %v11458_v24 = vld [vmem:[#allocation70_spill] sm:$0xff] }
 0x291   :  { %2218 = vmatprep.subr.bf16.mxu0 %v9301_v58  ;;  %2259 = vmatprep.subr.bf16.mxu1 %v9303_v59  ;;  %v11459_v58 = vld [vmem:[#allocation71_spill] sm:$0xff]  ;;  %v11460_v59 = vld [vmem:[#allocation72_spill] sm:$0xff] }
 0x294   :  { %2219 = vmatpush1.bf16.msra.mxu0 %v9307_v23  ;;  %2260 = vmatpush1.bf16.msra.mxu1 %v9309_v28  ;;  %v11461_v23 = vld [vmem:[#allocation73_spill] sm:$0xff]  ;;  %v11462_v28 = vld [vmem:[#allocation74_spill] sm:$0xff] }
 0x295   :  { %2220 = vmatprep.subr.bf16.mxu0 %v9313_v31  ;;  %2261 = vmatprep.subr.bf16.mxu1 %v9315_v32  ;;  %v11463_v31 = vld [vmem:[#allocation75_spill] sm:$0xff]  ;;  %v11464_v32 = vld [vmem:[#allocation76_spill] sm:$0xff] }
 0x298   :  { %2221 = vmatpush1.bf16.msra.mxu0 %v9319_v40  ;;  %2262 = vmatpush1.bf16.msra.mxu1 %v9321_v63  ;;  %v11465_v40 = vld [vmem:[#allocation77_spill] sm:$0xff]  ;;  %v11466_v63 = vld [vmem:[#allocation78_spill] sm:$0xff] }
 0x299   :  { %2222 = vmatprep.subr.bf16.mxu0 %v9325_v53  ;;  %2263 = vmatprep.subr.bf16.mxu1 %v9327_v55  ;;  %v11427_v53 = vld [vmem:[#allocation40_spill] sm:$0xff]  ;;  %v11429_v55 = vld [vmem:[#allocation42_spill] sm:$0xff] }
 0x29c   :  { %2223 = vmatpush1.bf16.msra.mxu0 %v9331_v60  ;;  %2264 = vmatpush1.bf16.msra.mxu1 %v9333_v54  ;;  %v11428_v54 = vld [vmem:[#allocation41_spill] sm:$0xff]  ;;  %v11430_v60 = vld [vmem:[#allocation43_spill] sm:$0xff] }
 0x29d   :  { %2224 = vmatprep.subr.bf16.mxu0 %v9337_v0  ;;  %2265 = vmatprep.subr.bf16.mxu1 %v9339_v8  ;;  %v11426_v0 = vld [vmem:[#allocation39_spill] sm:$0xff]  ;;  %v11439_v8 = vld [vmem:[#allocation52_spill] sm:$0xff] }
 0x2a0   :  { %2225 = vmatpush2.bf16.msra.mxu0 %v9343_v19  ;;  %2266 = vmatpush2.bf16.msra.mxu1 %v9345_v16  ;;  %v11440_v16 = vld [vmem:[#allocation53_spill] sm:$0xff]  ;;  %v11441_v19 = vld [vmem:[#allocation54_spill] sm:$0xff] }
 0x2a1   :  { %2226 = vmatprep.subr.bf16.mxu0 %v9349_v7  ;;  %2267 = vmatprep.subr.bf16.mxu1 %v9351_v56  ;;  %v11437_v56 = vld [vmem:[#allocation50_spill] sm:$0xff]  ;;  %v11438_v7 = vld [vmem:[#allocation51_spill] sm:$0xff] }
 0x2a4   :  { %2227 = vmatpush2.bf16.msra.mxu0 %v9355_v51  ;;  %2268 = vmatpush2.bf16.msra.mxu1 %v9357_v46  ;;  %v11431_v51 = vld [vmem:[#allocation44_spill] sm:$0xff]  ;;  %v11432_v46 = vld [vmem:[#allocation45_spill] sm:$0xff] }
 0x2a5   :  { %2228 = vmatprep.subr.bf16.mxu0 %v9361_v45  ;;  %2269 = vmatprep.subr.bf16.mxu1 %v9363_v42  ;;  %v11433_v45 = vld [vmem:[#allocation46_spill] sm:$0xff]  ;;  %v11434_v42 = vld [vmem:[#allocation47_spill] sm:$0xff] }
 0x2a8   :  { %2229 = vmatpush2.bf16.msra.mxu0 %v9367_v41  ;;  %2270 = vmatpush2.bf16.msra.mxu1 %v9369_v38  ;;  %v11435_v41 = vld [vmem:[#allocation48_spill] sm:$0xff]  ;;  %v11436_v38 = vld [vmem:[#allocation49_spill] sm:$0xff] }
 0x2a9   :  { %2230 = vmatprep.subr.bf16.mxu0 %v11426_v0  ;;  %2271 = vmatprep.subr.bf16.mxu1 %v11427_v53  ;;  %v11480_v53 = vld [vmem:[#allocation16_spill] sm:$0xff] }
 0x2ac   :  { %2231 = vmatpush2.bf16.msra.mxu0 %v11428_v54  ;;  %2272 = vmatpush2.bf16.msra.mxu1 %v11429_v55 }
 0x2ad   :  { %2232 = vmatprep.subr.bf16.mxu0 %v11430_v60  ;;  %2273 = vmatprep.subr.bf16.mxu1 %v11431_v51 }
 0x2b0   :  { %2233 = vmatpush2.bf16.msra.mxu0 %v11432_v46  ;;  %2274 = vmatpush2.bf16.msra.mxu1 %v11433_v45  ;;  %v11481_v46 = vld [vmem:[#allocation17_spill] sm:$0xff] }
 0x2b1   :  { %2234 = vmatprep.subr.bf16.mxu0 %v11434_v42  ;;  %2275 = vmatprep.subr.bf16.mxu1 %v11435_v41  ;;  %v11482_v42 = vld [vmem:[#allocation18_spill] sm:$0xff] }
 0x2b4   :  { %2235 = vmatpush2.bf16.msra.mxu0 %v11436_v38  ;;  %2276 = vmatpush2.bf16.msra.mxu1 %v11437_v56 }
 0x2b5   :  { %2236 = vmatprep.subr.bf16.mxu0 %v11438_v7  ;;  %2277 = vmatprep.subr.bf16.mxu1 %v11439_v8 }
 0x2b8   :  { %2237 = vmatpush2.bf16.msra.mxu0 %v11440_v16  ;;  %2278 = vmatpush2.bf16.msra.mxu1 %v11441_v19 }
 0x2b9   :  { %2238 = vmatprep.subr.bf16.mxu0 %v11442_v35  ;;  %2279 = vmatprep.subr.bf16.mxu1 %v11443_v36 }
 0x2bc   :  { %2239 = vmatpush2.bf16.msra.mxu0 %v11444_v39  ;;  %2280 = vmatpush2.bf16.msra.mxu1 %v11445_v57 }
 0x2bd   :  { %2522 = vmatprep.subr.bf16.mxu0 %v11446_v47  ;;  %2563 = vmatprep.subr.bf16.mxu1 %v11447_v61 }
 0x2bf   :  { %2241 = vmatmul.mubr.bf16.vlgmr.msra.gmra.mxu0 %v8737_v44  ;;  %2282 = vmatmul.mubr.bf16.vlgmr.msra.gmra.mxu1 %v8737_v44 }
 0x2c0   :  { %2523 = vmatpush1.bf16.msra.mxu0 %v11448_v4  ;;  %2564 = vmatpush1.bf16.msra.mxu1 %v11449_v48 }
 0x2c1   :  { %2524 = vmatprep.subr.bf16.mxu0 %v11450_v2  ;;  %2565 = vmatprep.subr.bf16.mxu1 %v11451_v3 }
 0x2c2   :  { %2554 = vmatprep.mubr.bf16.mxu0 %v11452_v11  ;;  %2595 = vmatprep.mubr.bf16.mxu1 %v11452_v11 }
 0x2c4   :  { %2525 = vmatpush1.bf16.msra.mxu0 %v11453_v12  ;;  %2566 = vmatpush1.bf16.msra.mxu1 %v11454_v15  ;;  %v11483_v12 = vld [vmem:[#allocation91_spill] sm:$0xff] }
 0x2c5   :  { %2526 = vmatprep.subr.bf16.mxu0 %v11455_v62  ;;  %2567 = vmatprep.subr.bf16.mxu1 %v11456_v1 }
 0x2c8   :  { %2527 = vmatpush1.bf16.msra.mxu0 %v11457_v20  ;;  %2568 = vmatpush1.bf16.msra.mxu1 %v11458_v24 }
 0x2c9   :  { %2528 = vmatprep.subr.bf16.mxu0 %v11459_v58  ;;  %2569 = vmatprep.subr.bf16.mxu1 %v11460_v59 }
 0x2cc   :  { %2529 = vmatpush1.bf16.msra.mxu0 %v11461_v23  ;;  %2570 = vmatpush1.bf16.msra.mxu1 %v11462_v28 }
 0x2cd   :  { %2530 = vmatprep.subr.bf16.mxu0 %v11463_v31  ;;  %2571 = vmatprep.subr.bf16.mxu1 %v11464_v32 }
 0x2d0   :  { %2531 = vmatpush1.bf16.msra.mxu0 %v11465_v40  ;;  %2572 = vmatpush1.bf16.msra.mxu1 %v11466_v63 }
 0x2d1   :  { %2532 = vmatprep.subr.bf16.mxu0 %v11467_v27  ;;  %2573 = vmatprep.subr.bf16.mxu1 %v11468_v18 }
 0x2d4   :  { %2533 = vmatpush1.bf16.msra.mxu0 %v11469_v52  ;;  %2574 = vmatpush1.bf16.msra.mxu1 %v11470_v14 }
 0x2d5   :  { %2534 = vmatprep.subr.bf16.mxu0 %v11471_v26  ;;  %2575 = vmatprep.subr.bf16.mxu1 %v11472_v9 }
 0x2d8   :  { %2535 = vmatpush1.bf16.msra.mxu0 %v11473_v17  ;;  %2576 = vmatpush1.bf16.msra.mxu1 %v11474_v37 }
 0x2d9   :  { %2536 = vmatprep.subr.bf16.mxu0 %v11475_v34  ;;  %2577 = vmatprep.subr.bf16.mxu1 %v11476_v43 }
 0x2dc   :  { %2537 = vmatpush1.bf16.msra.mxu0 %v11477_v29  ;;  %2578 = vmatpush1.bf16.msra.mxu1 %v11478_v5 }
 0x2dd   :  { %3026 = vmatprep.subr.bf16.mxu0 %v9774_v6  ;;  %3067 = vmatprep.subr.bf16.mxu1 %v9776_v25 }
 0x33f   :  { %v1738_v49 = vpop.f32.mrf.mxu0  ;;  %v1779_v50 = vpop.f32.mrf.mxu1 }
 0x340   :  { %v1786_v0 = vadd.f32 %v1738_v49, %v11479_v21  ;;  %v1788_v54 = vadd.f32 %v1779_v50, %v11480_v53 }
 0x341   :  { %v1740_v55 = vpop.f32.mrf.mxu0  ;;  %v1781_v60 = vpop.f32.mrf.mxu1 }
 0x342   :  { %v7167_v51 = vmul.f32 -1.442695, %v1786_v0  ;;  %v1787_v45 = vadd.f32 %v1740_v55, %v11481_v46  ;;  %v1789_v41 = vadd.f32 %v1781_v60, %v11482_v42  ;;  %v9804_v46 = vld [vmem:[#allocation6 + $0xe8] ss:$16 sps:$4 sm:$0xff]   ;;  %v9806_v42 = vld [vmem:[#allocation6 + $0xc4] ss:$16 sps:$4 sm:$0xff]  }
 0x343   :  { %v1742_v38 = vpop.f32.mrf.mxu0  ;;  %v1783_v56 = vpop.f32.mrf.mxu1 }
 0x344   :  { %8528 = vpow2.f32 %v7167_v51  ;;  %v7168_v7 = vmul.f32 -1.442695, %v1787_v45  ;;  %v7169_v32 = vmul.f32 -1.442695, %v1789_v41  ;;  %v9802_v51 = vld [vmem:[#allocation6 + $0xe0] ss:$16 sps:$4 sm:$0xff]  }
 0x345   :  { %v1743_v8 = vpop.f32.mrf.mxu0  ;;  %v1784_v16 = vpop.f32.mrf.mxu1  ;;  %v9808_v41 = vld [vmem:[#allocation6 + $0xcc] ss:$16 sps:$4 sm:$0xff]   ;;  %v9812_v56 = vld [vmem:[#allocation6 + $0xc0] ss:$16 sps:$4 sm:$0xff]  }
 0x346   :  { %8530 = vpow2.f32 %v7168_v7  ;;  %v9814_v7 = vld [vmem:[#allocation6 + $0xc8] ss:$16 sps:$4 sm:$0xff]   ;;  %v9816_v8 = vld [vmem:[#allocation6 + $0xa4] ss:$16 sps:$4 sm:$0xff]   ;;  %v9818_v16 = vld [vmem:[#allocation6 + $0xac] ss:$16 sps:$4 sm:$0xff]  }
 0x347   :  { %8532 = vtanh.f32 %v1788_v54 }
 0x351   :  { %v8529_v19 = vpop.eup %8528 }
 0x352   :  { %v1794_v35 = vadd.f32 1.0, %v8529_v19  ;;  %v9824_v19 = vld [vmem:[#allocation6 + $0xa0] ss:$16 sps:$4 sm:$0xff]  }
 0x353   :  { %v8531_v36 = vpop.eup %8530 }
 0x354   :  { %8534 = vrcp.f32 %v1794_v35  ;;  %v1800_v39 = vadd.f32 1.0, %v8531_v36  ;;  %v8533_v57 = vpop.eup %8532  ;;  %v9826_v35 = vld [vmem:[#allocation6 + $0xa8] ss:$16 sps:$4 sm:$0xff]   ;;  %v9830_v36 = vld [vmem:[#allocation6 + $0x84] ss:$16 sps:$4 sm:$0xff]  }
 0x356   :  { %8536 = vrcp.f32 %v1800_v39  ;;  %v9832_v39 = vld [vmem:[#allocation6 + $0x8c] ss:$16 sps:$4 sm:$0xff]  }
 0x361   :  { %v8535_v44 = vpop.eup %8534 }
 0x362   :  { %v1811_v47 = vmul.f32 %v8535_v44, %v8533_v57  ;;  %v9836_v57 = vld [vmem:[#allocation6 + $0x80] ss:$16 sps:$4 sm:$0xff]   ;;  %v9838_v44 = vld [vmem:[#allocation6 + $0x88] ss:$16 sps:$4 sm:$0xff]  }
 0x363   :  { %v8537_v61 = vpop.eup %8536 }
 0x364   :  { %v1810_v4 = vmul.f32 %v8537_v61, %v9638_v13  ;;  %v9844_v61 = vld [vmem:[#allocation6 + $0x6c] ss:$16 sps:$4 sm:$0xff]  }
 0x366   :  { %v9785_v48 = vadd.f32 %v1811_v47, %v1810_v4  ;;  %v9842_v47 = vld [vmem:[#allocation6 + $0x64] ss:$16 sps:$4 sm:$0xff]   ;;  %v9848_v4 = vld [vmem:[#allocation6 + $0x60] ss:$16 sps:$4 sm:$0xff]  }
 0x37f   :  { %v2242_v2 = vpop.f32.mrf.mxu0  ;;  %v2283_v3 = vpop.f32.mrf.mxu1 }
 0x380   :  { %v2243_v15 = vadd.f32 %v2242_v2, %v11483_v12  ;;  %v2284_v27 = vadd.f32 %v2283_v3, %v9660_v30  ;;  %v9850_v2 = vld [vmem:[#allocation6 + $0x68] ss:$16 sps:$4 sm:$0xff]   ;;  %v9854_v3 = vld [vmem:[#allocation6 + $0x44] ss:$16 sps:$4 sm:$0xff]  }
 0x381   :  { %v2244_v62 = vpop.f32.mrf.mxu0  ;;  %v2285_v1 = vpop.f32.mrf.mxu1 }
 0x382   :  { %v7236_v20 = vmul.f32 -1.442695, %v2243_v15  ;;  %v2245_v24 = vadd.f32 %v2244_v62, %v9649_v33  ;;  %v2286_v13 = vadd.f32 %v2285_v1, %v9655_v10  ;;  %v9856_v15 = vld [vmem:[#allocation6 + $0x4c] ss:$16 sps:$4 sm:$0xff]   ;;  %v9860_v62 = vld [vmem:[#allocation6 + $0x40] ss:$16 sps:$4 sm:$0xff]  }
 0x383   :  { %v2246_v58 = vpop.f32.mrf.mxu0  ;;  %v2287_v59 = vpop.f32.mrf.mxu1  ;;  %v9862_v1 = vld [vmem:[#allocation6 + $0x48] ss:$16 sps:$4 sm:$0xff]  }
 0x384   :  { %8538 = vpow2.f32 %v7236_v20  ;;  %v7237_v23 = vmul.f32 -1.442695, %v2245_v24  ;;  %v7238_v40 = vmul.f32 -1.442695, %v2286_v13  ;;  %v9866_v20 = vld [vmem:[#allocation6 + $0x24] ss:$16 sps:$4 sm:$0xff]  }
 0x385   :  { %v2247_v28 = vpop.f32.mrf.mxu0  ;;  %v2288_v31 = vpop.f32.mrf.mxu1  ;;  %v9868_v24 = vld [vmem:[#allocation6 + $0x2c] ss:$16 sps:$4 sm:$0xff]   ;;  %v9872_v58 = vld [vmem:[#allocation6 + $0x20] ss:$16 sps:$4 sm:$0xff]   ;;  %v9874_v59 = vld [vmem:[#allocation6 + $0x28] ss:$16 sps:$4 sm:$0xff]  }
 0x386   :  { %8540 = vpow2.f32 %v7237_v23  ;;  %v9878_v23 = vld [vmem:[#allocation6 + $0x4] ss:$16 sps:$4 sm:$0xff]   ;;  %v9880_v28 = vld [vmem:[#allocation6 + $0xc] ss:$16 sps:$4 sm:$0xff]   ;;  %v9884_v31 = vld [vmem:[#allocation6] ss:$16 sps:$4 sm:$0xff]  }
 0x387   :  { %8542 = vpow2.f32 %v7169_v32  ;;  %v9886_v13 = vld [vmem:[#allocation6 + $0x8] ss:$16 sps:$4 sm:$0xff]   ;;  %v9890_v32 = vld [vmem:[#allocation6 + $0x1e4] ss:$16 sps:$4 sm:$0xff]  }
 0x388   :  { %8544 = vpow2.f32 %v7238_v40  ;;  %v9892_v40 = vld [vmem:[#allocation6 + $0x1ec] ss:$16 sps:$4 sm:$0xff]  }
 0x391   :  { %v8539_v63 = vpop.eup %8538 }
 0x392   :  { %v2294_v18 = vadd.f32 1.0, %v8539_v63  ;;  %v9896_v63 = vld [vmem:[#allocation6 + $0x1e0] ss:$16 sps:$4 sm:$0xff]  }
 0x393   :  { %v8541_v52 = vpop.eup %8540 }
 0x394   :  { %8546 = vrcp.f32 %v2294_v18  ;;  %v2300_v14 = vadd.f32 1.0, %v8541_v52  ;;  %v8543_v26 = vpop.eup %8542  ;;  %v9902_v18 = vld [vmem:[#allocation6 + $0x1c4] ss:$16 sps:$4 sm:$0xff]   ;;  %v9904_v52 = vld [vmem:[#allocation6 + $0x1cc] ss:$16 sps:$4 sm:$0xff]  }
 0x395   :  { %8548 = vtanh.f32 %v2284_v27  ;;  %v8545_v9 = vpop.eup %8544  ;;  %v1807_v37 = vadd.f32 1.0, %v8543_v26  ;;  %v9898_v27 = vld [vmem:[#allocation6 + $0x1e8] ss:$16 sps:$4 sm:$0xff]  }
 0x396   :  { %8550 = vrcp.f32 %v2300_v14  ;;  %v2307_v29 = vadd.f32 1.0, %v8545_v9  ;;  %v9908_v14 = vld [vmem:[#allocation6 + $0x1c0] ss:$16 sps:$4 sm:$0xff]   ;;  %v9910_v26 = vld [vmem:[#allocation6 + $0x1c8] ss:$16 sps:$4 sm:$0xff]  }
 0x397   :  { %8552 = vrcp.f32 %v1807_v37  ;;  %v9914_v9 = vld [vmem:[#allocation6 + $0x1a4] ss:$16 sps:$4 sm:$0xff]   ;;  %v9920_v37 = vld [vmem:[#allocation6 + $0x1a0] ss:$16 sps:$4 sm:$0xff]  }
 0x398   :  { %8554 = vtanh.f32 %v9785_v48  ;;  %11484 = vst [vmem:[#allocation39_spill] sm:$0xff] %v9914_v9  ;;  %11486 = vst [vmem:[#allocation41_spill] sm:$0xff] %v9920_v37 }
 0x399   :  { %8556 = vrcp.f32 %v2307_v29  ;;  %v9928_v29 = vld [vmem:[#allocation6 + $0x18c] ss:$16 sps:$4 sm:$0xff]  }
 0x39a   :  { %11489 = vst [vmem:[#allocation44_spill] sm:$0xff] %v9928_v29 }
 0x3a1   :  { %v8547_v17 = vpop.eup %8546 }
 0x3a2   :  { %v8549_v34 = vpop.eup %8548 }
 0x3a3   :  { %v8551_v43 = vpop.eup %8550  ;;  %v2311_v5 = vmul.f32 %v8549_v34, %v8547_v17  ;;  %v9916_v17 = vld [vmem:[#allocation6 + $0x1ac] ss:$16 sps:$4 sm:$0xff]   ;;  %v9922_v34 = vld [vmem:[#allocation6 + $0x1a8] ss:$16 sps:$4 sm:$0xff]  }
 0x3a4   :  { %v2310_v49 = vmul.f32 %v8551_v43, %v9667_v22  ;;  %v8553_v21 = vpop.eup %8552  ;;  %11485 = vst [vmem:[#allocation40_spill] sm:$0xff] %v9916_v17  ;;  %11487 = vst [vmem:[#allocation42_spill] sm:$0xff] %v9922_v34  ;;  %v9926_v43 = vld [vmem:[#allocation6 + $0x184] ss:$16 sps:$4 sm:$0xff]  }
 0x3a5   :  { %v8555_v0 = vpop.eup %8554  ;;  %11488 = vst [vmem:[#allocation43_spill] sm:$0xff] %v9926_v43 }
 0x3a6   :  { %v9793_v50 = vadd.f32 %v2311_v5, %v2310_v49  ;;  %v8557_v53 = vpop.eup %8556  ;;  %v9796_v55 = vmul.f32 %v8555_v0, %v8553_v21  ;;  %v9932_v5 = vld [vmem:[#allocation6 + $0x180] ss:$16 sps:$4 sm:$0xff]   ;;  %v9934_v49 = vld [vmem:[#allocation6 + $0x188] ss:$16 sps:$4 sm:$0xff]   ;;  %v9938_v21 = vld [vmem:[#allocation6 + $0x164] ss:$16 sps:$4 sm:$0xff]  }
 0x3a7   :  { %11490 = vst [vmem:[#allocation45_spill] sm:$0xff] %v9932_v5  ;;  %11491 = vst [vmem:[#allocation46_spill] sm:$0xff] %v9934_v49  ;;  %v9940_v0 = vld [vmem:[#allocation6 + $0x16c] ss:$16 sps:$4 sm:$0xff]  }
 0x3a8   :  { %8558 = vtanh.f32 %v9793_v50  ;;  %11492 = vst [vmem:[#allocation47_spill] sm:$0xff] %v9938_v21  ;;  %11493 = vst [vmem:[#allocation48_spill] sm:$0xff] %v9940_v0 }
 0x3b5   :  { %v8559_v54 = vpop.eup %8558 }
 0x3b6   :  { %v2314_v60 = vmul.f32 %v8559_v54, %v8557_v53  ;;  %v9944_v53 = vld [vmem:[#allocation6 + $0x160] ss:$16 sps:$4 sm:$0xff]   ;;  %v9946_v54 = vld [vmem:[#allocation6 + $0x168] ss:$16 sps:$4 sm:$0xff]  }
 0x3b7   :  { %11494 = vst [vmem:[#allocation49_spill] sm:$0xff] %v9944_v53  ;;  %11495 = vst [vmem:[#allocation50_spill] sm:$0xff] %v9946_v54 }
 0x3b8   :  { %7239 = vst [vmem:[%s11152_s8 + $0x8] sm:$0xff] %v2314_v60  ;;  %v7847_v22 = vpack.c.bf16 %v2314_v60, %v9796_v55  ;;  %v8738_v38 = vpack.c.bf16 %v2314_v60, %v2314_v60  ;;  %v9950_v60 = vld [vmem:[#allocation6 + $0x144] ss:$16 sps:$4 sm:$0xff]  }
 0x3b9   :  { %11496 = vst [vmem:[#allocation51_spill] sm:$0xff] %v9950_v60 }
 0x3ba   :  { %7848 = vst [vmem:[#allocation3] sm:$0xff] %v7847_v22   ;;  %v9952_v22 = vld [vmem:[#allocation6 + $0x14c] ss:$16 sps:$4 sm:$0xff]  }
 0x3bb   :  { %11497 = vst [vmem:[#allocation52_spill] sm:$0xff] %v9952_v22 }
 0x3c1   :  { %v2322_v45 = vld [vmem:[#allocation3] sm:$0xf] }
 0x3c2   :  { %2555 = vmatmul.mubr.bf16.vlgmr.msra.gmra.mxu0 %v2322_v45  ;;  %2596 = vmatmul.mubr.bf16.vlgmr.msra.gmra.mxu1 %v2322_v45  ;;  %v9956_v45 = vld [vmem:[#allocation6 + $0x140] ss:$16 sps:$4 sm:$0xff]  }
 0x3c3   :  { %3027 = vmatpush1.bf16.msra.mxu0 %v9802_v51  ;;  %3068 = vmatpush1.bf16.msra.mxu1 %v9804_v46  ;;  %11498 = vst [vmem:[#allocation53_spill] sm:$0xff] %v9956_v45 }
 0x3c4   :  { %3058 = vmatprep.mubr.bf16.mxu0 %v8738_v38  ;;  %3099 = vmatprep.mubr.bf16.mxu1 %v8738_v38  ;;  %v9958_v38 = vld [vmem:[#allocation6 + $0x148] ss:$16 sps:$4 sm:$0xff]  }
 0x3c5   :  { %3028 = vmatprep.subr.bf16.mxu0 %v9806_v42  ;;  %3069 = vmatprep.subr.bf16.mxu1 %v9808_v41  ;;  %11499 = vst [vmem:[#allocation54_spill] sm:$0xff] %v9958_v38 }
 0x3c7   :  { %3029 = vmatpush1.bf16.msra.mxu0 %v9812_v56  ;;  %3070 = vmatpush1.bf16.msra.mxu1 %v9814_v7 }
 0x3c8   :  { %3030 = vmatprep.subr.bf16.mxu0 %v9816_v8  ;;  %3071 = vmatprep.subr.bf16.mxu1 %v9818_v16 }
 0x3cb   :  { %3031 = vmatpush1.bf16.msra.mxu0 %v9824_v19  ;;  %3072 = vmatpush1.bf16.msra.mxu1 %v9826_v35 }
 0x3cc   :  { %3032 = vmatprep.subr.bf16.mxu0 %v9830_v36  ;;  %3073 = vmatprep.subr.bf16.mxu1 %v9832_v39 }
 0x3cf   :  { %3033 = vmatpush1.bf16.msra.mxu0 %v9836_v57  ;;  %3074 = vmatpush1.bf16.msra.mxu1 %v9838_v44 }
 0x3d0   :  { %3034 = vmatprep.subr.bf16.mxu0 %v9842_v47  ;;  %3075 = vmatprep.subr.bf16.mxu1 %v9844_v61 }
 0x3d3   :  { %3035 = vmatpush1.bf16.msra.mxu0 %v9848_v4  ;;  %3076 = vmatpush1.bf16.msra.mxu1 %v9850_v2 }
 0x3d4   :  { %3036 = vmatprep.subr.bf16.mxu0 %v9854_v3  ;;  %3077 = vmatprep.subr.bf16.mxu1 %v9856_v15 }
 0x3d7   :  { %3037 = vmatpush1.bf16.msra.mxu0 %v9860_v62  ;;  %3078 = vmatpush1.bf16.msra.mxu1 %v9862_v1 }
 0x3d8   :  { %3038 = vmatprep.subr.bf16.mxu0 %v9866_v20  ;;  %3079 = vmatprep.subr.bf16.mxu1 %v9868_v24 }
 0x3db   :  { %3039 = vmatpush1.bf16.msra.mxu0 %v9872_v58  ;;  %3080 = vmatpush1.bf16.msra.mxu1 %v9874_v59 }
 0x3dc   :  { %3040 = vmatprep.subr.bf16.mxu0 %v9878_v23  ;;  %3081 = vmatprep.subr.bf16.mxu1 %v9880_v28 }
 0x3df   :  { %3041 = vmatpush1.bf16.msra.mxu0 %v9884_v31  ;;  %3082 = vmatpush1.bf16.msra.mxu1 %v9886_v13 }
 0x3e0   :  { %3042 = vmatprep.subr.bf16.mxu0 %v9890_v32  ;;  %3083 = vmatprep.subr.bf16.mxu1 %v9892_v40 }
 0x3e3   :  { %3043 = vmatpush2.bf16.msra.mxu0 %v9896_v63  ;;  %3084 = vmatpush2.bf16.msra.mxu1 %v9898_v27 }
 0x3e4   :  { %3044 = vmatprep.subr.bf16.mxu0 %v9902_v18  ;;  %3085 = vmatprep.subr.bf16.mxu1 %v9904_v52 }
 0x3e7   :  { %3045 = vmatpush2.bf16.msra.mxu0 %v9908_v14  ;;  %3086 = vmatpush2.bf16.msra.mxu1 %v9910_v26 }
 0x3e8   :  { %3046 = vmatprep.subr.bf16.mxu0 %v9914_v9  ;;  %3087 = vmatprep.subr.bf16.mxu1 %v9916_v17 }
 0x3eb   :  { %3047 = vmatpush2.bf16.msra.mxu0 %v9920_v37  ;;  %3088 = vmatpush2.bf16.msra.mxu1 %v9922_v34 }
 0x3ec   :  { %3048 = vmatprep.subr.bf16.mxu0 %v9926_v43  ;;  %3089 = vmatprep.subr.bf16.mxu1 %v9928_v29 }
 0x3ef   :  { %3049 = vmatpush2.bf16.msra.mxu0 %v9932_v5  ;;  %3090 = vmatpush2.bf16.msra.mxu1 %v9934_v49  ;;  %v9962_v49 = vld [vmem:[#allocation6 + $0x124] ss:$16 sps:$4 sm:$0xff]  }
 0x3f0   :  { %3050 = vmatprep.subr.bf16.mxu0 %v9938_v21  ;;  %3091 = vmatprep.subr.bf16.mxu1 %v9940_v0  ;;  %11500 = vst [vmem:[#allocation55_spill] sm:$0xff] %v9962_v49  ;;  %v9964_v21 = vld [vmem:[#allocation6 + $0x12c] ss:$16 sps:$4 sm:$0xff]   ;;  %v9968_v0 = vld [vmem:[#allocation6 + $0x120] ss:$16 sps:$4 sm:$0xff]  }
 0x3f1   :  { %11501 = vst [vmem:[#allocation56_spill] sm:$0xff] %v9964_v21  ;;  %11502 = vst [vmem:[#allocation57_spill] sm:$0xff] %v9968_v0 }
 0x3f3   :  { %3051 = vmatpush2.bf16.msra.mxu0 %v9944_v53  ;;  %3092 = vmatpush2.bf16.msra.mxu1 %v9946_v54  ;;  %v9970_v53 = vld [vmem:[#allocation6 + $0x128] ss:$16 sps:$4 sm:$0xff]   ;;  %v9974_v54 = vld [vmem:[#allocation6 + $0x104] ss:$16 sps:$4 sm:$0xff]  }
 0x3f4   :  { %3052 = vmatprep.subr.bf16.mxu0 %v9950_v60  ;;  %3093 = vmatprep.subr.bf16.mxu1 %v9952_v22  ;;  %11503 = vst [vmem:[#allocation58_spill] sm:$0xff] %v9970_v53  ;;  %11504 = vst [vmem:[#allocation59_spill] sm:$0xff] %v9974_v54  ;;  %v9976_v60 = vld [vmem:[#allocation6 + $0x10c] ss:$16 sps:$4 sm:$0xff]   ;;  %v9980_v22 = vld [vmem:[#allocation6 + $0x100] ss:$16 sps:$4 sm:$0xff]  }
 0x3f5   :  { %11505 = vst [vmem:[#allocation60_spill] sm:$0xff] %v9976_v60  ;;  %11506 = vst [vmem:[#allocation61_spill] sm:$0xff] %v9980_v22 }
 0x3f7   :  { %3053 = vmatpush2.bf16.msra.mxu0 %v9956_v45  ;;  %3094 = vmatpush2.bf16.msra.mxu1 %v9958_v38  ;;  %v9982_v45 = vld [vmem:[#allocation6 + $0x108] ss:$16 sps:$4 sm:$0xff]  }
 0x3f8   :  { %3054 = vmatprep.subr.bf16.mxu0 %v9962_v49  ;;  %3095 = vmatprep.subr.bf16.mxu1 %v9964_v21  ;;  %11507 = vst [vmem:[#allocation62_spill] sm:$0xff] %v9982_v45  ;;  %v8739_v21 = vpack.c.bf16 %v9796_v55, %v9796_v55  ;;  %v10005_v55 = vld [vmem:[%s11147_s3 + $0xe0] ss:$16 sps:$4 sm:$0xff]  }
 0x3f9   :  { %11510 = vst [vmem:[#allocation65_spill] sm:$0xff] %v10005_v55 }
 0x3fb   :  { %3055 = vmatpush2.bf16.msra.mxu0 %v9968_v0  ;;  %3096 = vmatpush2.bf16.msra.mxu1 %v9970_v53  ;;  %v9995_v53 = vld [vmem:[%s11147_s3 + $0xe4] ss:$16 sps:$4 sm:$0xff]  }
 0x3fc   :  { %3056 = vmatprep.subr.bf16.mxu0 %v9974_v54  ;;  %3097 = vmatprep.subr.bf16.mxu1 %v9976_v60  ;;  %11508 = vst [vmem:[#allocation63_spill] sm:$0xff] %v9995_v53  ;;  %v11540_v60 = vld [vmem:[#allocation19_spill] sm:$0xff]  ;;  %v11541_v0 = vld [vmem:[#allocation20_spill] sm:$0xff] }
 0x3ff   :  { %3057 = vmatpush2.bf16.msra.mxu0 %v9980_v22  ;;  %3098 = vmatpush2.bf16.msra.mxu1 %v9982_v45  ;;  %v10000_v22 = vld [vmem:[%s11147_s3 + $0xec] ss:$16 sps:$4 sm:$0xff]  }
 0x400   :  { %11509 = vst [vmem:[#allocation64_spill] sm:$0xff] %v10000_v22  ;;  %3340 = vmatprep.subr.bf16.mxu0 %v9995_v53  ;;  %3381 = vmatprep.subr.bf16.mxu1 %v10000_v22  ;;  %v10024_v45 = vld [vmem:[%s11147_s3 + $0xcc] ss:$16 sps:$4 sm:$0xff]   ;;  %v10029_v53 = vld [vmem:[%s11147_s3 + $0xc0] ss:$16 sps:$4 sm:$0xff]  }
 0x401   :  { %11513 = vst [vmem:[#allocation68_spill] sm:$0xff] %v10024_v45  ;;  %11514 = vst [vmem:[#allocation69_spill] sm:$0xff] %v10029_v53  ;;  %v10048_v22 = vld [vmem:[%s11147_s3 + $0xac] ss:$16 sps:$4 sm:$0xff]  }
 0x402   :  { %3059 = vmatmul.mubr.bf16.vlgmr.msra.gmra.mxu0 %v8739_v21  ;;  %3100 = vmatmul.mubr.bf16.vlgmr.msra.gmra.mxu1 %v8739_v21  ;;  %v10010_v21 = vld [vmem:[%s11147_s3 + $0xe8] ss:$16 sps:$4 sm:$0xff]   ;;  %11517 = vst [vmem:[#allocation72_spill] sm:$0xff] %v10048_v22 }
 0x403   :  { %3372 = vmatprep.mubr.bf16.mxu0 %v11452_v11  ;;  %3413 = vmatprep.mubr.bf16.mxu1 %v11452_v11  ;;  %11511 = vst [vmem:[#allocation66_spill] sm:$0xff] %v10010_v21  ;;  %v10019_v11 = vld [vmem:[%s11147_s3 + $0xc4] ss:$16 sps:$4 sm:$0xff]  }
 0x404   :  { %3341 = vmatpush1.bf16.msra.mxu0 %v10005_v55  ;;  %3382 = vmatpush1.bf16.msra.mxu1 %v10010_v21  ;;  %11512 = vst [vmem:[#allocation67_spill] sm:$0xff] %v10019_v11  ;;  %v10034_v55 = vld [vmem:[%s11147_s3 + $0xc8] ss:$16 sps:$4 sm:$0xff]   ;;  %v10043_v21 = vld [vmem:[%s11147_s3 + $0xa4] ss:$16 sps:$4 sm:$0xff]  }
 0x405   :  { %11515 = vst [vmem:[#allocation70_spill] sm:$0xff] %v10034_v55  ;;  %3342 = vmatprep.subr.bf16.mxu0 %v10019_v11  ;;  %3383 = vmatprep.subr.bf16.mxu1 %v10024_v45  ;;  %11516 = vst [vmem:[#allocation71_spill] sm:$0xff] %v10043_v21  ;;  %v10053_v11 = vld [vmem:[%s11147_s3 + $0xa0] ss:$16 sps:$4 sm:$0xff]   ;;  %v10072_v45 = vld [vmem:[%s11147_s3 + $0x8c] ss:$16 sps:$4 sm:$0xff]  }
 0x406   :  { %11518 = vst [vmem:[#allocation73_spill] sm:$0xff] %v10053_v11  ;;  %11521 = vst [vmem:[#allocation76_spill] sm:$0xff] %v10072_v45 }
 0x408   :  { %3343 = vmatpush1.bf16.msra.mxu0 %v10029_v53  ;;  %3384 = vmatpush1.bf16.msra.mxu1 %v10034_v55  ;;  %v10058_v53 = vld [vmem:[%s11147_s3 + $0xa8] ss:$16 sps:$4 sm:$0xff]   ;;  %v10067_v55 = vld [vmem:[%s11147_s3 + $0x84] ss:$16 sps:$4 sm:$0xff]  }
 0x409   :  { %11519 = vst [vmem:[#allocation74_spill] sm:$0xff] %v10058_v53  ;;  %3344 = vmatprep.subr.bf16.mxu0 %v10043_v21  ;;  %3385 = vmatprep.subr.bf16.mxu1 %v10048_v22  ;;  %11520 = vst [vmem:[#allocation75_spill] sm:$0xff] %v10067_v55  ;;  %v10077_v21 = vld [vmem:[%s11147_s3 + $0x80] ss:$16 sps:$4 sm:$0xff]   ;;  %v10096_v22 = vld [vmem:[%s11147_s3 + $0x6c] ss:$16 sps:$4 sm:$0xff]  }
 0x40a   :  { %11522 = vst [vmem:[#allocation77_spill] sm:$0xff] %v10077_v21  ;;  %11525 = vst [vmem:[#allocation80_spill] sm:$0xff] %v10096_v22 }
 0x40c   :  { %3345 = vmatpush1.bf16.msra.mxu0 %v10053_v11  ;;  %3386 = vmatpush1.bf16.msra.mxu1 %v10058_v53  ;;  %v10082_v11 = vld [vmem:[%s11147_s3 + $0x88] ss:$16 sps:$4 sm:$0xff]   ;;  %v10091_v53 = vld [vmem:[%s11147_s3 + $0x64] ss:$16 sps:$4 sm:$0xff]  }
 0x40d   :  { %11523 = vst [vmem:[#allocation78_spill] sm:$0xff] %v10082_v11  ;;  %3346 = vmatprep.subr.bf16.mxu0 %v10067_v55  ;;  %3387 = vmatprep.subr.bf16.mxu1 %v10072_v45  ;;  %11524 = vst [vmem:[#allocation79_spill] sm:$0xff] %v10091_v53  ;;  %v10101_v55 = vld [vmem:[%s11147_s3 + $0x60] ss:$16 sps:$4 sm:$0xff]   ;;  %v10120_v45 = vld [vmem:[%s11147_s3 + $0x4c] ss:$16 sps:$4 sm:$0xff]  }
 0x40e   :  { %11526 = vst [vmem:[#allocation81_spill] sm:$0xff] %v10101_v55  ;;  %11529 = vst [vmem:[#allocation84_spill] sm:$0xff] %v10120_v45 }
 0x410   :  { %3347 = vmatpush1.bf16.msra.mxu0 %v10077_v21  ;;  %3388 = vmatpush1.bf16.msra.mxu1 %v10082_v11  ;;  %v10106_v21 = vld [vmem:[%s11147_s3 + $0x68] ss:$16 sps:$4 sm:$0xff]   ;;  %v10115_v11 = vld [vmem:[%s11147_s3 + $0x44] ss:$16 sps:$4 sm:$0xff]  }
 0x411   :  { %11527 = vst [vmem:[#allocation82_spill] sm:$0xff] %v10106_v21  ;;  %3348 = vmatprep.subr.bf16.mxu0 %v10091_v53  ;;  %3389 = vmatprep.subr.bf16.mxu1 %v10096_v22  ;;  %11528 = vst [vmem:[#allocation83_spill] sm:$0xff] %v10115_v11  ;;  %v10125_v53 = vld [vmem:[%s11147_s3 + $0x40] ss:$16 sps:$4 sm:$0xff]   ;;  %v10144_v22 = vld [vmem:[%s11147_s3 + $0x2c] ss:$16 sps:$4 sm:$0xff]  }
 0x412   :  { %11530 = vst [vmem:[#allocation85_spill] sm:$0xff] %v10125_v53  ;;  %11533 = vst [vmem:[#allocation90_spill] sm:$0xff] %v10144_v22 }
 0x414   :  { %3349 = vmatpush1.bf16.msra.mxu0 %v10101_v55  ;;  %3390 = vmatpush1.bf16.msra.mxu1 %v10106_v21  ;;  %v10130_v55 = vld [vmem:[%s11147_s3 + $0x48] ss:$16 sps:$4 sm:$0xff]   ;;  %v10139_v21 = vld [vmem:[%s11147_s3 + $0x24] ss:$16 sps:$4 sm:$0xff]  }
 0x415   :  { %11531 = vst [vmem:[#allocation86_spill] sm:$0xff] %v10130_v55  ;;  %3350 = vmatprep.subr.bf16.mxu0 %v10115_v11  ;;  %3391 = vmatprep.subr.bf16.mxu1 %v10120_v45  ;;  %11532 = vst [vmem:[#allocation87_spill] sm:$0xff] %v10139_v21  ;;  %v10149_v11 = vld [vmem:[%s11147_s3 + $0x20] ss:$16 sps:$4 sm:$0xff]  }
 0x416   :  { %11534 = vst [vmem:[#allocation88_spill] sm:$0xff] %v10149_v11  ;;  %v10168_v45 = vld [vmem:[%s11147_s3] ss:$16 sps:$4 sm:$0xff]  }
 0x417   :  { %11537 = vst [vmem:[#allocation16_spill] sm:$0xff] %v10168_v45 }
 0x418   :  { %3351 = vmatpush1.bf16.msra.mxu0 %v10125_v53  ;;  %3392 = vmatpush1.bf16.msra.mxu1 %v10130_v55  ;;  %v10154_v53 = vld [vmem:[%s11147_s3 + $0x28] ss:$16 sps:$4 sm:$0xff]   ;;  %v10161_v55 = vld [vmem:[%s11147_s3 + $0x4] ss:$16 sps:$4 sm:$0xff]  }
 0x419   :  { %11535 = vst [vmem:[#allocation89_spill] sm:$0xff] %v10154_v53  ;;  %3352 = vmatprep.subr.bf16.mxu0 %v10139_v21  ;;  %3393 = vmatprep.subr.bf16.mxu1 %v10144_v22  ;;  %11536 = vst [vmem:[#allocation15_spill] sm:$0xff] %v10161_v55  ;;  %v10173_v21 = vld [vmem:[%s11147_s3 + $0x8] ss:$16 sps:$4 sm:$0xff]   ;;  %v10178_v22 = vld [vmem:[%s11147_s3 + $0xc] ss:$16 sps:$4 sm:$0xff]  }
 0x41a   :  { %11538 = vst [vmem:[#allocation17_spill] sm:$0xff] %v10173_v21  ;;  %11539 = vst [vmem:[#allocation18_spill] sm:$0xff] %v10178_v22 }
 0x41c   :  { %3353 = vmatpush1.bf16.msra.mxu0 %v10149_v11  ;;  %3394 = vmatpush1.bf16.msra.mxu1 %v10154_v53 }
 0x41d   :  { %3354 = vmatprep.subr.bf16.mxu0 %v10161_v55  ;;  %3395 = vmatprep.subr.bf16.mxu1 %v10178_v22  ;;  %v11542_v55 = vld [vmem:[#allocation21_spill] sm:$0xff]  ;;  %v11543_v22 = vld [vmem:[#allocation22_spill] sm:$0xff] }
 0x420   :  { %3355 = vmatpush1.bf16.msra.mxu0 %v10168_v45  ;;  %3396 = vmatpush1.bf16.msra.mxu1 %v10173_v21 }
 0x421   :  { %3844 = vmatprep.subr.bf16.mxu0 %v9774_v6  ;;  %3885 = vmatprep.subr.bf16.mxu1 %v9776_v25 }
 0x482   :  { %v2556_v53 = vpop.f32.mrf.mxu0  ;;  %v2597_v11 = vpop.f32.mrf.mxu1 }
 0x483   :  { %v2604_v54 = vadd.f32 %v2556_v53, %v11540_v60  ;;  %v2606_v49 = vadd.f32 %v2597_v11, %v11541_v0 }
 0x484   :  { %v2558_v38 = vpop.f32.mrf.mxu0  ;;  %v2599_v5 = vpop.f32.mrf.mxu1 }
 0x485   :  { %v7272_v29 = vmul.f32 -1.442695, %v2604_v54  ;;  %v2605_v43 = vadd.f32 %v2558_v38, %v11542_v55  ;;  %v2607_v34 = vadd.f32 %v2599_v5, %v11543_v22 }
 0x486   :  { %v2560_v37 = vpop.f32.mrf.mxu0  ;;  %v2601_v17 = vpop.f32.mrf.mxu1 }
 0x487   :  { %8560 = vpow2.f32 %v7272_v29  ;;  %v7273_v45 = vmul.f32 -1.442695, %v2605_v43 }
 0x488   :  { %v2561_v21 = vpop.f32.mrf.mxu0  ;;  %v2602_v9 = vpop.f32.mrf.mxu1 }
 0x489   :  { %8562 = vpow2.f32 %v7273_v45 }
 0x48a   :  { %8564 = vtanh.f32 %v2606_v49 }
 0x494   :  { %v8561_v53 = vpop.eup %8560 }
 0x495   :  { %v2612_v11 = vadd.f32 1.0, %v8561_v53 }
 0x496   :  { %v8563_v0 = vpop.eup %8562 }
 0x497   :  { %8566 = vrcp.f32 %v2612_v11  ;;  %v2618_v6 = vadd.f32 1.0, %v8563_v0  ;;  %v8565_v25 = vpop.eup %8564 }
 0x499   :  { %8568 = vrcp.f32 %v2618_v6  ;;  %v7274_v6 = vmul.f32 -1.442695, %v2607_v34 }
 0x4a4   :  { %v8567_v54 = vpop.eup %8566 }
 0x4a5   :  { %v2629_v60 = vmul.f32 %v8567_v54, %v8565_v25 }
 0x4a6   :  { %v8569_v38 = vpop.eup %8568 }
 0x4a7   :  { %v2628_v5 = vmul.f32 %v8569_v38, %v9785_v48 }
 0x4a9   :  { %v10191_v37 = vadd.f32 %v2629_v60, %v2628_v5 }
 0x4c2   :  { %v3060_v17 = vpop.f32.mrf.mxu0  ;;  %v3101_v43 = vpop.f32.mrf.mxu1 }
 0x4c3   :  { %v3061_v9 = vadd.f32 %v3060_v17, %v11483_v12  ;;  %v3102_v60 = vadd.f32 %v3101_v43, %v9660_v30 }
 0x4c4   :  { %v3062_v29 = vpop.f32.mrf.mxu0  ;;  %v3103_v22 = vpop.f32.mrf.mxu1 }
 0x4c5   :  { %v7341_v45 = vmul.f32 -1.442695, %v3061_v9  ;;  %v3063_v49 = vadd.f32 %v3062_v29, %v9649_v33  ;;  %v3104_v48 = vadd.f32 %v3103_v22, %v9655_v10 }
 0x4c6   :  { %v3064_v55 = vpop.f32.mrf.mxu0  ;;  %v3105_v21 = vpop.f32.mrf.mxu1 }
 0x4c7   :  { %8570 = vpow2.f32 %v7341_v45  ;;  %v7342_v53 = vmul.f32 -1.442695, %v3063_v49  ;;  %v7343_v25 = vmul.f32 -1.442695, %v3104_v48 }
 0x4c8   :  { %v3065_v11 = vpop.f32.mrf.mxu0  ;;  %v3106_v0 = vpop.f32.mrf.mxu1 }
 0x4c9   :  { %8572 = vpow2.f32 %v7342_v53 }
 0x4ca   :  { %8574 = vpow2.f32 %v7274_v6 }
 0x4cb   :  { %8576 = vpow2.f32 %v7343_v25 }
 0x4d4   :  { %v8571_v54 = vpop.eup %8570 }
 0x4d5   :  { %v3112_v38 = vadd.f32 1.0, %v8571_v54 }
 0x4d6   :  { %v8573_v5 = vpop.eup %8572 }
 0x4d7   :  { %8578 = vrcp.f32 %v3112_v38  ;;  %v3118_v17 = vadd.f32 1.0, %v8573_v5  ;;  %v8575_v9 = vpop.eup %8574  ;;  %v11581_v5 = vld [vmem:[#allocation75_spill] sm:$0xff] }
 0x4d8   :  { %8580 = vtanh.f32 %v3102_v60  ;;  %v8577_v29 = vpop.eup %8576  ;;  %v2625_v49 = vadd.f32 1.0, %v8575_v9  ;;  %v11583_v9 = vld [vmem:[#allocation77_spill] sm:$0xff] }
 0x4d9   :  { %8582 = vrcp.f32 %v3118_v17  ;;  %v3125_v22 = vadd.f32 1.0, %v8577_v29  ;;  %v11582_v17 = vld [vmem:[#allocation76_spill] sm:$0xff]  ;;  %v11584_v29 = vld [vmem:[#allocation78_spill] sm:$0xff] }
 0x4da   :  { %8584 = vrcp.f32 %v2625_v49  ;;  %v11586_v49 = vld [vmem:[#allocation80_spill] sm:$0xff] }
 0x4db   :  { %8586 = vtanh.f32 %v10191_v37 }
 0x4dc   :  { %8588 = vrcp.f32 %v3125_v22  ;;  %v11589_v22 = vld [vmem:[#allocation83_spill] sm:$0xff] }
 0x4e4   :  { %v8579_v45 = vpop.eup %8578 }
 0x4e5   :  { %v8581_v55 = vpop.eup %8580 }
 0x4e6   :  { %v8583_v21 = vpop.eup %8582  ;;  %v3129_v34 = vmul.f32 %v8581_v55, %v8579_v45  ;;  %v11585_v45 = vld [vmem:[#allocation79_spill] sm:$0xff]  ;;  %v11587_v55 = vld [vmem:[#allocation81_spill] sm:$0xff] }
 0x4e7   :  { %v3128_v53 = vmul.f32 %v8583_v21, %v9793_v50  ;;  %v8585_v11 = vpop.eup %8584  ;;  %v11588_v21 = vld [vmem:[#allocation82_spill] sm:$0xff] }
 0x4e8   :  { %v8587_v0 = vpop.eup %8586 }
 0x4e9   :  { %v10199_v43 = vadd.f32 %v3129_v34, %v3128_v53  ;;  %v8589_v48 = vpop.eup %8588  ;;  %v10202_v25 = vmul.f32 %v8587_v0, %v8585_v11  ;;  %v11590_v34 = vld [vmem:[#allocation84_spill] sm:$0xff]  ;;  %v11591_v53 = vld [vmem:[#allocation85_spill] sm:$0xff]  ;;  %v11592_v11 = vld [vmem:[#allocation86_spill] sm:$0xff] }
 0x4ea   :  { %v11593_v0 = vld [vmem:[#allocation87_spill] sm:$0xff] }
 0x4eb   :  { %8590 = vtanh.f32 %v10199_v43 }
 0x4f8   :  { %v8591_v6 = vpop.eup %8590 }
 0x4f9   :  { %v3132_v54 = vmul.f32 %v8591_v6, %v8589_v48  ;;  %v11594_v48 = vld [vmem:[#allocation90_spill] sm:$0xff]  ;;  %v11595_v6 = vld [vmem:[#allocation88_spill] sm:$0xff] }
 0x4fb   :  { %7344 = vst [vmem:[%s11152_s8 + $0x10] sm:$0xff] %v3132_v54  ;;  %v7852_v50 = vpack.c.bf16 %v3132_v54, %v10202_v25  ;;  %v8740_v38 = vpack.c.bf16 %v3132_v54, %v3132_v54  ;;  %v11597_v54 = vld [vmem:[#allocation15_spill] sm:$0xff] }
 0x4fd   :  { %7853 = vst [vmem:[#allocation3] sm:$0xff] %v7852_v50   ;;  %v11598_v50 = vld [vmem:[#allocation18_spill] sm:$0xff] }
 0x504   :  { %v3140_v60 = vld [vmem:[#allocation3] sm:$0xf] }
 0x505   :  { %3373 = vmatmul.mubr.bf16.vlgmr.msra.gmra.mxu0 %v3140_v60  ;;  %3414 = vmatmul.mubr.bf16.vlgmr.msra.gmra.mxu1 %v3140_v60  ;;  %v11599_v60 = vld [vmem:[#allocation16_spill] sm:$0xff] }
 0x506   :  { %3845 = vmatpush1.bf16.msra.mxu0 %v9802_v51  ;;  %3886 = vmatpush1.bf16.msra.mxu1 %v9804_v46  ;;  %v11544_v51 = vld [vmem:[#allocation39_spill] sm:$0xff]  ;;  %v11545_v46 = vld [vmem:[#allocation40_spill] sm:$0xff] }
 0x507   :  { %3876 = vmatprep.mubr.bf16.mxu0 %v8740_v38  ;;  %3917 = vmatprep.mubr.bf16.mxu1 %v8740_v38  ;;  %v11600_v38 = vld [vmem:[#allocation17_spill] sm:$0xff] }
 0x508   :  { %3846 = vmatprep.subr.bf16.mxu0 %v9806_v42  ;;  %3887 = vmatprep.subr.bf16.mxu1 %v9808_v41  ;;  %v11546_v42 = vld [vmem:[#allocation41_spill] sm:$0xff]  ;;  %v11547_v41 = vld [vmem:[#allocation42_spill] sm:$0xff] }
 0x50a   :  { %3847 = vmatpush1.bf16.msra.mxu0 %v9812_v56  ;;  %3888 = vmatpush1.bf16.msra.mxu1 %v9814_v7  ;;  %v11548_v56 = vld [vmem:[#allocation43_spill] sm:$0xff]  ;;  %v11549_v7 = vld [vmem:[#allocation44_spill] sm:$0xff] }
 0x50b   :  { %3848 = vmatprep.subr.bf16.mxu0 %v9816_v8  ;;  %3889 = vmatprep.subr.bf16.mxu1 %v9818_v16  ;;  %v11550_v8 = vld [vmem:[#allocation45_spill] sm:$0xff]  ;;  %v11551_v16 = vld [vmem:[#allocation46_spill] sm:$0xff] }
 0x50e   :  { %3849 = vmatpush1.bf16.msra.mxu0 %v9824_v19  ;;  %3890 = vmatpush1.bf16.msra.mxu1 %v9826_v35  ;;  %v11552_v19 = vld [vmem:[#allocation47_spill] sm:$0xff]  ;;  %v11553_v35 = vld [vmem:[#allocation48_spill] sm:$0xff] }
 0x50f   :  { %3850 = vmatprep.subr.bf16.mxu0 %v9830_v36  ;;  %3891 = vmatprep.subr.bf16.mxu1 %v9832_v39  ;;  %v11554_v36 = vld [vmem:[#allocation49_spill] sm:$0xff]  ;;  %v11555_v39 = vld [vmem:[#allocation50_spill] sm:$0xff] }
 0x512   :  { %3851 = vmatpush1.bf16.msra.mxu0 %v9836_v57  ;;  %3892 = vmatpush1.bf16.msra.mxu1 %v9838_v44  ;;  %v11556_v57 = vld [vmem:[#allocation51_spill] sm:$0xff]  ;;  %v11557_v44 = vld [vmem:[#allocation52_spill] sm:$0xff] }
 0x513   :  { %3852 = vmatprep.subr.bf16.mxu0 %v9842_v47  ;;  %3893 = vmatprep.subr.bf16.mxu1 %v9844_v61  ;;  %v11558_v47 = vld [vmem:[#allocation53_spill] sm:$0xff]  ;;  %v11559_v61 = vld [vmem:[#allocation54_spill] sm:$0xff] }
 0x516   :  { %3853 = vmatpush1.bf16.msra.mxu0 %v9848_v4  ;;  %3894 = vmatpush1.bf16.msra.mxu1 %v9850_v2  ;;  %v11560_v4 = vld [vmem:[#allocation55_spill] sm:$0xff]  ;;  %v11561_v2 = vld [vmem:[#allocation56_spill] sm:$0xff] }
 0x517   :  { %3854 = vmatprep.subr.bf16.mxu0 %v9854_v3  ;;  %3895 = vmatprep.subr.bf16.mxu1 %v9856_v15  ;;  %v11562_v3 = vld [vmem:[#allocation57_spill] sm:$0xff]  ;;  %v11563_v15 = vld [vmem:[#allocation58_spill] sm:$0xff] }
 0x51a   :  { %3855 = vmatpush1.bf16.msra.mxu0 %v9860_v62  ;;  %3896 = vmatpush1.bf16.msra.mxu1 %v9862_v1  ;;  %v11564_v62 = vld [vmem:[#allocation59_spill] sm:$0xff]  ;;  %v11565_v1 = vld [vmem:[#allocation60_spill] sm:$0xff] }
 0x51b   :  { %3856 = vmatprep.subr.bf16.mxu0 %v9866_v20  ;;  %3897 = vmatprep.subr.bf16.mxu1 %v9868_v24  ;;  %v11566_v20 = vld [vmem:[#allocation61_spill] sm:$0xff]  ;;  %v11567_v24 = vld [vmem:[#allocation62_spill] sm:$0xff] }
 0x51e   :  { %3857 = vmatpush1.bf16.msra.mxu0 %v9872_v58  ;;  %3898 = vmatpush1.bf16.msra.mxu1 %v9874_v59  ;;  %v8741_v58 = vpack.c.bf16 %v10202_v25, %v10202_v25  ;;  %v11568_v59 = vld [vmem:[#allocation63_spill] sm:$0xff]  ;;  %v11596_v25 = vld [vmem:[#allocation89_spill] sm:$0xff] }
 0x51f   :  { %3858 = vmatprep.subr.bf16.mxu0 %v9878_v23  ;;  %3899 = vmatprep.subr.bf16.mxu1 %v9880_v28  ;;  %v11569_v23 = vld [vmem:[#allocation64_spill] sm:$0xff]  ;;  %v11570_v28 = vld [vmem:[#allocation65_spill] sm:$0xff] }
 0x522   :  { %3859 = vmatpush1.bf16.msra.mxu0 %v9884_v31  ;;  %3900 = vmatpush1.bf16.msra.mxu1 %v9886_v13  ;;  %v11571_v31 = vld [vmem:[#allocation66_spill] sm:$0xff]  ;;  %v11572_v13 = vld [vmem:[#allocation67_spill] sm:$0xff] }
 0x523   :  { %3860 = vmatprep.subr.bf16.mxu0 %v9890_v32  ;;  %3901 = vmatprep.subr.bf16.mxu1 %v9892_v40  ;;  %v11573_v32 = vld [vmem:[#allocation68_spill] sm:$0xff]  ;;  %v11574_v40 = vmov 0  }
 0x526   :  { %3861 = vmatpush2.bf16.msra.mxu0 %v9896_v63  ;;  %3902 = vmatpush2.bf16.msra.mxu1 %v9898_v27  ;;  %v11575_v63 = vld [vmem:[#allocation69_spill] sm:$0xff]  ;;  %v11576_v27 = vld [vmem:[#allocation70_spill] sm:$0xff] }
 0x527   :  { %3862 = vmatprep.subr.bf16.mxu0 %v9902_v18  ;;  %3903 = vmatprep.subr.bf16.mxu1 %v9904_v52  ;;  %v11577_v18 = vld [vmem:[#allocation71_spill] sm:$0xff]  ;;  %v11578_v52 = vld [vmem:[#allocation72_spill] sm:$0xff] }
 0x52a   :  { %3863 = vmatpush2.bf16.msra.mxu0 %v9908_v14  ;;  %3904 = vmatpush2.bf16.msra.mxu1 %v9910_v26  ;;  %v11579_v14 = vld [vmem:[#allocation73_spill] sm:$0xff]  ;;  %v11580_v26 = vld [vmem:[#allocation74_spill] sm:$0xff] }
 0x52b   :  { %3864 = vmatprep.subr.bf16.mxu0 %v11544_v51  ;;  %3905 = vmatprep.subr.bf16.mxu1 %v11545_v46  ;;  %v10306_v51 = vld [vmem:[#allocation6 + $0xe4] ss:$16 sps:$4 sm:$0xff]   ;;  %v10308_v46 = vld [vmem:[#allocation6 + $0xec] ss:$16 sps:$4 sm:$0xff]  }
 0x52e   :  { %3865 = vmatpush2.bf16.msra.mxu0 %v11546_v42  ;;  %3906 = vmatpush2.bf16.msra.mxu1 %v11547_v41 }
 0x52f   :  { %3866 = vmatprep.subr.bf16.mxu0 %v11548_v56  ;;  %3907 = vmatprep.subr.bf16.mxu1 %v11549_v7  ;;  %v11601_v56 = vld [vmem:[#allocation23_spill] sm:$0xff] }
 0x532   :  { %3867 = vmatpush2.bf16.msra.mxu0 %v11550_v8  ;;  %3908 = vmatpush2.bf16.msra.mxu1 %v11551_v16  ;;  %v11602_v8 = vld [vmem:[#allocation24_spill] sm:$0xff] }
 0x533   :  { %3868 = vmatprep.subr.bf16.mxu0 %v11552_v19  ;;  %3909 = vmatprep.subr.bf16.mxu1 %v11553_v35 }
 0x536   :  { %3869 = vmatpush2.bf16.msra.mxu0 %v11554_v36  ;;  %3910 = vmatpush2.bf16.msra.mxu1 %v11555_v39  ;;  %v11603_v39 = vld [vmem:[#allocation25_spill] sm:$0xff] }
 0x537   :  { %3870 = vmatprep.subr.bf16.mxu0 %v11556_v57  ;;  %3911 = vmatprep.subr.bf16.mxu1 %v11557_v44  ;;  %v11604_v44 = vld [vmem:[#allocation26_spill] sm:$0xff] }
 0x53a   :  { %3871 = vmatpush2.bf16.msra.mxu0 %v11558_v47  ;;  %3912 = vmatpush2.bf16.msra.mxu1 %v11559_v61 }
 0x53b   :  { %3872 = vmatprep.subr.bf16.mxu0 %v11560_v4  ;;  %3913 = vmatprep.subr.bf16.mxu1 %v11561_v2 }
 0x53e   :  { %3873 = vmatpush2.bf16.msra.mxu0 %v11562_v3  ;;  %3914 = vmatpush2.bf16.msra.mxu1 %v11563_v15 }
 0x53f   :  { %3874 = vmatprep.subr.bf16.mxu0 %v11564_v62  ;;  %3915 = vmatprep.subr.bf16.mxu1 %v11565_v1 }
 0x542   :  { %3875 = vmatpush2.bf16.msra.mxu0 %v11566_v20  ;;  %3916 = vmatpush2.bf16.msra.mxu1 %v11567_v24 }
 0x543   :  { %4158 = vmatprep.subr.bf16.mxu0 %v11568_v59  ;;  %4199 = vmatprep.subr.bf16.mxu1 %v11569_v23 }
 0x545   :  { %3877 = vmatmul.mubr.bf16.vlgmr.msra.gmra.mxu0 %v8741_v58  ;;  %3918 = vmatmul.mubr.bf16.vlgmr.msra.gmra.mxu1 %v8741_v58 }
 0x546   :  { %4159 = vmatpush1.bf16.msra.mxu0 %v11570_v28  ;;  %4200 = vmatpush1.bf16.msra.mxu1 %v11571_v31 }
 0x547   :  { %4160 = vmatprep.subr.bf16.mxu0 %v11572_v13  ;;  %4201 = vmatprep.subr.bf16.mxu1 %v11573_v32 }
 0x548   :  { %4190 = vmatprep.mubr.bf16.mxu0 %v11574_v40  ;;  %4231 = vmatprep.mubr.bf16.mxu1 %v11574_v40 }
 0x54a   :  { %4161 = vmatpush1.bf16.msra.mxu0 %v11575_v63  ;;  %4202 = vmatpush1.bf16.msra.mxu1 %v11576_v27 }
 0x54b   :  { %4162 = vmatprep.subr.bf16.mxu0 %v11577_v18  ;;  %4203 = vmatprep.subr.bf16.mxu1 %v11578_v52 }
 0x54e   :  { %4163 = vmatpush1.bf16.msra.mxu0 %v11579_v14  ;;  %4204 = vmatpush1.bf16.msra.mxu1 %v11580_v26 }
 0x54f   :  { %4164 = vmatprep.subr.bf16.mxu0 %v11581_v5  ;;  %4205 = vmatprep.subr.bf16.mxu1 %v11582_v17 }
 0x552   :  { %4165 = vmatpush1.bf16.msra.mxu0 %v11583_v9  ;;  %4206 = vmatpush1.bf16.msra.mxu1 %v11584_v29 }
 0x553   :  { %4166 = vmatprep.subr.bf16.mxu0 %v11585_v45  ;;  %4207 = vmatprep.subr.bf16.mxu1 %v11586_v49 }
 0x556   :  { %4167 = vmatpush1.bf16.msra.mxu0 %v11587_v55  ;;  %4208 = vmatpush1.bf16.msra.mxu1 %v11588_v21 }
 0x557   :  { %4168 = vmatprep.subr.bf16.mxu0 %v11589_v22  ;;  %4209 = vmatprep.subr.bf16.mxu1 %v11590_v34 }
 0x55a   :  { %4169 = vmatpush1.bf16.msra.mxu0 %v11591_v53  ;;  %4210 = vmatpush1.bf16.msra.mxu1 %v11592_v11 }
 0x55b   :  { %4170 = vmatprep.subr.bf16.mxu0 %v11593_v0  ;;  %4211 = vmatprep.subr.bf16.mxu1 %v11594_v48 }
 0x55e   :  { %4171 = vmatpush1.bf16.msra.mxu0 %v11595_v6  ;;  %4212 = vmatpush1.bf16.msra.mxu1 %v11596_v25 }
 0x55f   :  { %4172 = vmatprep.subr.bf16.mxu0 %v11597_v54  ;;  %4213 = vmatprep.subr.bf16.mxu1 %v11598_v50 }
 0x562   :  { %4173 = vmatpush1.bf16.msra.mxu0 %v11599_v60  ;;  %4214 = vmatpush1.bf16.msra.mxu1 %v11600_v38 }
 0x563   :  { %4662 = vmatprep.subr.bf16.mxu0 %v10306_v51  ;;  %4703 = vmatprep.subr.bf16.mxu1 %v10308_v46 }
 0x5c5   :  { %v3374_v42 = vpop.f32.mrf.mxu0  ;;  %v3415_v41 = vpop.f32.mrf.mxu1 }
 0x5c6   :  { %v3422_v7 = vadd.f32 %v3374_v42, %v11601_v56  ;;  %v3424_v16 = vadd.f32 %v3415_v41, %v11602_v8 }
 0x5c7   :  { %v3376_v19 = vpop.f32.mrf.mxu0  ;;  %v3417_v35 = vpop.f32.mrf.mxu1 }
 0x5c8   :  { %v7377_v36 = vmul.f32 -1.442695, %v3422_v7  ;;  %v3423_v57 = vadd.f32 %v3376_v19, %v11603_v39  ;;  %v3425_v47 = vadd.f32 %v3417_v35, %v11604_v44  ;;  %v10336_v39 = vld [vmem:[#allocation6 + $0xe8] ss:$16 sps:$4 sm:$0xff]   ;;  %v10338_v44 = vld [vmem:[#allocation6 + $0xc4] ss:$16 sps:$4 sm:$0xff]  }
 0x5c9   :  { %v3378_v61 = vpop.f32.mrf.mxu0  ;;  %v3419_v4 = vpop.f32.mrf.mxu1 }
 0x5ca   :  { %8592 = vpow2.f32 %v7377_v36  ;;  %v7378_v2 = vmul.f32 -1.442695, %v3423_v57  ;;  %v7379_v49 = vmul.f32 -1.442695, %v3425_v47  ;;  %v10334_v36 = vld [vmem:[#allocation6 + $0xe0] ss:$16 sps:$4 sm:$0xff]  }
 0x5cb   :  { %v3379_v3 = vpop.f32.mrf.mxu0  ;;  %v3420_v15 = vpop.f32.mrf.mxu1  ;;  %v10340_v47 = vld [vmem:[#allocation6 + $0xcc] ss:$16 sps:$4 sm:$0xff]   ;;  %v10344_v4 = vld [vmem:[#allocation6 + $0xc0] ss:$16 sps:$4 sm:$0xff]  }
 0x5cc   :  { %8594 = vpow2.f32 %v7378_v2  ;;  %v10346_v2 = vld [vmem:[#allocation6 + $0xc8] ss:$16 sps:$4 sm:$0xff]   ;;  %v10348_v3 = vld [vmem:[#allocation6 + $0xa4] ss:$16 sps:$4 sm:$0xff]   ;;  %v10350_v15 = vld [vmem:[#allocation6 + $0xac] ss:$16 sps:$4 sm:$0xff]  }
 0x5cd   :  { %8596 = vtanh.f32 %v3424_v16 }
 0x5d7   :  { %v8593_v62 = vpop.eup %8592 }
 0x5d8   :  { %v3430_v1 = vadd.f32 1.0, %v8593_v62  ;;  %v10356_v62 = vld [vmem:[#allocation6 + $0xa0] ss:$16 sps:$4 sm:$0xff]  }
 0x5d9   :  { %v8595_v20 = vpop.eup %8594 }
 0x5da   :  { %8598 = vrcp.f32 %v3430_v1  ;;  %v3436_v24 = vadd.f32 1.0, %v8595_v20  ;;  %v8597_v58 = vpop.eup %8596  ;;  %v10358_v1 = vld [vmem:[#allocation6 + $0xa8] ss:$16 sps:$4 sm:$0xff]   ;;  %v10362_v20 = vld [vmem:[#allocation6 + $0x84] ss:$16 sps:$4 sm:$0xff]  }
 0x5dc   :  { %8600 = vrcp.f32 %v3436_v24  ;;  %v10364_v24 = vld [vmem:[#allocation6 + $0x8c] ss:$16 sps:$4 sm:$0xff]  }
 0x5e7   :  { %v8599_v59 = vpop.eup %8598 }
 0x5e8   :  { %v3447_v23 = vmul.f32 %v8599_v59, %v8597_v58  ;;  %v10368_v58 = vld [vmem:[#allocation6 + $0x80] ss:$16 sps:$4 sm:$0xff]   ;;  %v10370_v59 = vld [vmem:[#allocation6 + $0x88] ss:$16 sps:$4 sm:$0xff]  }
 0x5e9   :  { %v8601_v28 = vpop.eup %8600 }
 0x5ea   :  { %v3446_v31 = vmul.f32 %v8601_v28, %v10191_v37  ;;  %v10376_v28 = vld [vmem:[#allocation6 + $0x6c] ss:$16 sps:$4 sm:$0xff]  }
 0x5ec   :  { %v10317_v13 = vadd.f32 %v3447_v23, %v3446_v31  ;;  %v10374_v23 = vld [vmem:[#allocation6 + $0x64] ss:$16 sps:$4 sm:$0xff]   ;;  %v10380_v31 = vld [vmem:[#allocation6 + $0x60] ss:$16 sps:$4 sm:$0xff]  }
 0x605   :  { %v3878_v32 = vpop.f32.mrf.mxu0  ;;  %v3919_v63 = vpop.f32.mrf.mxu1 }
 0x606   :  { %v3879_v27 = vadd.f32 %v3878_v32, %v11483_v12  ;;  %v3920_v22 = vadd.f32 %v3919_v63, %v9660_v30  ;;  %v10382_v32 = vld [vmem:[#allocation6 + $0x68] ss:$16 sps:$4 sm:$0xff]   ;;  %v10386_v63 = vld [vmem:[#allocation6 + $0x44] ss:$16 sps:$4 sm:$0xff]  }
 0x607   :  { %v3880_v18 = vpop.f32.mrf.mxu0  ;;  %v3921_v52 = vpop.f32.mrf.mxu1 }
 0x608   :  { %v7446_v14 = vmul.f32 -1.442695, %v3879_v27  ;;  %v3881_v26 = vadd.f32 %v3880_v18, %v9649_v33  ;;  %v3922_v37 = vadd.f32 %v3921_v52, %v9655_v10  ;;  %v10388_v27 = vld [vmem:[#allocation6 + $0x4c] ss:$16 sps:$4 sm:$0xff]   ;;  %v10392_v18 = vld [vmem:[#allocation6 + $0x40] ss:$16 sps:$4 sm:$0xff]  }
 0x609   :  { %v3882_v5 = vpop.f32.mrf.mxu0  ;;  %v3923_v17 = vpop.f32.mrf.mxu1  ;;  %v10394_v52 = vld [vmem:[#allocation6 + $0x48] ss:$16 sps:$4 sm:$0xff]  }
 0x60a   :  { %8602 = vpow2.f32 %v7446_v14  ;;  %v7447_v9 = vmul.f32 -1.442695, %v3881_v26  ;;  %v7448_v55 = vmul.f32 -1.442695, %v3922_v37  ;;  %v10398_v14 = vld [vmem:[#allocation6 + $0x24] ss:$16 sps:$4 sm:$0xff]  }
 0x60b   :  { %v3883_v29 = vpop.f32.mrf.mxu0  ;;  %v3924_v45 = vpop.f32.mrf.mxu1  ;;  %v10400_v26 = vld [vmem:[#allocation6 + $0x2c] ss:$16 sps:$4 sm:$0xff]   ;;  %v10404_v5 = vld [vmem:[#allocation6 + $0x20] ss:$16 sps:$4 sm:$0xff]   ;;  %v10406_v17 = vld [vmem:[#allocation6 + $0x28] ss:$16 sps:$4 sm:$0xff]  }
 0x60c   :  { %8604 = vpow2.f32 %v7447_v9  ;;  %v10410_v9 = vld [vmem:[#allocation6 + $0x4] ss:$16 sps:$4 sm:$0xff]   ;;  %v10412_v29 = vld [vmem:[#allocation6 + $0xc] ss:$16 sps:$4 sm:$0xff]   ;;  %v10416_v45 = vld [vmem:[#allocation6] ss:$16 sps:$4 sm:$0xff]  }
 0x60d   :  { %8606 = vpow2.f32 %v7379_v49  ;;  %v10418_v37 = vld [vmem:[#allocation6 + $0x8] ss:$16 sps:$4 sm:$0xff]   ;;  %v10422_v49 = vld [vmem:[#allocation6 + $0x1e4] ss:$16 sps:$4 sm:$0xff]  }
 0x60e   :  { %8608 = vpow2.f32 %v7448_v55  ;;  %v10424_v55 = vld [vmem:[#allocation6 + $0x1ec] ss:$16 sps:$4 sm:$0xff]  }
 0x617   :  { %v8603_v21 = vpop.eup %8602 }
 0x618   :  { %v3930_v34 = vadd.f32 1.0, %v8603_v21  ;;  %v10428_v21 = vld [vmem:[#allocation6 + $0x1e0] ss:$16 sps:$4 sm:$0xff]  }
 0x619   :  { %v8605_v53 = vpop.eup %8604 }
 0x61a   :  { %8610 = vrcp.f32 %v3930_v34  ;;  %v3936_v11 = vadd.f32 1.0, %v8605_v53  ;;  %v8607_v0 = vpop.eup %8606  ;;  %v10434_v34 = vld [vmem:[#allocation6 + $0x1c4] ss:$16 sps:$4 sm:$0xff]   ;;  %v10436_v53 = vld [vmem:[#allocation6 + $0x1cc] ss:$16 sps:$4 sm:$0xff]  }
 0x61b   :  { %8612 = vtanh.f32 %v3920_v22  ;;  %v8609_v48 = vpop.eup %8608  ;;  %v3443_v25 = vadd.f32 1.0, %v8607_v0  ;;  %v10430_v22 = vld [vmem:[#allocation6 + $0x1e8] ss:$16 sps:$4 sm:$0xff]  }
 0x61c   :  { %8614 = vrcp.f32 %v3936_v11  ;;  %v3943_v60 = vadd.f32 1.0, %v8609_v48  ;;  %v10440_v11 = vld [vmem:[#allocation6 + $0x1c0] ss:$16 sps:$4 sm:$0xff]   ;;  %v10442_v0 = vld [vmem:[#allocation6 + $0x1c8] ss:$16 sps:$4 sm:$0xff]  }
 0x61d   :  { %8616 = vrcp.f32 %v3443_v25  ;;  %v10446_v48 = vld [vmem:[#allocation6 + $0x1a4] ss:$16 sps:$4 sm:$0xff]   ;;  %v10452_v25 = vld [vmem:[#allocation6 + $0x1a0] ss:$16 sps:$4 sm:$0xff]  }
 0x61e   :  { %8618 = vtanh.f32 %v10317_v13  ;;  %11605 = vst [vmem:[#allocation19_spill] sm:$0xff] %v10446_v48  ;;  %11607 = vst [vmem:[#allocation21_spill] sm:$0xff] %v10452_v25 }
 0x61f   :  { %8620 = vrcp.f32 %v3943_v60  ;;  %v10460_v60 = vld [vmem:[#allocation6 + $0x18c] ss:$16 sps:$4 sm:$0xff]  }
 0x620   :  { %11610 = vst [vmem:[#allocation40_spill] sm:$0xff] %v10460_v60 }
 0x627   :  { %v8611_v6 = vpop.eup %8610 }
 0x628   :  { %v8613_v54 = vpop.eup %8612 }
 0x629   :  { %v8615_v50 = vpop.eup %8614  ;;  %v3947_v38 = vmul.f32 %v8613_v54, %v8611_v6  ;;  %v10448_v6 = vld [vmem:[#allocation6 + $0x1ac] ss:$16 sps:$4 sm:$0xff]   ;;  %v10454_v54 = vld [vmem:[#allocation6 + $0x1a8] ss:$16 sps:$4 sm:$0xff]  }
 0x62a   :  { %v3946_v42 = vmul.f32 %v8615_v50, %v10199_v43  ;;  %v8617_v56 = vpop.eup %8616  ;;  %11606 = vst [vmem:[#allocation20_spill] sm:$0xff] %v10448_v6  ;;  %11608 = vst [vmem:[#allocation22_spill] sm:$0xff] %v10454_v54  ;;  %v10458_v50 = vld [vmem:[#allocation6 + $0x184] ss:$16 sps:$4 sm:$0xff]  }
 0x62b   :  { %v8619_v7 = vpop.eup %8618  ;;  %11609 = vst [vmem:[#allocation39_spill] sm:$0xff] %v10458_v50 }
 0x62c   :  { %v10325_v41 = vadd.f32 %v3947_v38, %v3946_v42  ;;  %v8621_v8 = vpop.eup %8620  ;;  %v10328_v19 = vmul.f32 %v8619_v7, %v8617_v56  ;;  %v10464_v38 = vld [vmem:[#allocation6 + $0x180] ss:$16 sps:$4 sm:$0xff]   ;;  %v10466_v42 = vld [vmem:[#allocation6 + $0x188] ss:$16 sps:$4 sm:$0xff]   ;;  %v10470_v56 = vld [vmem:[#allocation6 + $0x164] ss:$16 sps:$4 sm:$0xff]  }
 0x62d   :  { %11611 = vst [vmem:[#allocation41_spill] sm:$0xff] %v10464_v38  ;;  %11612 = vst [vmem:[#allocation42_spill] sm:$0xff] %v10466_v42  ;;  %v10472_v7 = vld [vmem:[#allocation6 + $0x16c] ss:$16 sps:$4 sm:$0xff]  }
 0x62e   :  { %8622 = vtanh.f32 %v10325_v41  ;;  %11613 = vst [vmem:[#allocation43_spill] sm:$0xff] %v10470_v56  ;;  %11614 = vst [vmem:[#allocation44_spill] sm:$0xff] %v10472_v7 }
 0x63b   :  { %v8623_v16 = vpop.eup %8622 }
 0x63c   :  { %v3950_v35 = vmul.f32 %v8623_v16, %v8621_v8  ;;  %v10476_v8 = vld [vmem:[#allocation6 + $0x160] ss:$16 sps:$4 sm:$0xff]   ;;  %v10478_v16 = vld [vmem:[#allocation6 + $0x168] ss:$16 sps:$4 sm:$0xff]  }
 0x63d   :  { %11615 = vst [vmem:[#allocation45_spill] sm:$0xff] %v10476_v8  ;;  %11616 = vst [vmem:[#allocation46_spill] sm:$0xff] %v10478_v16 }
 0x63e   :  { %7449 = vst [vmem:[%s11152_s8 + $0x18] sm:$0xff] %v3950_v35  ;;  %v7857_v43 = vpack.c.bf16 %v3950_v35, %v10328_v19  ;;  %v8742_v61 = vpack.c.bf16 %v3950_v35, %v3950_v35  ;;  %v10482_v35 = vld [vmem:[#allocation6 + $0x144] ss:$16 sps:$4 sm:$0xff]  }
 0x63f   :  { %11617 = vst [vmem:[#allocation47_spill] sm:$0xff] %v10482_v35 }
 0x640   :  { %7858 = vst [vmem:[#allocation3] sm:$0xff] %v7857_v43   ;;  %v10484_v43 = vld [vmem:[#allocation6 + $0x14c] ss:$16 sps:$4 sm:$0xff]  }
 0x641   :  { %11618 = vst [vmem:[#allocation48_spill] sm:$0xff] %v10484_v43 }
 0x647   :  { %v3958_v57 = vld [vmem:[#allocation3] sm:$0xf] }
 0x648   :  { %4191 = vmatmul.mubr.bf16.vlgmr.msra.gmra.mxu0 %v3958_v57  ;;  %4232 = vmatmul.mubr.bf16.vlgmr.msra.gmra.mxu1 %v3958_v57  ;;  %v10488_v57 = vld [vmem:[#allocation6 + $0x140] ss:$16 sps:$4 sm:$0xff]  }
 0x649   :  { %4663 = vmatpush1.bf16.msra.mxu0 %v10334_v36  ;;  %4704 = vmatpush1.bf16.msra.mxu1 %v10336_v39  ;;  %11619 = vst [vmem:[#allocation49_spill] sm:$0xff] %v10488_v57 }
 0x64a   :  { %4694 = vmatprep.mubr.bf16.mxu0 %v8742_v61  ;;  %4735 = vmatprep.mubr.bf16.mxu1 %v8742_v61  ;;  %v10490_v61 = vld [vmem:[#allocation6 + $0x148] ss:$16 sps:$4 sm:$0xff]  }
 0x64b   :  { %4664 = vmatprep.subr.bf16.mxu0 %v10338_v44  ;;  %4705 = vmatprep.subr.bf16.mxu1 %v10340_v47  ;;  %11620 = vst [vmem:[#allocation50_spill] sm:$0xff] %v10490_v61 }
 0x64d   :  { %4665 = vmatpush1.bf16.msra.mxu0 %v10344_v4  ;;  %4706 = vmatpush1.bf16.msra.mxu1 %v10346_v2 }
 0x64e   :  { %4666 = vmatprep.subr.bf16.mxu0 %v10348_v3  ;;  %4707 = vmatprep.subr.bf16.mxu1 %v10350_v15 }
 0x651   :  { %4667 = vmatpush1.bf16.msra.mxu0 %v10356_v62  ;;  %4708 = vmatpush1.bf16.msra.mxu1 %v10358_v1 }
 0x652   :  { %4668 = vmatprep.subr.bf16.mxu0 %v10362_v20  ;;  %4709 = vmatprep.subr.bf16.mxu1 %v10364_v24 }
 0x655   :  { %4669 = vmatpush1.bf16.msra.mxu0 %v10368_v58  ;;  %4710 = vmatpush1.bf16.msra.mxu1 %v10370_v59 }
 0x656   :  { %4670 = vmatprep.subr.bf16.mxu0 %v10374_v23  ;;  %4711 = vmatprep.subr.bf16.mxu1 %v10376_v28 }
 0x659   :  { %4671 = vmatpush1.bf16.msra.mxu0 %v10380_v31  ;;  %4712 = vmatpush1.bf16.msra.mxu1 %v10382_v32 }
 0x65a   :  { %4672 = vmatprep.subr.bf16.mxu0 %v10386_v63  ;;  %4713 = vmatprep.subr.bf16.mxu1 %v10388_v27 }
 0x65d   :  { %4673 = vmatpush1.bf16.msra.mxu0 %v10392_v18  ;;  %4714 = vmatpush1.bf16.msra.mxu1 %v10394_v52 }
 0x65e   :  { %4674 = vmatprep.subr.bf16.mxu0 %v10398_v14  ;;  %4715 = vmatprep.subr.bf16.mxu1 %v10400_v26 }
 0x661   :  { %4675 = vmatpush1.bf16.msra.mxu0 %v10404_v5  ;;  %4716 = vmatpush1.bf16.msra.mxu1 %v10406_v17 }
 0x662   :  { %4676 = vmatprep.subr.bf16.mxu0 %v10410_v9  ;;  %4717 = vmatprep.subr.bf16.mxu1 %v10412_v29 }
 0x665   :  { %4677 = vmatpush1.bf16.msra.mxu0 %v10416_v45  ;;  %4718 = vmatpush1.bf16.msra.mxu1 %v10418_v37 }
 0x666   :  { %4678 = vmatprep.subr.bf16.mxu0 %v10422_v49  ;;  %4719 = vmatprep.subr.bf16.mxu1 %v10424_v55 }
 0x669   :  { %4679 = vmatpush2.bf16.msra.mxu0 %v10428_v21  ;;  %4720 = vmatpush2.bf16.msra.mxu1 %v10430_v22 }
 0x66a   :  { %4680 = vmatprep.subr.bf16.mxu0 %v10434_v34  ;;  %4721 = vmatprep.subr.bf16.mxu1 %v10436_v53 }
 0x66d   :  { %4681 = vmatpush2.bf16.msra.mxu0 %v10440_v11  ;;  %4722 = vmatpush2.bf16.msra.mxu1 %v10442_v0 }
 0x66e   :  { %4682 = vmatprep.subr.bf16.mxu0 %v10446_v48  ;;  %4723 = vmatprep.subr.bf16.mxu1 %v10448_v6 }
 0x671   :  { %4683 = vmatpush2.bf16.msra.mxu0 %v10452_v25  ;;  %4724 = vmatpush2.bf16.msra.mxu1 %v10454_v54 }
 0x672   :  { %4684 = vmatprep.subr.bf16.mxu0 %v10458_v50  ;;  %4725 = vmatprep.subr.bf16.mxu1 %v10460_v60 }
 0x675   :  { %4685 = vmatpush2.bf16.msra.mxu0 %v10464_v38  ;;  %4726 = vmatpush2.bf16.msra.mxu1 %v10466_v42  ;;  %v10494_v42 = vld [vmem:[#allocation6 + $0x124] ss:$16 sps:$4 sm:$0xff]  }
 0x676   :  { %4686 = vmatprep.subr.bf16.mxu0 %v10470_v56  ;;  %4727 = vmatprep.subr.bf16.mxu1 %v10472_v7  ;;  %11621 = vst [vmem:[#allocation51_spill] sm:$0xff] %v10494_v42  ;;  %v10496_v56 = vld [vmem:[#allocation6 + $0x12c] ss:$16 sps:$4 sm:$0xff]   ;;  %v10500_v7 = vld [vmem:[#allocation6 + $0x120] ss:$16 sps:$4 sm:$0xff]  }
 0x677   :  { %11622 = vst [vmem:[#allocation52_spill] sm:$0xff] %v10496_v56  ;;  %11623 = vst [vmem:[#allocation53_spill] sm:$0xff] %v10500_v7 }
 0x679   :  { %4687 = vmatpush2.bf16.msra.mxu0 %v10476_v8  ;;  %4728 = vmatpush2.bf16.msra.mxu1 %v10478_v16  ;;  %v10502_v8 = vld [vmem:[#allocation6 + $0x128] ss:$16 sps:$4 sm:$0xff]   ;;  %v10506_v16 = vld [vmem:[#allocation6 + $0x104] ss:$16 sps:$4 sm:$0xff]  }
 0x67a   :  { %4688 = vmatprep.subr.bf16.mxu0 %v10482_v35  ;;  %4729 = vmatprep.subr.bf16.mxu1 %v10484_v43  ;;  %11624 = vst [vmem:[#allocation54_spill] sm:$0xff] %v10502_v8  ;;  %11625 = vst [vmem:[#allocation55_spill] sm:$0xff] %v10506_v16  ;;  %v10508_v35 = vld [vmem:[#allocation6 + $0x10c] ss:$16 sps:$4 sm:$0xff]   ;;  %v10512_v43 = vld [vmem:[#allocation6 + $0x100] ss:$16 sps:$4 sm:$0xff]  }
 0x67b   :  { %11626 = vst [vmem:[#allocation56_spill] sm:$0xff] %v10508_v35  ;;  %11627 = vst [vmem:[#allocation57_spill] sm:$0xff] %v10512_v43 }
 0x67d   :  { %4689 = vmatpush2.bf16.msra.mxu0 %v10488_v57  ;;  %4730 = vmatpush2.bf16.msra.mxu1 %v10490_v61  ;;  %v10514_v57 = vld [vmem:[#allocation6 + $0x108] ss:$16 sps:$4 sm:$0xff]  }
 0x67e   :  { %4690 = vmatprep.subr.bf16.mxu0 %v10494_v42  ;;  %4731 = vmatprep.subr.bf16.mxu1 %v10496_v56  ;;  %11628 = vst [vmem:[#allocation58_spill] sm:$0xff] %v10514_v57  ;;  %v8743_v56 = vpack.c.bf16 %v10328_v19, %v10328_v19  ;;  %v10537_v19 = vld [vmem:[%s11147_s3 + $0xe0] ss:$16 sps:$4 sm:$0xff]  }
 0x67f   :  { %11631 = vst [vmem:[#allocation61_spill] sm:$0xff] %v10537_v19 }
 0x681   :  { %4691 = vmatpush2.bf16.msra.mxu0 %v10500_v7  ;;  %4732 = vmatpush2.bf16.msra.mxu1 %v10502_v8  ;;  %v10527_v8 = vld [vmem:[%s11147_s3 + $0xe4] ss:$16 sps:$4 sm:$0xff]  }
 0x682   :  { %4692 = vmatprep.subr.bf16.mxu0 %v10506_v16  ;;  %4733 = vmatprep.subr.bf16.mxu1 %v10508_v35  ;;  %11629 = vst [vmem:[#allocation59_spill] sm:$0xff] %v10527_v8  ;;  %v11661_v35 = vld [vmem:[#allocation27_spill] sm:$0xff]  ;;  %v11662_v7 = vld [vmem:[#allocation28_spill] sm:$0xff] }
 0x685   :  { %4693 = vmatpush2.bf16.msra.mxu0 %v10512_v43  ;;  %4734 = vmatpush2.bf16.msra.mxu1 %v10514_v57  ;;  %v10532_v43 = vld [vmem:[%s11147_s3 + $0xec] ss:$16 sps:$4 sm:$0xff]  }
 0x686   :  { %11630 = vst [vmem:[#allocation60_spill] sm:$0xff] %v10532_v43  ;;  %4976 = vmatprep.subr.bf16.mxu0 %v10527_v8  ;;  %5017 = vmatprep.subr.bf16.mxu1 %v10532_v43  ;;  %v10556_v57 = vld [vmem:[%s11147_s3 + $0xcc] ss:$16 sps:$4 sm:$0xff]   ;;  %v10561_v8 = vld [vmem:[%s11147_s3 + $0xc0] ss:$16 sps:$4 sm:$0xff]  }
 0x687   :  { %11634 = vst [vmem:[#allocation64_spill] sm:$0xff] %v10556_v57  ;;  %11635 = vst [vmem:[#allocation65_spill] sm:$0xff] %v10561_v8  ;;  %v10580_v43 = vld [vmem:[%s11147_s3 + $0xac] ss:$16 sps:$4 sm:$0xff]  }
 0x688   :  { %4695 = vmatmul.mubr.bf16.vlgmr.msra.gmra.mxu0 %v8743_v56  ;;  %4736 = vmatmul.mubr.bf16.vlgmr.msra.gmra.mxu1 %v8743_v56  ;;  %v10542_v56 = vld [vmem:[%s11147_s3 + $0xe8] ss:$16 sps:$4 sm:$0xff]   ;;  %11638 = vst [vmem:[#allocation68_spill] sm:$0xff] %v10580_v43 }
 0x689   :  { %5008 = vmatprep.mubr.bf16.mxu0 %v11574_v40  ;;  %5049 = vmatprep.mubr.bf16.mxu1 %v11574_v40  ;;  %11632 = vst [vmem:[#allocation62_spill] sm:$0xff] %v10542_v56  ;;  %v10551_v40 = vld [vmem:[%s11147_s3 + $0xc4] ss:$16 sps:$4 sm:$0xff]  }
 0x68a   :  { %4977 = vmatpush1.bf16.msra.mxu0 %v10537_v19  ;;  %5018 = vmatpush1.bf16.msra.mxu1 %v10542_v56  ;;  %11633 = vst [vmem:[#allocation63_spill] sm:$0xff] %v10551_v40  ;;  %v10566_v19 = vld [vmem:[%s11147_s3 + $0xc8] ss:$16 sps:$4 sm:$0xff]   ;;  %v10575_v56 = vld [vmem:[%s11147_s3 + $0xa4] ss:$16 sps:$4 sm:$0xff]  }
 0x68b   :  { %11636 = vst [vmem:[#allocation66_spill] sm:$0xff] %v10566_v19  ;;  %4978 = vmatprep.subr.bf16.mxu0 %v10551_v40  ;;  %5019 = vmatprep.subr.bf16.mxu1 %v10556_v57  ;;  %11637 = vst [vmem:[#allocation67_spill] sm:$0xff] %v10575_v56  ;;  %v10585_v40 = vld [vmem:[%s11147_s3 + $0xa0] ss:$16 sps:$4 sm:$0xff]   ;;  %v10604_v57 = vld [vmem:[%s11147_s3 + $0x8c] ss:$16 sps:$4 sm:$0xff]  }
 0x68c   :  { %11639 = vst [vmem:[#allocation69_spill] sm:$0xff] %v10585_v40  ;;  %11642 = vst [vmem:[#allocation72_spill] sm:$0xff] %v10604_v57 }
 0x68e   :  { %4979 = vmatpush1.bf16.msra.mxu0 %v10561_v8  ;;  %5020 = vmatpush1.bf16.msra.mxu1 %v10566_v19  ;;  %v10590_v8 = vld [vmem:[%s11147_s3 + $0xa8] ss:$16 sps:$4 sm:$0xff]   ;;  %v10599_v19 = vld [vmem:[%s11147_s3 + $0x84] ss:$16 sps:$4 sm:$0xff]  }
 0x68f   :  { %11640 = vst [vmem:[#allocation70_spill] sm:$0xff] %v10590_v8  ;;  %4980 = vmatprep.subr.bf16.mxu0 %v10575_v56  ;;  %5021 = vmatprep.subr.bf16.mxu1 %v10580_v43  ;;  %11641 = vst [vmem:[#allocation71_spill] sm:$0xff] %v10599_v19  ;;  %v10609_v56 = vld [vmem:[%s11147_s3 + $0x80] ss:$16 sps:$4 sm:$0xff]   ;;  %v10628_v43 = vld [vmem:[%s11147_s3 + $0x6c] ss:$16 sps:$4 sm:$0xff]  }
 0x690   :  { %11643 = vst [vmem:[#allocation73_spill] sm:$0xff] %v10609_v56  ;;  %11646 = vst [vmem:[#allocation76_spill] sm:$0xff] %v10628_v43 }
 0x692   :  { %4981 = vmatpush1.bf16.msra.mxu0 %v10585_v40  ;;  %5022 = vmatpush1.bf16.msra.mxu1 %v10590_v8  ;;  %v10614_v40 = vld [vmem:[%s11147_s3 + $0x88] ss:$16 sps:$4 sm:$0xff]   ;;  %v10623_v8 = vld [vmem:[%s11147_s3 + $0x64] ss:$16 sps:$4 sm:$0xff]  }
 0x693   :  { %11644 = vst [vmem:[#allocation74_spill] sm:$0xff] %v10614_v40  ;;  %4982 = vmatprep.subr.bf16.mxu0 %v10599_v19  ;;  %5023 = vmatprep.subr.bf16.mxu1 %v10604_v57  ;;  %11645 = vst [vmem:[#allocation75_spill] sm:$0xff] %v10623_v8  ;;  %v10633_v19 = vld [vmem:[%s11147_s3 + $0x60] ss:$16 sps:$4 sm:$0xff]   ;;  %v10652_v57 = vld [vmem:[%s11147_s3 + $0x4c] ss:$16 sps:$4 sm:$0xff]  }
 0x694   :  { %11647 = vst [vmem:[#allocation77_spill] sm:$0xff] %v10633_v19  ;;  %11650 = vst [vmem:[#allocation80_spill] sm:$0xff] %v10652_v57 }
 0x696   :  { %4983 = vmatpush1.bf16.msra.mxu0 %v10609_v56  ;;  %5024 = vmatpush1.bf16.msra.mxu1 %v10614_v40  ;;  %v10638_v56 = vld [vmem:[%s11147_s3 + $0x68] ss:$16 sps:$4 sm:$0xff]   ;;  %v10647_v40 = vld [vmem:[%s11147_s3 + $0x44] ss:$16 sps:$4 sm:$0xff]  }
 0x697   :  { %11648 = vst [vmem:[#allocation78_spill] sm:$0xff] %v10638_v56  ;;  %4984 = vmatprep.subr.bf16.mxu0 %v10623_v8  ;;  %5025 = vmatprep.subr.bf16.mxu1 %v10628_v43  ;;  %11649 = vst [vmem:[#allocation79_spill] sm:$0xff] %v10647_v40  ;;  %v10657_v8 = vld [vmem:[%s11147_s3 + $0x40] ss:$16 sps:$4 sm:$0xff]   ;;  %v10676_v43 = vld [vmem:[%s11147_s3 + $0x2c] ss:$16 sps:$4 sm:$0xff]  }
 0x698   :  { %11651 = vst [vmem:[#allocation81_spill] sm:$0xff] %v10657_v8  ;;  %11654 = vst [vmem:[#allocation84_spill] sm:$0xff] %v10676_v43 }
 0x69a   :  { %4985 = vmatpush1.bf16.msra.mxu0 %v10633_v19  ;;  %5026 = vmatpush1.bf16.msra.mxu1 %v10638_v56  ;;  %v10662_v19 = vld [vmem:[%s11147_s3 + $0x48] ss:$16 sps:$4 sm:$0xff]   ;;  %v10671_v56 = vld [vmem:[%s11147_s3 + $0x24] ss:$16 sps:$4 sm:$0xff]  }
 0x69b   :  { %11652 = vst [vmem:[#allocation82_spill] sm:$0xff] %v10662_v19  ;;  %4986 = vmatprep.subr.bf16.mxu0 %v10647_v40  ;;  %5027 = vmatprep.subr.bf16.mxu1 %v10652_v57  ;;  %11653 = vst [vmem:[#allocation83_spill] sm:$0xff] %v10671_v56  ;;  %v10681_v40 = vld [vmem:[%s11147_s3 + $0x20] ss:$16 sps:$4 sm:$0xff]  }
 0x69c   :  { %11655 = vst [vmem:[#allocation85_spill] sm:$0xff] %v10681_v40  ;;  %v10700_v57 = vld [vmem:[%s11147_s3] ss:$16 sps:$4 sm:$0xff]  }
 0x69d   :  { %11658 = vst [vmem:[#allocation90_spill] sm:$0xff] %v10700_v57 }
 0x69e   :  { %4987 = vmatpush1.bf16.msra.mxu0 %v10657_v8  ;;  %5028 = vmatpush1.bf16.msra.mxu1 %v10662_v19  ;;  %v10686_v8 = vld [vmem:[%s11147_s3 + $0x28] ss:$16 sps:$4 sm:$0xff]   ;;  %v10693_v19 = vld [vmem:[%s11147_s3 + $0x4] ss:$16 sps:$4 sm:$0xff]  }
 0x69f   :  { %11656 = vst [vmem:[#allocation86_spill] sm:$0xff] %v10686_v8  ;;  %4988 = vmatprep.subr.bf16.mxu0 %v10671_v56  ;;  %5029 = vmatprep.subr.bf16.mxu1 %v10676_v43  ;;  %11657 = vst [vmem:[#allocation87_spill] sm:$0xff] %v10693_v19  ;;  %v10705_v56 = vld [vmem:[%s11147_s3 + $0x8] ss:$16 sps:$4 sm:$0xff]   ;;  %v10710_v43 = vld [vmem:[%s11147_s3 + $0xc] ss:$16 sps:$4 sm:$0xff]  }
 0x6a0   :  { %11659 = vst [vmem:[#allocation88_spill] sm:$0xff] %v10705_v56  ;;  %11660 = vst [vmem:[#allocation89_spill] sm:$0xff] %v10710_v43 }
 0x6a2   :  { %4989 = vmatpush1.bf16.msra.mxu0 %v10681_v40  ;;  %5030 = vmatpush1.bf16.msra.mxu1 %v10686_v8 }
 0x6a3   :  { %4990 = vmatprep.subr.bf16.mxu0 %v10693_v19  ;;  %5031 = vmatprep.subr.bf16.mxu1 %v10710_v43  ;;  %v11663_v19 = vld [vmem:[#allocation29_spill] sm:$0xff]  ;;  %v11664_v43 = vld [vmem:[#allocation30_spill] sm:$0xff] }
 0x6a6   :  { %4991 = vmatpush1.bf16.msra.mxu0 %v10700_v57  ;;  %5032 = vmatpush1.bf16.msra.mxu1 %v10705_v56 }
 0x6a7   :  { %5480 = vmatprep.subr.bf16.mxu0 %v10306_v51  ;;  %5521 = vmatprep.subr.bf16.mxu1 %v10308_v46 }
 0x708   :  { %v4192_v8 = vpop.f32.mrf.mxu0  ;;  %v4233_v40 = vpop.f32.mrf.mxu1 }
 0x709   :  { %v4240_v16 = vadd.f32 %v4192_v8, %v11661_v35  ;;  %v4242_v42 = vadd.f32 %v4233_v40, %v11662_v7 }
 0x70a   :  { %v4194_v61 = vpop.f32.mrf.mxu0  ;;  %v4235_v38 = vpop.f32.mrf.mxu1 }
 0x70b   :  { %v7482_v60 = vmul.f32 -1.442695, %v4240_v16  ;;  %v4241_v50 = vadd.f32 %v4194_v61, %v11663_v19  ;;  %v4243_v54 = vadd.f32 %v4235_v38, %v11664_v43 }
 0x70c   :  { %v4196_v25 = vpop.f32.mrf.mxu0  ;;  %v4237_v6 = vpop.f32.mrf.mxu1 }
 0x70d   :  { %8624 = vpow2.f32 %v7482_v60  ;;  %v7483_v57 = vmul.f32 -1.442695, %v4241_v50 }
 0x70e   :  { %v4197_v56 = vpop.f32.mrf.mxu0  ;;  %v4238_v48 = vpop.f32.mrf.mxu1 }
 0x70f   :  { %8626 = vpow2.f32 %v7483_v57 }
 0x710   :  { %8628 = vtanh.f32 %v4242_v42 }
 0x71a   :  { %v8625_v8 = vpop.eup %8624 }
 0x71b   :  { %v4248_v40 = vadd.f32 1.0, %v8625_v8 }
 0x71c   :  { %v8627_v7 = vpop.eup %8626 }
 0x71d   :  { %8630 = vrcp.f32 %v4248_v40  ;;  %v4254_v51 = vadd.f32 1.0, %v8627_v7  ;;  %v8629_v46 = vpop.eup %8628 }
 0x71f   :  { %8632 = vrcp.f32 %v4254_v51  ;;  %v7484_v51 = vmul.f32 -1.442695, %v4243_v54 }
 0x72a   :  { %v8631_v16 = vpop.eup %8630 }
 0x72b   :  { %v4265_v35 = vmul.f32 %v8631_v16, %v8629_v46 }
 0x72c   :  { %v8633_v61 = vpop.eup %8632 }
 0x72d   :  { %v4264_v38 = vmul.f32 %v8633_v61, %v10317_v13 }
 0x72f   :  { %v10723_v25 = vadd.f32 %v4265_v35, %v4264_v38 }
 0x748   :  { %v4696_v6 = vpop.f32.mrf.mxu0  ;;  %v4737_v50 = vpop.f32.mrf.mxu1 }
 0x749   :  { %v4697_v48 = vadd.f32 %v4696_v6, %v11483_v12  ;;  %v4738_v35 = vadd.f32 %v4737_v50, %v9660_v30 }
 0x74a   :  { %v4698_v60 = vpop.f32.mrf.mxu0  ;;  %v4739_v43 = vpop.f32.mrf.mxu1 }
 0x74b   :  { %v7551_v57 = vmul.f32 -1.442695, %v4697_v48  ;;  %v4699_v42 = vadd.f32 %v4698_v60, %v9649_v33  ;;  %v4740_v13 = vadd.f32 %v4739_v43, %v9655_v10 }
 0x74c   :  { %v4700_v19 = vpop.f32.mrf.mxu0  ;;  %v4741_v56 = vpop.f32.mrf.mxu1 }
 0x74d   :  { %8634 = vpow2.f32 %v7551_v57  ;;  %v7552_v8 = vmul.f32 -1.442695, %v4699_v42  ;;  %v7553_v46 = vmul.f32 -1.442695, %v4740_v13 }
 0x74e   :  { %v4701_v40 = vpop.f32.mrf.mxu0  ;;  %v4742_v7 = vpop.f32.mrf.mxu1 }
 0x74f   :  { %8636 = vpow2.f32 %v7552_v8 }
 0x750   :  { %8638 = vpow2.f32 %v7484_v51 }
 0x751   :  { %8640 = vpow2.f32 %v7553_v46 }
 0x75a   :  { %v8635_v16 = vpop.eup %8634 }
 0x75b   :  { %v4748_v61 = vadd.f32 1.0, %v8635_v16 }
 0x75c   :  { %v8637_v38 = vpop.eup %8636 }
 0x75d   :  { %8642 = vrcp.f32 %v4748_v61  ;;  %v4754_v6 = vadd.f32 1.0, %v8637_v38  ;;  %v8639_v48 = vpop.eup %8638  ;;  %v11702_v38 = vld [vmem:[#allocation71_spill] sm:$0xff] }
 0x75e   :  { %8644 = vtanh.f32 %v4738_v35  ;;  %v8641_v60 = vpop.eup %8640  ;;  %v4261_v42 = vadd.f32 1.0, %v8639_v48  ;;  %v11704_v48 = vld [vmem:[#allocation73_spill] sm:$0xff] }
 0x75f   :  { %8646 = vrcp.f32 %v4754_v6  ;;  %v4761_v43 = vadd.f32 1.0, %v8641_v60  ;;  %v11703_v6 = vld [vmem:[#allocation72_spill] sm:$0xff]  ;;  %v11705_v60 = vld [vmem:[#allocation74_spill] sm:$0xff] }
 0x760   :  { %8648 = vrcp.f32 %v4261_v42  ;;  %v11707_v42 = vld [vmem:[#allocation76_spill] sm:$0xff] }
 0x761   :  { %8650 = vtanh.f32 %v10723_v25 }
 0x762   :  { %8652 = vrcp.f32 %v4761_v43  ;;  %v11710_v43 = vld [vmem:[#allocation79_spill] sm:$0xff] }
 0x76a   :  { %v8643_v57 = vpop.eup %8642 }
 0x76b   :  { %v8645_v19 = vpop.eup %8644 }
 0x76c   :  { %v8647_v56 = vpop.eup %8646  ;;  %v4765_v54 = vmul.f32 %v8645_v19, %v8643_v57  ;;  %v11706_v57 = vld [vmem:[#allocation75_spill] sm:$0xff]  ;;  %v11708_v19 = vld [vmem:[#allocation77_spill] sm:$0xff] }
 0x76d   :  { %v4764_v8 = vmul.f32 %v8647_v56, %v10325_v41  ;;  %v8649_v40 = vpop.eup %8648  ;;  %v11709_v56 = vld [vmem:[#allocation78_spill] sm:$0xff] }
 0x76e   :  { %v8651_v7 = vpop.eup %8650 }
 0x76f   :  { %v10731_v50 = vadd.f32 %v4765_v54, %v4764_v8  ;;  %v8653_v13 = vpop.eup %8652  ;;  %v10734_v46 = vmul.f32 %v8651_v7, %v8649_v40  ;;  %v11711_v54 = vld [vmem:[#allocation80_spill] sm:$0xff]  ;;  %v11712_v8 = vld [vmem:[#allocation81_spill] sm:$0xff]  ;;  %v11713_v40 = vld [vmem:[#allocation82_spill] sm:$0xff] }
 0x770   :  { %v11714_v7 = vld [vmem:[#allocation83_spill] sm:$0xff] }
 0x771   :  { %8654 = vtanh.f32 %v10731_v50 }
 0x77e   :  { %v8655_v51 = vpop.eup %8654 }
 0x77f   :  { %v4768_v16 = vmul.f32 %v8655_v51, %v8653_v13  ;;  %v11715_v13 = vld [vmem:[#allocation84_spill] sm:$0xff]  ;;  %v11716_v51 = vld [vmem:[#allocation85_spill] sm:$0xff] }
 0x781   :  { %7554 = vst [vmem:[%s11152_s8 + $0x20] sm:$0xff] %v4768_v16  ;;  %v7862_v41 = vpack.c.bf16 %v4768_v16, %v10734_v46  ;;  %v8744_v61 = vpack.c.bf16 %v4768_v16, %v4768_v16  ;;  %v11718_v16 = vld [vmem:[#allocation87_spill] sm:$0xff] }
 0x783   :  { %7863 = vst [vmem:[#allocation3] sm:$0xff] %v7862_v41   ;;  %v11719_v41 = vld [vmem:[#allocation89_spill] sm:$0xff] }
 0x78a   :  { %v4776_v35 = vld [vmem:[#allocation3] sm:$0xf] }
 0x78b   :  { %5009 = vmatmul.mubr.bf16.vlgmr.msra.gmra.mxu0 %v4776_v35  ;;  %5050 = vmatmul.mubr.bf16.vlgmr.msra.gmra.mxu1 %v4776_v35  ;;  %v11720_v35 = vld [vmem:[#allocation90_spill] sm:$0xff] }
 0x78c   :  { %5481 = vmatpush1.bf16.msra.mxu0 %v10334_v36  ;;  %5522 = vmatpush1.bf16.msra.mxu1 %v10336_v39  ;;  %v11665_v36 = vld [vmem:[#allocation19_spill] sm:$0xff]  ;;  %v11666_v39 = vld [vmem:[#allocation20_spill] sm:$0xff] }
 0x78d   :  { %5512 = vmatprep.mubr.bf16.mxu0 %v8744_v61  ;;  %5553 = vmatprep.mubr.bf16.mxu1 %v8744_v61  ;;  %v11721_v61 = vld [vmem:[#allocation88_spill] sm:$0xff] }
 0x78e   :  { %5482 = vmatprep.subr.bf16.mxu0 %v10338_v44  ;;  %5523 = vmatprep.subr.bf16.mxu1 %v10340_v47  ;;  %v11667_v44 = vld [vmem:[#allocation21_spill] sm:$0xff]  ;;  %v11668_v47 = vld [vmem:[#allocation22_spill] sm:$0xff] }
 0x790   :  { %5483 = vmatpush1.bf16.msra.mxu0 %v10344_v4  ;;  %5524 = vmatpush1.bf16.msra.mxu1 %v10346_v2  ;;  %v11669_v4 = vld [vmem:[#allocation39_spill] sm:$0xff]  ;;  %v11670_v2 = vld [vmem:[#allocation40_spill] sm:$0xff] }
 0x791   :  { %5484 = vmatprep.subr.bf16.mxu0 %v10348_v3  ;;  %5525 = vmatprep.subr.bf16.mxu1 %v10350_v15  ;;  %v11671_v3 = vld [vmem:[#allocation41_spill] sm:$0xff]  ;;  %v11672_v15 = vld [vmem:[#allocation42_spill] sm:$0xff] }
 0x794   :  { %5485 = vmatpush1.bf16.msra.mxu0 %v10356_v62  ;;  %5526 = vmatpush1.bf16.msra.mxu1 %v10358_v1  ;;  %v11673_v62 = vld [vmem:[#allocation43_spill] sm:$0xff]  ;;  %v11674_v1 = vld [vmem:[#allocation44_spill] sm:$0xff] }
 0x795   :  { %5486 = vmatprep.subr.bf16.mxu0 %v10362_v20  ;;  %5527 = vmatprep.subr.bf16.mxu1 %v10364_v24  ;;  %v11675_v20 = vld [vmem:[#allocation45_spill] sm:$0xff]  ;;  %v11676_v24 = vld [vmem:[#allocation46_spill] sm:$0xff] }
 0x798   :  { %5487 = vmatpush1.bf16.msra.mxu0 %v10368_v58  ;;  %5528 = vmatpush1.bf16.msra.mxu1 %v10370_v59  ;;  %v11677_v58 = vld [vmem:[#allocation47_spill] sm:$0xff]  ;;  %v11678_v59 = vld [vmem:[#allocation48_spill] sm:$0xff] }
 0x799   :  { %5488 = vmatprep.subr.bf16.mxu0 %v10374_v23  ;;  %5529 = vmatprep.subr.bf16.mxu1 %v10376_v28  ;;  %v11679_v23 = vld [vmem:[#allocation49_spill] sm:$0xff]  ;;  %v11680_v28 = vld [vmem:[#allocation50_spill] sm:$0xff] }
 0x79c   :  { %5489 = vmatpush1.bf16.msra.mxu0 %v10380_v31  ;;  %5530 = vmatpush1.bf16.msra.mxu1 %v10382_v32  ;;  %v11681_v31 = vld [vmem:[#allocation51_spill] sm:$0xff]  ;;  %v11682_v32 = vld [vmem:[#allocation52_spill] sm:$0xff] }
 0x79d   :  { %5490 = vmatprep.subr.bf16.mxu0 %v10386_v63  ;;  %5531 = vmatprep.subr.bf16.mxu1 %v10388_v27  ;;  %v11683_v63 = vld [vmem:[#allocation53_spill] sm:$0xff]  ;;  %v11684_v27 = vld [vmem:[#allocation54_spill] sm:$0xff] }
 0x7a0   :  { %5491 = vmatpush1.bf16.msra.mxu0 %v10392_v18  ;;  %5532 = vmatpush1.bf16.msra.mxu1 %v10394_v52  ;;  %v11685_v18 = vld [vmem:[#allocation55_spill] sm:$0xff]  ;;  %v11686_v52 = vld [vmem:[#allocation56_spill] sm:$0xff] }
 0x7a1   :  { %5492 = vmatprep.subr.bf16.mxu0 %v10398_v14  ;;  %5533 = vmatprep.subr.bf16.mxu1 %v10400_v26  ;;  %v11687_v14 = vld [vmem:[#allocation57_spill] sm:$0xff]  ;;  %v11688_v26 = vld [vmem:[#allocation58_spill] sm:$0xff] }
 0x7a4   :  { %5493 = vmatpush1.bf16.msra.mxu0 %v10404_v5  ;;  %5534 = vmatpush1.bf16.msra.mxu1 %v10406_v17  ;;  %v8745_v5 = vpack.c.bf16 %v10734_v46, %v10734_v46  ;;  %v11689_v17 = vld [vmem:[#allocation59_spill] sm:$0xff]  ;;  %v11717_v46 = vld [vmem:[#allocation86_spill] sm:$0xff] }
 0x7a5   :  { %5494 = vmatprep.subr.bf16.mxu0 %v10410_v9  ;;  %5535 = vmatprep.subr.bf16.mxu1 %v10412_v29  ;;  %v11690_v9 = vld [vmem:[#allocation60_spill] sm:$0xff]  ;;  %v11691_v29 = vld [vmem:[#allocation61_spill] sm:$0xff] }
 0x7a8   :  { %5495 = vmatpush1.bf16.msra.mxu0 %v10416_v45  ;;  %5536 = vmatpush1.bf16.msra.mxu1 %v10418_v37  ;;  %v11692_v45 = vld [vmem:[#allocation62_spill] sm:$0xff]  ;;  %v11693_v37 = vld [vmem:[#allocation63_spill] sm:$0xff] }
 0x7a9   :  { %5496 = vmatprep.subr.bf16.mxu0 %v10422_v49  ;;  %5537 = vmatprep.subr.bf16.mxu1 %v10424_v55  ;;  %v11694_v49 = vld [vmem:[#allocation64_spill] sm:$0xff]  ;;  %v11695_v55 = vmov 0  }
 0x7ac   :  { %5497 = vmatpush2.bf16.msra.mxu0 %v10428_v21  ;;  %5538 = vmatpush2.bf16.msra.mxu1 %v10430_v22  ;;  %v11696_v21 = vld [vmem:[#allocation65_spill] sm:$0xff]  ;;  %v11697_v22 = vld [vmem:[#allocation66_spill] sm:$0xff] }
 0x7ad   :  { %5498 = vmatprep.subr.bf16.mxu0 %v10434_v34  ;;  %5539 = vmatprep.subr.bf16.mxu1 %v10436_v53  ;;  %v11698_v34 = vld [vmem:[#allocation67_spill] sm:$0xff]  ;;  %v11699_v53 = vld [vmem:[#allocation68_spill] sm:$0xff] }
 0x7b0   :  { %5499 = vmatpush2.bf16.msra.mxu0 %v10440_v11  ;;  %5540 = vmatpush2.bf16.msra.mxu1 %v10442_v0  ;;  %v11700_v11 = vld [vmem:[#allocation69_spill] sm:$0xff]  ;;  %v11701_v0 = vld [vmem:[#allocation70_spill] sm:$0xff] }
 0x7b1   :  { %5500 = vmatprep.subr.bf16.mxu0 %v11665_v36  ;;  %5541 = vmatprep.subr.bf16.mxu1 %v11666_v39  ;;  %v10838_v36 = vld [vmem:[#allocation6 + $0xe4] ss:$16 sps:$4 sm:$0xff]   ;;  %v10840_v39 = vld [vmem:[#allocation6 + $0xec] ss:$16 sps:$4 sm:$0xff]  }
 0x7b4   :  { %5501 = vmatpush2.bf16.msra.mxu0 %v11667_v44  ;;  %5542 = vmatpush2.bf16.msra.mxu1 %v11668_v47 }
 0x7b5   :  { %5502 = vmatprep.subr.bf16.mxu0 %v11669_v4  ;;  %5543 = vmatprep.subr.bf16.mxu1 %v11670_v2  ;;  %v11722_v4 = vld [vmem:[#allocation31_spill] sm:$0xff] }
 0x7b8   :  { %5503 = vmatpush2.bf16.msra.mxu0 %v11671_v3  ;;  %5544 = vmatpush2.bf16.msra.mxu1 %v11672_v15  ;;  %v11723_v3 = vld [vmem:[#allocation32_spill] sm:$0xff] }
 0x7b9   :  { %5504 = vmatprep.subr.bf16.mxu0 %v11673_v62  ;;  %5545 = vmatprep.subr.bf16.mxu1 %v11674_v1 }
 0x7bc   :  { %5505 = vmatpush2.bf16.msra.mxu0 %v11675_v20  ;;  %5546 = vmatpush2.bf16.msra.mxu1 %v11676_v24  ;;  %v11724_v24 = vld [vmem:[#allocation33_spill] sm:$0xff] }
 0x7bd   :  { %5506 = vmatprep.subr.bf16.mxu0 %v11677_v58  ;;  %5547 = vmatprep.subr.bf16.mxu1 %v11678_v59  ;;  %v11725_v59 = vld [vmem:[#allocation34_spill] sm:$0xff] }
 0x7c0   :  { %5507 = vmatpush2.bf16.msra.mxu0 %v11679_v23  ;;  %5548 = vmatpush2.bf16.msra.mxu1 %v11680_v28 }
 0x7c1   :  { %5508 = vmatprep.subr.bf16.mxu0 %v11681_v31  ;;  %5549 = vmatprep.subr.bf16.mxu1 %v11682_v32 }
 0x7c4   :  { %5509 = vmatpush2.bf16.msra.mxu0 %v11683_v63  ;;  %5550 = vmatpush2.bf16.msra.mxu1 %v11684_v27 }
 0x7c5   :  { %5510 = vmatprep.subr.bf16.mxu0 %v11685_v18  ;;  %5551 = vmatprep.subr.bf16.mxu1 %v11686_v52 }
 0x7c8   :  { %5511 = vmatpush2.bf16.msra.mxu0 %v11687_v14  ;;  %5552 = vmatpush2.bf16.msra.mxu1 %v11688_v26 }
 0x7c9   :  { %5794 = vmatprep.subr.bf16.mxu0 %v11689_v17  ;;  %5835 = vmatprep.subr.bf16.mxu1 %v11690_v9 }
 0x7cb   :  { %5513 = vmatmul.mubr.bf16.vlgmr.msra.gmra.mxu0 %v8745_v5  ;;  %5554 = vmatmul.mubr.bf16.vlgmr.msra.gmra.mxu1 %v8745_v5 }
 0x7cc   :  { %5795 = vmatpush1.bf16.msra.mxu0 %v11691_v29  ;;  %5836 = vmatpush1.bf16.msra.mxu1 %v11692_v45 }
 0x7cd   :  { %5796 = vmatprep.subr.bf16.mxu0 %v11693_v37  ;;  %5837 = vmatprep.subr.bf16.mxu1 %v11694_v49 }
 0x7ce   :  { %5826 = vmatprep.mubr.bf16.mxu0 %v11695_v55  ;;  %5867 = vmatprep.mubr.bf16.mxu1 %v11695_v55 }
 0x7d0   :  { %5797 = vmatpush1.bf16.msra.mxu0 %v11696_v21  ;;  %5838 = vmatpush1.bf16.msra.mxu1 %v11697_v22 }
 0x7d1   :  { %5798 = vmatprep.subr.bf16.mxu0 %v11698_v34  ;;  %5839 = vmatprep.subr.bf16.mxu1 %v11699_v53 }
 0x7d4   :  { %5799 = vmatpush1.bf16.msra.mxu0 %v11700_v11  ;;  %5840 = vmatpush1.bf16.msra.mxu1 %v11701_v0 }
 0x7d5   :  { %5800 = vmatprep.subr.bf16.mxu0 %v11702_v38  ;;  %5841 = vmatprep.subr.bf16.mxu1 %v11703_v6 }
 0x7d8   :  { %5801 = vmatpush1.bf16.msra.mxu0 %v11704_v48  ;;  %5842 = vmatpush1.bf16.msra.mxu1 %v11705_v60 }
 0x7d9   :  { %5802 = vmatprep.subr.bf16.mxu0 %v11706_v57  ;;  %5843 = vmatprep.subr.bf16.mxu1 %v11707_v42 }
 0x7dc   :  { %5803 = vmatpush1.bf16.msra.mxu0 %v11708_v19  ;;  %5844 = vmatpush1.bf16.msra.mxu1 %v11709_v56 }
 0x7dd   :  { %5804 = vmatprep.subr.bf16.mxu0 %v11710_v43  ;;  %5845 = vmatprep.subr.bf16.mxu1 %v11711_v54 }
 0x7e0   :  { %5805 = vmatpush1.bf16.msra.mxu0 %v11712_v8  ;;  %5846 = vmatpush1.bf16.msra.mxu1 %v11713_v40 }
 0x7e1   :  { %5806 = vmatprep.subr.bf16.mxu0 %v11714_v7  ;;  %5847 = vmatprep.subr.bf16.mxu1 %v11715_v13 }
 0x7e4   :  { %5807 = vmatpush1.bf16.msra.mxu0 %v11716_v51  ;;  %5848 = vmatpush1.bf16.msra.mxu1 %v11717_v46 }
 0x7e5   :  { %5808 = vmatprep.subr.bf16.mxu0 %v11718_v16  ;;  %5849 = vmatprep.subr.bf16.mxu1 %v11719_v41 }
 0x7e8   :  { %5809 = vmatpush1.bf16.msra.mxu0 %v11720_v35  ;;  %5850 = vmatpush1.bf16.msra.mxu1 %v11721_v61 }
 0x7e9   :  { %6298 = vmatprep.subr.bf16.mxu0 %v10838_v36  ;;  %6339 = vmatprep.subr.bf16.mxu1 %v10840_v39 }
 0x84b   :  { %v5010_v44 = vpop.f32.mrf.mxu0  ;;  %v5051_v47 = vpop.f32.mrf.mxu1 }
 0x84c   :  { %v5058_v2 = vadd.f32 %v5010_v44, %v11722_v4  ;;  %v5060_v15 = vadd.f32 %v5051_v47, %v11723_v3 }
 0x84d   :  { %v5012_v62 = vpop.f32.mrf.mxu0  ;;  %v5053_v1 = vpop.f32.mrf.mxu1 }
 0x84e   :  { %v7587_v20 = vmul.f32 -1.442695, %v5058_v2  ;;  %v5059_v58 = vadd.f32 %v5012_v62, %v11724_v24  ;;  %v5061_v23 = vadd.f32 %v5053_v1, %v11725_v59  ;;  %v10866_v1 = vld [vmem:[#allocation6 + $0xe0] ss:$16 sps:$4 sm:$0xff]   ;;  %v10872_v59 = vld [vmem:[#allocation6 + $0xcc] ss:$16 sps:$4 sm:$0xff]  }
 0x84f   :  { %v5014_v28 = vpop.f32.mrf.mxu0  ;;  %v5055_v31 = vpop.f32.mrf.mxu1 }
 0x850   :  { %8656 = vpow2.f32 %v7587_v20  ;;  %v7588_v32 = vmul.f32 -1.442695, %v5059_v58  ;;  %v7589_v57 = vmul.f32 -1.442695, %v5061_v23  ;;  %v10868_v20 = vld [vmem:[#allocation6 + $0xe8] ss:$16 sps:$4 sm:$0xff]  }
 0x851   :  { %v5015_v63 = vpop.f32.mrf.mxu0  ;;  %v5056_v27 = vpop.f32.mrf.mxu1  ;;  %v10870_v58 = vld [vmem:[#allocation6 + $0xc4] ss:$16 sps:$4 sm:$0xff]   ;;  %v10876_v28 = vld [vmem:[#allocation6 + $0xc0] ss:$16 sps:$4 sm:$0xff]   ;;  %v10878_v31 = vld [vmem:[#allocation6 + $0xc8] ss:$16 sps:$4 sm:$0xff]  }
 0x852   :  { %8658 = vpow2.f32 %v7588_v32  ;;  %v10880_v32 = vld [vmem:[#allocation6 + $0xa4] ss:$16 sps:$4 sm:$0xff]   ;;  %v10882_v63 = vld [vmem:[#allocation6 + $0xac] ss:$16 sps:$4 sm:$0xff]   ;;  %v10888_v27 = vld [vmem:[#allocation6 + $0xa0] ss:$16 sps:$4 sm:$0xff]  }
 0x853   :  { %8660 = vtanh.f32 %v5060_v15 }
 0x85d   :  { %v8657_v18 = vpop.eup %8656 }
 0x85e   :  { %v5066_v52 = vadd.f32 1.0, %v8657_v18  ;;  %v10890_v18 = vld [vmem:[#allocation6 + $0xa8] ss:$16 sps:$4 sm:$0xff]  }
 0x85f   :  { %v8659_v14 = vpop.eup %8658 }
 0x860   :  { %8662 = vrcp.f32 %v5066_v52  ;;  %v5072_v26 = vadd.f32 1.0, %v8659_v14  ;;  %v8661_v5 = vpop.eup %8660  ;;  %v10894_v52 = vld [vmem:[#allocation6 + $0x84] ss:$16 sps:$4 sm:$0xff]   ;;  %v10896_v14 = vld [vmem:[#allocation6 + $0x8c] ss:$16 sps:$4 sm:$0xff]  }
 0x862   :  { %8664 = vrcp.f32 %v5072_v26  ;;  %v10900_v26 = vld [vmem:[#allocation6 + $0x80] ss:$16 sps:$4 sm:$0xff]  }
 0x86d   :  { %v8663_v17 = vpop.eup %8662 }
 0x86e   :  { %v5083_v9 = vmul.f32 %v8663_v17, %v8661_v5  ;;  %v10902_v5 = vld [vmem:[#allocation6 + $0x88] ss:$16 sps:$4 sm:$0xff]   ;;  %v10906_v17 = vld [vmem:[#allocation6 + $0x64] ss:$16 sps:$4 sm:$0xff]  }
 0x86f   :  { %v8665_v29 = vpop.eup %8664 }
 0x870   :  { %v5082_v45 = vmul.f32 %v8665_v29, %v10723_v25  ;;  %v10912_v29 = vld [vmem:[#allocation6 + $0x60] ss:$16 sps:$4 sm:$0xff]  }
 0x872   :  { %v10849_v37 = vadd.f32 %v5083_v9, %v5082_v45  ;;  %v10908_v9 = vld [vmem:[#allocation6 + $0x6c] ss:$16 sps:$4 sm:$0xff]   ;;  %v10914_v45 = vld [vmem:[#allocation6 + $0x68] ss:$16 sps:$4 sm:$0xff]  }
 0x874   :  { %11726 = vst [vmem:[#allocation15_spill] sm:$0xff] %v10849_v37 }
 0x88b   :  { %v5514_v49 = vpop.f32.mrf.mxu0  ;;  %v5555_v55 = vpop.f32.mrf.mxu1 }
 0x88c   :  { %v5515_v21 = vadd.f32 %v5514_v49, %v11483_v12  ;;  %v5556_v56 = vadd.f32 %v5555_v55, %v9660_v30  ;;  %v10918_v49 = vld [vmem:[#allocation6 + $0x44] ss:$16 sps:$4 sm:$0xff]   ;;  %v10920_v55 = vld [vmem:[#allocation6 + $0x4c] ss:$16 sps:$4 sm:$0xff]   ;;  %v11032_v30 = vld [vmem:[#allocation6 + $0x120] ss:$16 sps:$4 sm:$0xff]  }
 0x88d   :  { %v5516_v22 = vpop.f32.mrf.mxu0  ;;  %v5557_v34 = vpop.f32.mrf.mxu1  ;;  %v11040_v12 = vld [vmem:[#allocation6 + $0x10c] ss:$16 sps:$4 sm:$0xff]  }
 0x88e   :  { %v7656_v53 = vmul.f32 -1.442695, %v5515_v21  ;;  %v5517_v11 = vadd.f32 %v5516_v22, %v9649_v33  ;;  %v5558_v25 = vadd.f32 %v5557_v34, %v9655_v10  ;;  %v10924_v21 = vld [vmem:[#allocation6 + $0x40] ss:$16 sps:$4 sm:$0xff]   ;;  %v10926_v22 = vld [vmem:[#allocation6 + $0x48] ss:$16 sps:$4 sm:$0xff]  }
 0x88f   :  { %v5518_v0 = vpop.f32.mrf.mxu0  ;;  %v5559_v38 = vpop.f32.mrf.mxu1  ;;  %v10930_v34 = vld [vmem:[#allocation6 + $0x24] ss:$16 sps:$4 sm:$0xff]   ;;  %v11034_v10 = vld [vmem:[#allocation6 + $0x128] ss:$16 sps:$4 sm:$0xff]  }
 0x890   :  { %8666 = vpow2.f32 %v7656_v53  ;;  %v7657_v6 = vmul.f32 -1.442695, %v5517_v11  ;;  %v7658_v42 = vmul.f32 -1.442695, %v5558_v25  ;;  %v10932_v53 = vld [vmem:[#allocation6 + $0x2c] ss:$16 sps:$4 sm:$0xff]  }
 0x891   :  { %v5519_v48 = vpop.f32.mrf.mxu0  ;;  %v5560_v60 = vpop.f32.mrf.mxu1  ;;  %v10936_v11 = vld [vmem:[#allocation6 + $0x20] ss:$16 sps:$4 sm:$0xff]   ;;  %v10938_v0 = vld [vmem:[#allocation6 + $0x28] ss:$16 sps:$4 sm:$0xff]   ;;  %v10942_v38 = vld [vmem:[#allocation6 + $0x4] ss:$16 sps:$4 sm:$0xff]  }
 0x892   :  { %8668 = vpow2.f32 %v7657_v6  ;;  %v10944_v6 = vld [vmem:[#allocation6 + $0xc] ss:$16 sps:$4 sm:$0xff]   ;;  %v10948_v48 = vld [vmem:[#allocation6] ss:$16 sps:$4 sm:$0xff]   ;;  %v10950_v60 = vld [vmem:[#allocation6 + $0x8] ss:$16 sps:$4 sm:$0xff]  }
 0x893   :  { %8670 = vpow2.f32 %v7589_v57  ;;  %v10954_v25 = vld [vmem:[#allocation6 + $0x1e4] ss:$16 sps:$4 sm:$0xff]   ;;  %v10956_v57 = vld [vmem:[#allocation6 + $0x1ec] ss:$16 sps:$4 sm:$0xff]  }
 0x894   :  { %8672 = vpow2.f32 %v7658_v42  ;;  %v10960_v42 = vld [vmem:[#allocation6 + $0x1e0] ss:$16 sps:$4 sm:$0xff]   ;;  %v11038_v33 = vld [vmem:[#allocation6 + $0x104] ss:$16 sps:$4 sm:$0xff]  }
 0x89d   :  { %v8667_v19 = vpop.eup %8666 }
 0x89e   :  { %v5566_v43 = vadd.f32 1.0, %v8667_v19  ;;  %v10962_v19 = vld [vmem:[#allocation6 + $0x1e8] ss:$16 sps:$4 sm:$0xff]  }
 0x89f   :  { %v8669_v54 = vpop.eup %8668 }
 0x8a0   :  { %8674 = vrcp.f32 %v5566_v43  ;;  %v5572_v8 = vadd.f32 1.0, %v8669_v54  ;;  %v8671_v40 = vpop.eup %8670  ;;  %v10968_v43 = vld [vmem:[#allocation6 + $0x1cc] ss:$16 sps:$4 sm:$0xff]   ;;  %v10972_v54 = vld [vmem:[#allocation6 + $0x1c0] ss:$16 sps:$4 sm:$0xff]  }
 0x8a1   :  { %8676 = vtanh.f32 %v5556_v56  ;;  %v8673_v7 = vpop.eup %8672  ;;  %v5079_v51 = vadd.f32 1.0, %v8671_v40  ;;  %v10966_v56 = vld [vmem:[#allocation6 + $0x1c4] ss:$16 sps:$4 sm:$0xff]  }
 0x8a2   :  { %8678 = vrcp.f32 %v5572_v8  ;;  %v5579_v41 = vadd.f32 1.0, %v8673_v7  ;;  %v10974_v8 = vld [vmem:[#allocation6 + $0x1c8] ss:$16 sps:$4 sm:$0xff]   ;;  %v10978_v40 = vld [vmem:[#allocation6 + $0x1a4] ss:$16 sps:$4 sm:$0xff]  }
 0x8a3   :  { %8680 = vrcp.f32 %v5079_v51  ;;  %v10980_v7 = vld [vmem:[#allocation6 + $0x1ac] ss:$16 sps:$4 sm:$0xff]   ;;  %v10986_v51 = vld [vmem:[#allocation6 + $0x1a8] ss:$16 sps:$4 sm:$0xff]  }
 0x8a4   :  { %8682 = vtanh.f32 %v10849_v37  ;;  %v11044_v37 = vld [vmem:[#allocation6 + $0x100] ss:$16 sps:$4 sm:$0xff]  }
 0x8a5   :  { %8684 = vrcp.f32 %v5579_v41  ;;  %v10996_v41 = vld [vmem:[#allocation6 + $0x180] ss:$16 sps:$4 sm:$0xff]  }
 0x8ad   :  { %v8675_v13 = vpop.eup %8674 }
 0x8ae   :  { %v8677_v46 = vpop.eup %8676 }
 0x8af   :  { %v8679_v16 = vpop.eup %8678  ;;  %v5583_v35 = vmul.f32 %v8677_v46, %v8675_v13  ;;  %v10984_v13 = vld [vmem:[#allocation6 + $0x1a0] ss:$16 sps:$4 sm:$0xff]   ;;  %v10990_v46 = vld [vmem:[#allocation6 + $0x184] ss:$16 sps:$4 sm:$0xff]  }
 0x8b0   :  { %v5582_v61 = vmul.f32 %v8679_v16, %v10731_v50  ;;  %v8681_v47 = vpop.eup %8680  ;;  %v10992_v16 = vld [vmem:[#allocation6 + $0x18c] ss:$16 sps:$4 sm:$0xff]  }
 0x8b1   :  { %v8683_v4 = vpop.eup %8682 }
 0x8b2   :  { %v10857_v44 = vadd.f32 %v5583_v35, %v5582_v61  ;;  %v8685_v2 = vpop.eup %8684  ;;  %v10860_v15 = vmul.f32 %v8683_v4, %v8681_v47  ;;  %v10998_v35 = vld [vmem:[#allocation6 + $0x188] ss:$16 sps:$4 sm:$0xff]   ;;  %v11002_v61 = vld [vmem:[#allocation6 + $0x164] ss:$16 sps:$4 sm:$0xff]   ;;  %v11004_v47 = vld [vmem:[#allocation6 + $0x16c] ss:$16 sps:$4 sm:$0xff]  }
 0x8b3   :  { %v11008_v4 = vld [vmem:[#allocation6 + $0x160] ss:$16 sps:$4 sm:$0xff]  }
 0x8b4   :  { %11727 = vst [vmem:[#allocation18_spill] sm:$0xff] %v10857_v44  ;;  %8686 = vtanh.f32 %v10857_v44  ;;  %v11028_v44 = vld [vmem:[#allocation6 + $0x12c] ss:$16 sps:$4 sm:$0xff]  }
 0x8b5   :  { %11729 = vst [vmem:[#allocation17_spill] sm:$0xff] %v11028_v44 }
 0x8c1   :  { %v8687_v3 = vpop.eup %8686 }
 0x8c2   :  { %v5586_v62 = vmul.f32 %v8687_v3, %v8685_v2  ;;  %v11010_v2 = vld [vmem:[#allocation6 + $0x168] ss:$16 sps:$4 sm:$0xff]   ;;  %v11014_v3 = vld [vmem:[#allocation6 + $0x144] ss:$16 sps:$4 sm:$0xff]  }
 0x8c4   :  { %7659 = vst [vmem:[%s11152_s8 + $0x28] sm:$0xff] %v5586_v62  ;;  %v7867_v50 = vpack.c.bf16 %v5586_v62, %v10860_v15  ;;  %v8746_v23 = vpack.c.bf16 %v5586_v62, %v5586_v62  ;;  %v11016_v62 = vld [vmem:[#allocation6 + $0x14c] ss:$16 sps:$4 sm:$0xff]  }
 0x8c6   :  { %7868 = vst [vmem:[#allocation3] sm:$0xff] %v7867_v50   ;;  %v11020_v50 = vld [vmem:[#allocation6 + $0x140] ss:$16 sps:$4 sm:$0xff]  }
 0x8c7   :  { %11728 = vst [vmem:[#allocation16_spill] sm:$0xff] %v11020_v50 }
 0x8cd   :  { %v5594_v24 = vld [vmem:[#allocation3] sm:$0xf] }
 0x8ce   :  { %5827 = vmatmul.mubr.bf16.vlgmr.msra.gmra.mxu0 %v5594_v24  ;;  %5868 = vmatmul.mubr.bf16.vlgmr.msra.gmra.mxu1 %v5594_v24  ;;  %v11022_v24 = vld [vmem:[#allocation6 + $0x148] ss:$16 sps:$4 sm:$0xff]  }
 0x8cf   :  { %6299 = vmatpush1.bf16.msra.mxu0 %v10866_v1  ;;  %6340 = vmatpush1.bf16.msra.mxu1 %v10868_v20 }
 0x8d0   :  { %6330 = vmatprep.mubr.bf16.mxu0 %v8746_v23  ;;  %6371 = vmatprep.mubr.bf16.mxu1 %v8746_v23  ;;  %v11026_v23 = vld [vmem:[#allocation6 + $0x124] ss:$16 sps:$4 sm:$0xff]  }
 0x8d1   :  { %6300 = vmatprep.subr.bf16.mxu0 %v10870_v58  ;;  %6341 = vmatprep.subr.bf16.mxu1 %v10872_v59 }
 0x8d3   :  { %6301 = vmatpush1.bf16.msra.mxu0 %v10876_v28  ;;  %6342 = vmatpush1.bf16.msra.mxu1 %v10878_v31 }
 0x8d4   :  { %6302 = vmatprep.subr.bf16.mxu0 %v10880_v32  ;;  %6343 = vmatprep.subr.bf16.mxu1 %v10882_v63 }
 0x8d7   :  { %6303 = vmatpush1.bf16.msra.mxu0 %v10888_v27  ;;  %6344 = vmatpush1.bf16.msra.mxu1 %v10890_v18 }
 0x8d8   :  { %6304 = vmatprep.subr.bf16.mxu0 %v10894_v52  ;;  %6345 = vmatprep.subr.bf16.mxu1 %v10896_v14 }
 0x8db   :  { %6305 = vmatpush1.bf16.msra.mxu0 %v10900_v26  ;;  %6346 = vmatpush1.bf16.msra.mxu1 %v10902_v5 }
 0x8dc   :  { %6306 = vmatprep.subr.bf16.mxu0 %v10906_v17  ;;  %6347 = vmatprep.subr.bf16.mxu1 %v10908_v9 }
 0x8df   :  { %6307 = vmatpush1.bf16.msra.mxu0 %v10912_v29  ;;  %6348 = vmatpush1.bf16.msra.mxu1 %v10914_v45 }
 0x8e0   :  { %6308 = vmatprep.subr.bf16.mxu0 %v10918_v49  ;;  %6349 = vmatprep.subr.bf16.mxu1 %v10920_v55 }
 0x8e3   :  { %6309 = vmatpush1.bf16.msra.mxu0 %v10924_v21  ;;  %6350 = vmatpush1.bf16.msra.mxu1 %v10926_v22 }
 0x8e4   :  { %6310 = vmatprep.subr.bf16.mxu0 %v10930_v34  ;;  %6351 = vmatprep.subr.bf16.mxu1 %v10932_v53 }
 0x8e7   :  { %6311 = vmatpush1.bf16.msra.mxu0 %v10936_v11  ;;  %6352 = vmatpush1.bf16.msra.mxu1 %v10938_v0 }
 0x8e8   :  { %6312 = vmatprep.subr.bf16.mxu0 %v10942_v38  ;;  %6353 = vmatprep.subr.bf16.mxu1 %v10944_v6 }
 0x8eb   :  { %6313 = vmatpush1.bf16.msra.mxu0 %v10948_v48  ;;  %6354 = vmatpush1.bf16.msra.mxu1 %v10950_v60 }
 0x8ec   :  { %6314 = vmatprep.subr.bf16.mxu0 %v10954_v25  ;;  %6355 = vmatprep.subr.bf16.mxu1 %v10956_v57 }
 0x8ef   :  { %6315 = vmatpush2.bf16.msra.mxu0 %v10960_v42  ;;  %6356 = vmatpush2.bf16.msra.mxu1 %v10962_v19 }
 0x8f0   :  { %6316 = vmatprep.subr.bf16.mxu0 %v10966_v56  ;;  %6357 = vmatprep.subr.bf16.mxu1 %v10968_v43 }
 0x8f3   :  { %6317 = vmatpush2.bf16.msra.mxu0 %v10972_v54  ;;  %6358 = vmatpush2.bf16.msra.mxu1 %v10974_v8 }
 0x8f4   :  { %6318 = vmatprep.subr.bf16.mxu0 %v10978_v40  ;;  %6359 = vmatprep.subr.bf16.mxu1 %v10980_v7 }
 0x8f7   :  { %6319 = vmatpush2.bf16.msra.mxu0 %v10984_v13  ;;  %6360 = vmatpush2.bf16.msra.mxu1 %v10986_v51 }
 0x8f8   :  { %6320 = vmatprep.subr.bf16.mxu0 %v10990_v46  ;;  %6361 = vmatprep.subr.bf16.mxu1 %v10992_v16 }
 0x8fb   :  { %6321 = vmatpush2.bf16.msra.mxu0 %v10996_v41  ;;  %6362 = vmatpush2.bf16.msra.mxu1 %v10998_v35 }
 0x8fc   :  { %6322 = vmatprep.subr.bf16.mxu0 %v11002_v61  ;;  %6363 = vmatprep.subr.bf16.mxu1 %v11004_v47 }
 0x8ff   :  { %6323 = vmatpush2.bf16.msra.mxu0 %v11008_v4  ;;  %6364 = vmatpush2.bf16.msra.mxu1 %v11010_v2 }
 0x900   :  { %6324 = vmatprep.subr.bf16.mxu0 %v11014_v3  ;;  %6365 = vmatprep.subr.bf16.mxu1 %v11016_v62 }
 0x903   :  { %6325 = vmatpush2.bf16.msra.mxu0 %v11020_v50  ;;  %6366 = vmatpush2.bf16.msra.mxu1 %v11022_v24  ;;  %v11046_v50 = vld [vmem:[#allocation6 + $0x108] ss:$16 sps:$4 sm:$0xff]  }
 0x904   :  { %6326 = vmatprep.subr.bf16.mxu0 %v11026_v23  ;;  %6367 = vmatprep.subr.bf16.mxu1 %v11028_v44  ;;  %v8747_v44 = vpack.c.bf16 %v10860_v15, %v10860_v15 }
 0x907   :  { %6327 = vmatpush2.bf16.msra.mxu0 %v11032_v30  ;;  %6368 = vmatpush2.bf16.msra.mxu1 %v11034_v10 }
 0x908   :  { %6328 = vmatprep.subr.bf16.mxu0 %v11038_v33  ;;  %6369 = vmatprep.subr.bf16.mxu1 %v11040_v12 }
 0x90b   :  { %6329 = vmatpush2.bf16.msra.mxu0 %v11044_v37  ;;  %6370 = vmatpush2.bf16.msra.mxu1 %v11046_v50 }
 0x90c   :  { %6804 = vmatprep.subr.bf16.mxu0 %v10838_v36  ;;  %6845 = vmatprep.subr.bf16.mxu1 %v10840_v39  ;;  %v11730_v36 = vld [vmem:[#allocation16_spill] sm:$0xff]  ;;  %v11731_v39 = vld [vmem:[#allocation17_spill] sm:$0xff] }
 0x90e   :  { %6331 = vmatmul.mubr.bf16.vlgmr.msra.gmra.mxu0 %v8747_v44  ;;  %6372 = vmatmul.mubr.bf16.vlgmr.msra.gmra.mxu1 %v8747_v44 }
 0x90f   :  { %6805 = vmatpush1.bf16.msra.mxu0 %v10866_v1  ;;  %6846 = vmatpush1.bf16.msra.mxu1 %v10868_v20  ;;  %v11732_v1 = vld [vmem:[#allocation35_spill] sm:$0xff] }
 0x910   :  { %6806 = vmatprep.subr.bf16.mxu0 %v10870_v58  ;;  %6847 = vmatprep.subr.bf16.mxu1 %v10872_v59 }
 0x913   :  { %6807 = vmatpush1.bf16.msra.mxu0 %v10876_v28  ;;  %6848 = vmatpush1.bf16.msra.mxu1 %v10878_v31  ;;  %v11733_v31 = vld [vmem:[#allocation37_spill] sm:$0xff] }
 0x914   :  { %6808 = vmatprep.subr.bf16.mxu0 %v10880_v32  ;;  %6849 = vmatprep.subr.bf16.mxu1 %v10882_v63 }
 0x917   :  { %6809 = vmatpush1.bf16.msra.mxu0 %v10888_v27  ;;  %6850 = vmatpush1.bf16.msra.mxu1 %v10890_v18 }
 0x918   :  { %6810 = vmatprep.subr.bf16.mxu0 %v10894_v52  ;;  %6851 = vmatprep.subr.bf16.mxu1 %v10896_v14 }
 0x91b   :  { %6811 = vmatpush1.bf16.msra.mxu0 %v10900_v26  ;;  %6852 = vmatpush1.bf16.msra.mxu1 %v10902_v5 }
 0x91c   :  { %6812 = vmatprep.subr.bf16.mxu0 %v10906_v17  ;;  %6853 = vmatprep.subr.bf16.mxu1 %v10908_v9 }
 0x91f   :  { %6813 = vmatpush1.bf16.msra.mxu0 %v10912_v29  ;;  %6854 = vmatpush1.bf16.msra.mxu1 %v10914_v45 }
 0x920   :  { %6814 = vmatprep.subr.bf16.mxu0 %v10918_v49  ;;  %6855 = vmatprep.subr.bf16.mxu1 %v10920_v55 }
 0x923   :  { %6815 = vmatpush1.bf16.msra.mxu0 %v10924_v21  ;;  %6856 = vmatpush1.bf16.msra.mxu1 %v10926_v22 }
 0x924   :  { %6816 = vmatprep.subr.bf16.mxu0 %v10930_v34  ;;  %6857 = vmatprep.subr.bf16.mxu1 %v10932_v53  ;;  %v11736_v34 = vld [vmem:[#allocation15_spill] sm:$0xff] }
 0x927   :  { %6817 = vmatpush1.bf16.msra.mxu0 %v10936_v11  ;;  %6858 = vmatpush1.bf16.msra.mxu1 %v10938_v0 }
 0x928   :  { %6818 = vmatprep.subr.bf16.mxu0 %v10942_v38  ;;  %6859 = vmatprep.subr.bf16.mxu1 %v10944_v6 }
 0x92b   :  { %6819 = vmatpush1.bf16.msra.mxu0 %v10948_v48  ;;  %6860 = vmatpush1.bf16.msra.mxu1 %v10950_v60 }
 0x92c   :  { %6820 = vmatprep.subr.bf16.mxu0 %v10954_v25  ;;  %6861 = vmatprep.subr.bf16.mxu1 %v10956_v57  ;;  %v11737_v25 = vld [vmem:[#allocation91_spill] sm:$0xff] }
 0x92f   :  { %6821 = vmatpush2.bf16.msra.mxu0 %v10960_v42  ;;  %6862 = vmatpush2.bf16.msra.mxu1 %v10962_v19 }
 0x930   :  { %6822 = vmatprep.subr.bf16.mxu0 %v10966_v56  ;;  %6863 = vmatprep.subr.bf16.mxu1 %v10968_v43  ;;  %v11738_v43 = vld [vmem:[#allocation92_spill] sm:$0xff] }
 0x933   :  { %6823 = vmatpush2.bf16.msra.mxu0 %v10972_v54  ;;  %6864 = vmatpush2.bf16.msra.mxu1 %v10974_v8 }
 0x934   :  { %6824 = vmatprep.subr.bf16.mxu0 %v10978_v40  ;;  %6865 = vmatprep.subr.bf16.mxu1 %v10980_v7 }
 0x937   :  { %6825 = vmatpush2.bf16.msra.mxu0 %v10984_v13  ;;  %6866 = vmatpush2.bf16.msra.mxu1 %v10986_v51 }
 0x938   :  { %6826 = vmatprep.subr.bf16.mxu0 %v10990_v46  ;;  %6867 = vmatprep.subr.bf16.mxu1 %v10992_v16  ;;  %v11739_v46 = vld [vmem:[#allocation93_spill] sm:$0xff] }
 0x93b   :  { %6827 = vmatpush2.bf16.msra.mxu0 %v10996_v41  ;;  %6868 = vmatpush2.bf16.msra.mxu1 %v10998_v35 }
 0x93c   :  { %6828 = vmatprep.subr.bf16.mxu0 %v11002_v61  ;;  %6869 = vmatprep.subr.bf16.mxu1 %v11004_v47  ;;  %v11740_v61 = vld [vmem:[#allocation94_spill] sm:$0xff] }
 0x93f   :  { %6829 = vmatpush2.bf16.msra.mxu0 %v11008_v4  ;;  %6870 = vmatpush2.bf16.msra.mxu1 %v11010_v2 }
 0x940   :  { %6830 = vmatprep.subr.bf16.mxu0 %v11014_v3  ;;  %6871 = vmatprep.subr.bf16.mxu1 %v11016_v62 }
 0x943   :  { %6831 = vmatpush2.bf16.msra.mxu0 %v11730_v36  ;;  %6872 = vmatpush2.bf16.msra.mxu1 %v11022_v24 }
 0x944   :  { %6832 = vmatprep.subr.bf16.mxu0 %v11026_v23  ;;  %6873 = vmatprep.subr.bf16.mxu1 %v11731_v39 }
 0x947   :  { %6833 = vmatpush2.bf16.msra.mxu0 %v11032_v30  ;;  %6874 = vmatpush2.bf16.msra.mxu1 %v11034_v10  ;;  %v11734_v30 = vld [vmem:[#allocation38_spill] sm:$0xff] }
 0x948   :  { %6834 = vmatprep.subr.bf16.mxu0 %v11038_v33  ;;  %6875 = vmatprep.subr.bf16.mxu1 %v11040_v12 }
 0x94b   :  { %6835 = vmatpush2.bf16.msra.mxu0 %v11044_v37  ;;  %6876 = vmatpush2.bf16.msra.mxu1 %v11046_v50  ;;  %v11735_v37 = vld [vmem:[#allocation36_spill] sm:$0xff] }
 0x98e   :  { %v5828_v44 = vpop.f32.mrf.mxu0  ;;  %v5869_v15 = vpop.f32.mrf.mxu1 }
 0x98f   :  { %v5876_v20 = vadd.f32 %v5828_v44, %v11732_v1  ;;  %v5878_v52 = vadd.f32 %v5869_v15, %v11735_v37  ;;  %v11741_v44 = vld [vmem:[#allocation18_spill] sm:$0xff] }
 0x990   :  { %v5830_v58 = vpop.f32.mrf.mxu0  ;;  %v5871_v59 = vpop.f32.mrf.mxu1 }
 0x991   :  { %v7692_v28 = vmul.f32 -1.442695, %v5876_v20  ;;  %v5877_v32 = vadd.f32 %v5830_v58, %v11733_v31  ;;  %v5879_v63 = vadd.f32 %v5871_v59, %v11734_v30 }
 0x992   :  { %v5832_v10 = vpop.f32.mrf.mxu0  ;;  %v5873_v27 = vpop.f32.mrf.mxu1 }
 0x993   :  { %8688 = vpow2.f32 %v7692_v28  ;;  %v7693_v33 = vmul.f32 -1.442695, %v5877_v32  ;;  %v7694_v14 = vmul.f32 -1.442695, %v5879_v63 }
 0x994   :  { %v5833_v12 = vpop.f32.mrf.mxu0  ;;  %v5874_v18 = vpop.f32.mrf.mxu1 }
 0x995   :  { %8690 = vpow2.f32 %v7693_v33 }
 0x996   :  { %8692 = vtanh.f32 %v5878_v52 }
 0x997   :  { %8694 = vpow2.f32 %v7694_v14 }
 0x9a0   :  { %v8689_v26 = vpop.eup %8688 }
 0x9a1   :  { %v5884_v5 = vadd.f32 1.0, %v8689_v26 }
 0x9a2   :  { %v8691_v17 = vpop.eup %8690 }
 0x9a3   :  { %8696 = vrcp.f32 %v5884_v5  ;;  %v5890_v9 = vadd.f32 1.0, %v8691_v17  ;;  %v8693_v29 = vpop.eup %8692 }
 0x9a4   :  { %v8695_v45 = vpop.eup %8694 }
 0x9a5   :  { %8698 = vrcp.f32 %v5890_v9  ;;  %v5897_v22 = vadd.f32 1.0, %v8695_v45 }
 0x9a7   :  { %8700 = vrcp.f32 %v5897_v22 }
 0x9b0   :  { %v8697_v49 = vpop.eup %8696 }
 0x9b1   :  { %v5901_v55 = vmul.f32 %v8697_v49, %v8693_v29 }
 0x9b2   :  { %v8699_v21 = vpop.eup %8698 }
 0x9b3   :  { %v5900_v53 = vmul.f32 %v8699_v21, %v11736_v34 }
 0x9b4   :  { %v8701_v0 = vpop.eup %8700 }
 0x9b5   :  { %v5902_v11 = vadd.f32 %v5901_v55, %v5900_v53 }
 0x9b7   :  { %8702 = vtanh.f32 %v5902_v11  ;;  %6926 = vst [vmem:[#allocation10] sm:$0xff] %v5902_v11 }
 0x9c4   :  { %v8703_v38 = vpop.eup %8702 }
 0x9c5   :  { %v5904_v6 = vmul.f32 %v8703_v38, %v8701_v0 }
 0x9c7   :  { %v8749_v32 = vpack.c.bf16 %v5904_v6, %v5904_v6 }
 0x9ce   :  { %v6332_v48 = vpop.f32.mrf.mxu0  ;;  %v6373_v60 = vpop.f32.mrf.mxu1 }
 0x9cf   :  { %v6333_v57 = vadd.f32 %v6332_v48, %v11737_v25  ;;  %v6374_v47 = vadd.f32 %v6373_v60, %v11740_v61 }
 0x9d0   :  { %v6334_v42 = vpop.f32.mrf.mxu0  ;;  %v6375_v19 = vpop.f32.mrf.mxu1 }
 0x9d1   :  { %v7761_v56 = vmul.f32 -1.442695, %v6333_v57  ;;  %v6335_v54 = vadd.f32 %v6334_v42, %v11738_v43  ;;  %v6376_v16 = vadd.f32 %v6375_v19, %v11739_v46 }
 0x9d2   :  { %v6336_v8 = vpop.f32.mrf.mxu0  ;;  %v6377_v40 = vpop.f32.mrf.mxu1 }
 0x9d3   :  { %8704 = vpow2.f32 %v7761_v56  ;;  %v7762_v7 = vmul.f32 -1.442695, %v6335_v54  ;;  %v7763_v41 = vmul.f32 -1.442695, %v6376_v16 }
 0x9d4   :  { %v6337_v13 = vpop.f32.mrf.mxu0  ;;  %v6378_v51 = vpop.f32.mrf.mxu1 }
 0x9d5   :  { %8706 = vpow2.f32 %v7762_v7 }
 0x9d6   :  { %8708 = vpow2.f32 %v7763_v41 }
 0x9e0   :  { %v8705_v35 = vpop.eup %8704 }
 0x9e1   :  { %v6384_v4 = vadd.f32 1.0, %v8705_v35 }
 0x9e2   :  { %v8707_v2 = vpop.eup %8706 }
 0x9e3   :  { %8710 = vrcp.f32 %v6384_v4  ;;  %v6390_v3 = vadd.f32 1.0, %v8707_v2  ;;  %v8709_v62 = vpop.eup %8708 }
 0x9e4   :  { %8712 = vtanh.f32 %v6374_v47  ;;  %v6397_v36 = vadd.f32 1.0, %v8709_v62 }
 0x9e5   :  { %8714 = vrcp.f32 %v6390_v3 }
 0x9e6   :  { %8716 = vrcp.f32 %v6397_v36 }
 0x9f0   :  { %v8711_v50 = vpop.eup %8710 }
 0x9f1   :  { %v8713_v24 = vpop.eup %8712 }
 0x9f2   :  { %v8715_v23 = vpop.eup %8714  ;;  %v6401_v39 = vmul.f32 %v8713_v24, %v8711_v50 }
 0x9f3   :  { %v6400_v15 = vmul.f32 %v8715_v23, %v11741_v44  ;;  %v8717_v20 = vpop.eup %8716 }
 0x9f5   :  { %v6402_v1 = vadd.f32 %v6401_v39, %v6400_v15 }
 0x9f7   :  { %8718 = vtanh.f32 %v6402_v1 }
 0xa04   :  { %v8719_v58 = vpop.eup %8718 }
 0xa05   :  { %v6404_v59 = vmul.f32 %v8719_v58, %v8717_v20 }
 0xa07   :  { %7764 = vst [vmem:[%s11152_s8 + $0x30] sm:$0xff] %v6404_v59  ;;  %v7872_v28 = vpack.c.bf16 %v6404_v59, %v5904_v6  ;;  %v8748_v31 = vpack.c.bf16 %v6404_v59, %v6404_v59 }
 0xa09   :  { %7873 = vst [vmem:[#allocation3] sm:$0xff] %v7872_v28   ;;  %6836 = vmatprep.mubr.bf16.mxu0 %v8748_v31  ;;  %6877 = vmatprep.mubr.bf16.mxu1 %v8748_v31 }
 0xa0a   :  { %6837 = vmatmul.mubr.bf16.vlgmr.msra.gmra.mxu0 %v8749_v32  ;;  %6878 = vmatmul.mubr.bf16.vlgmr.msra.gmra.mxu1 %v8749_v32 }
 0xaca   :  { %v6838_v30 = vpop.f32.mrf.mxu0  ;;  %v6879_v63 = vpop.f32.mrf.mxu1 }
 0xacb   :  { %v6839_v10 = vadd.f32 %v6838_v30, %v11737_v25  ;;  %v6880_v45 = vadd.f32 %v6879_v63, %v11740_v61 }
 0xacc   :  { %v6840_v27 = vpop.f32.mrf.mxu0  ;;  %v6881_v33 = vpop.f32.mrf.mxu1 }
 0xacd   :  { %v7831_v12 = vmul.f32 -1.442695, %v6839_v10  ;;  %v6841_v18 = vadd.f32 %v6840_v27, %v11738_v43  ;;  %v6882_v17 = vadd.f32 %v6881_v33, %v11739_v46 }
 0xace   :  { %v6842_v37 = vpop.f32.mrf.mxu0  ;;  %v6883_v52 = vpop.f32.mrf.mxu1 }
 0xacf   :  { %8720 = vpow2.f32 %v7831_v12  ;;  %v7832_v14 = vmul.f32 -1.442695, %v6841_v18  ;;  %v7833_v9 = vmul.f32 -1.442695, %v6882_v17 }
 0xad0   :  { %v6843_v26 = vpop.f32.mrf.mxu0  ;;  %v6884_v5 = vpop.f32.mrf.mxu1 }
 0xad1   :  { %8722 = vpow2.f32 %v7832_v14 }
 0xad2   :  { %8724 = vpow2.f32 %v7833_v9 }
 0xadc   :  { %v8721_v29 = vpop.eup %8720 }
 0xadd   :  { %v6890_v49 = vadd.f32 1.0, %v8721_v29 }
 0xade   :  { %v8723_v55 = vpop.eup %8722 }
 0xadf   :  { %8726 = vrcp.f32 %v6890_v49  ;;  %v6896_v21 = vadd.f32 1.0, %v8723_v55  ;;  %v8725_v22 = vpop.eup %8724 }
 0xae0   :  { %8728 = vtanh.f32 %v6880_v45  ;;  %v6903_v0 = vadd.f32 1.0, %v8725_v22 }
 0xae1   :  { %8730 = vrcp.f32 %v6896_v21 }
 0xae2   :  { %8732 = vrcp.f32 %v6903_v0 }
 0xaec   :  { %v8727_v34 = vpop.eup %8726 }
 0xaed   :  { %v8729_v53 = vpop.eup %8728 }
 0xaee   :  { %v8731_v11 = vpop.eup %8730  ;;  %v6907_v38 = vmul.f32 %v8729_v53, %v8727_v34 }
 0xaef   :  { %v6906_v6 = vmul.f32 %v8731_v11, %v6402_v1 }
 0xaf1   :  { %v6908_v48 = vadd.f32 %v6907_v38, %v6906_v6 }
 0xaf3   :  { %8734 = vtanh.f32 %v6908_v48  ;;  %6929 = vst [vmem:[#allocation10 + $0x8] sm:$0xff] %v6908_v48 }
 0xaf4   :  { %8781 = shalt.err (!%p8778_p9)
}
 0xaf5   :  { %s8821_s25 = smov 128   ;;  %s8822_s4 = smov 8   ;;  %v8733_v60 = vpop.eup %8732 }
 0xaf6   :  { %6955 = dma.vmem_to_hbm [thread:$0]  %s6950_s2, 256, %s11154_s10, [#allocation11], %s8821_s25, %s8821_s25, %s8822_s4  }
 0xaf7   :  { %s8823_s30 = smov [#allocation9]  }
 0xaf8   :  { %s6937_s11 = sshll.u32 %s8823_s30, 4  ;;  %s6938_s11 = int_to_ptr.vmem [resolvable:$true] %s6937_s11 }
 0xaf9   :  { %s8790_s12 = scalar_lea.vmem %s6938_s11, 256  ;;  %p8795_p11 = scmp.lt.s32.totalorder %s6938_s11, %s6938_s11 }
 0xafa   :  { %p8791_p10 = scmp.ne.s32.totalorder %s6938_s11, %s8790_s12  ;;  %p8796_p12 = scmp.lt.s32.totalorder %s8790_s12, %s8790_s12 }
 0xafc   :  { %p8797_p13 = por %p8796_p12, %p8795_p11 }
 0xafe   :  { %p8798_p0 = pnand %p8797_p13, %p8791_p10 }
 0xb00   :  { %v8735_v25 = vpop.eup %8734 }
 0xb01   :  { %v6910_v57 = vmul.f32 %v8735_v25, %v8733_v60 }
 0xb03   :  { %6911 = vst [vmem:[%s11152_s8 + $0x38] sm:$0xff] %v6910_v57  ;;  %v6913_v42 = vpack.c.bf16 %v6910_v57, %v6910_v57 }
 0xb05   :  { %6914 = vst [vmem:[#allocation3 + $0x4] sm:$0xf] %v6913_v42 }
 0xb0c   :  { %v7875_v19 = vld [vmem:[#allocation3] sm:$0xff]  }
 0xb0d   :  { %v7876_v56 = vunpack.c.l.bf16 %v7875_v19  ;;  %v7877_v43 = vunpack.c.h.bf16 %v7875_v19 }
 0xb0f   :  { %6920 = vst [vmem:[#allocation9] sm:$0xff] %v7876_v56  ;;  %6924 = vst [vmem:[#allocation9 + $0x8] sm:$0xff] %v7877_v43 }
 0xb10   :  { %8801 = shalt.err (!%p8798_p0)
}
 0xb11   :  { %6943 = dma.vmem_to_hbm [thread:$0]  %s6938_s11, 256, %s11153_s9, [#allocation8], %s8821_s25, %s8821_s25, %s8822_s4  }
 0xb12   :  { %8812 = dma.done.wait [#allocation8], 256  }
 0xb13   :  { %8813 = vsyncadd [#allocation8], 4294967040 }
 0xb14   :  { %8814 = dma.done.wait [#allocation11], 256  }
 0xb15   :  { %8815 = vsyncadd [#allocation11], 4294967040 }
 0xb16   :  { %6964 = vsyncpa [#allocation7], 1 }
 0xb17   :  { %6965 = vsyncpa [#allocation8], 1 }
 0xb18   :  { %6966 = vsyncpa [#allocation11], 1 }

</bundles_post_ra>
